<compile_context>
chip_gen: v7x
topology: tpu7x:2x2x1
jax: 0.10.0
libtpu: 0.0.40
codegen_flags: <defaults>
</compile_context>

<pallas_src>
import functools

import jax
import jax.numpy as jnp
from jax.experimental import pallas as pl
from jax.experimental.pallas import tpu as pltpu


# ----------------------------- math helpers --------------------------------

_SQRT_2_OVER_PI = 0.7978845608028654


def _gelu(x):
    # tanh-approximate GELU: routes the transcendental to the EUP slot instead
    # of a long f32 erf polynomial on the VPU (biggest win on v5e).
    # TODO(synk): torch.nn.GELU() default is the exact erf form; the tanh
    # approximation deviates by <~1e-3, inside the check tolerance used here.
    x3 = x * x * x
    return 0.5 * x * (1.0 + jnp.tanh(_SQRT_2_OVER_PI * (x + 0.044715 * x3)))


def _layernorm(x, gamma, beta, eps=1e-5):
    mu = jnp.mean(x, axis=-1, keepdims=True)
    var = jnp.mean((x - mu) ** 2, axis=-1, keepdims=True)
    return (x - mu) * jax.lax.rsqrt(var + jnp.float32(eps)) * gamma + beta


def _vmem_limit_bytes(working_set_bytes):
    """Scoped-VMEM request: 2x the static working-set estimate, clamped above
    the per-gen scoped defaults and below v7x's 64 MiB physical VMEM."""
    cap = 48 * 1024 * 1024
    try:  # generation-aware ceiling when available
        cap = int(0.75 * pltpu.get_tpu_info().vmem_capacity_bytes)
    except Exception:
        pass
    return int(min(cap, max(32 * 1024 * 1024, 2 * int(working_set_bytes))))


# --------------------- fused mixer stack (all blocks) -----------------------
# grid = (B//Bb, depth); depth is last + "arbitrary" so the [Bb, T, D] output
# block (index depends only on the batch block) stays resident in VMEM and is
# the activation accumulator across layers.

def mixer_stack_kernel(x_ref, vec_ref, w1_ref, w2_ref, wf1_ref, wf2_ref, o_ref):
    d = pl.program_id(1)

    @pl.when(d == 0)
    def _():
        # Load the embedding block once per batch block; it then stays resident
        # in VMEM for the whole depth loop.
        o_ref[...] = x_ref[...]

    Bb, T, D = o_ref.shape
    inner = wf1_ref.shape[2]

    vec = vec_ref[0]                                # (8, max(D, inner)) packed
    seq_g, seq_b = vec[0:1, :D], vec[1:2, :D]
    pat_g, pat_b = vec[2:3, :D], vec[3:4, :D]
    bf1, bf2 = vec[4:5, :inner], vec[5:6, :D]

    # view the resident block as (Bb*T, D) rows (sublane-aligned concat).
    x = jnp.concatenate([o_ref[bb] for bb in range(Bb)], axis=0)     # f32

    # ---- token mixing: causal Conv1d(T, T, 1) pair over the token axis ----
    xn = _layernorm(x, seq_g, seq_b)
    # fuse the Bb rows along the feature (lane) axis so the two (T,T) matmuls
    # run with N = Bb*D and fill the 256-wide MXU on v6e/v7x.
    xn_cat = jnp.concatenate(
        [xn[bb * T:(bb + 1) * T, :] for bb in range(Bb)], axis=1
    ).astype(jnp.bfloat16)                                           # (T, Bb*D)
    h = jnp.dot(w1_ref[0], xn_cat, preferred_element_type=jnp.float32)
    h = _gelu(h)
    h = jnp.dot(w2_ref[0], h.astype(jnp.bfloat16),
                preferred_element_type=jnp.float32)                  # (T, Bb*D)
    h = jnp.concatenate(
        [h[:, bb * D:(bb + 1) * D] for bb in range(Bb)], axis=0)     # (Bb*T, D)
    x = x + h                                                        # residual

    # ---- channel mixing: FeedForward(dim, expansion=4) over features ----
    xn = _layernorm(x, pat_g, pat_b)
    hf = jnp.dot(xn.astype(jnp.bfloat16), wf1_ref[0],
                 preferred_element_type=jnp.float32) + bf1
    hf = _gelu(hf)
    hf = jnp.dot(hf.astype(jnp.bfloat16), wf2_ref[0],
                 preferred_element_type=jnp.float32) + bf2
    x = x + hf                                                       # residual

    for bb in range(Bb):
        o_ref[bb] = x[bb * T:(bb + 1) * T, :]


def mixer_stack(x, params, block_b):
    B, T, D = x.shape
    depth = params["w1c"].shape[0]
    inner = params["wf1"].shape[2]
    maxw = params["vecs"].shape[2]
    Bb = block_b

    act = Bb * T * D * 4
    wts = (2 * T * T + 2 * D * inner) * 2 + 8 * maxw * 4
    work = 4 * act + 2 * wts + 2 * Bb * T * inner * 4    # blocks (x2 buf) + f32 temps

    # TODO(synk): for T >= ~1024 the (T,T) conv weights should additionally be
    # tiled over T (and their lower-triangular structure used to skip j>i
    # tiles); at the module's T=512 they fit the scoped VMEM limit as-is.
    return pl.pallas_call(
        mixer_stack_kernel,
        out_shape=jax.ShapeDtypeStruct((B, T, D), jnp.float32),
        grid=(B // Bb, depth),
        in_specs=[
            pl.BlockSpec((Bb, T, D), lambda b, d: (b, 0, 0)),      # embedding (aliased w/ out)
            pl.BlockSpec((1, 8, maxw), lambda b, d: (d, 0, 0)),    # packed LN/bias vectors
            pl.BlockSpec((1, T, T), lambda b, d: (d, 0, 0)),       # conv W1 (tril, bf16)
            pl.BlockSpec((1, T, T), lambda b, d: (d, 0, 0)),       # conv W2 (tril, bf16)
            pl.BlockSpec((1, D, inner), lambda b, d: (d, 0, 0)),   # FF W1 (bf16)
            pl.BlockSpec((1, inner, D), lambda b, d: (d, 0, 0)),   # FF W2 (bf16)
        ],
        out_specs=pl.BlockSpec((Bb, T, D), lambda b, d: (b, 0, 0)),
        input_output_aliases={0: 0},
        compiler_params=pltpu.CompilerParams(
            dimension_semantics=("parallel", "arbitrary"),
            vmem_limit_bytes=_vmem_limit_bytes(work)),
    )(x, params["vecs"], params["w1c"], params["w2c"],
      params["wf1"], params["wf2"])


# ------------------- fused lm_head + cross-entropy kernel -------------------
# grid = (B//Bb, V_pad // TV); vocab axis last + "arbitrary".  Per V tile we
# compute a [TV, T] logits block per row -- written straight to the [B, V, T]
# output (so no post-kernel transpose/slice) -- and fold it into online-LSE /
# target-logit accumulators held in VMEM scratch.  On the last tile we emit
# each row's loss sum and valid-token count.

def lm_head_ce_kernel(x_ref, w_ref, lab_ref, logits_ref, loss_ref,
                      m_ref, l_ref, t_ref, *, v_true, has_padding):
    vj = pl.program_id(1)
    Bb = x_ref.shape[0]
    tv = w_ref.shape[0]

    @pl.when(vj == 0)
    def _():
        m_ref[...] = jnp.full(m_ref.shape, -jnp.inf, m_ref.dtype)
        l_ref[...] = jnp.zeros(l_ref.shape, l_ref.dtype)
        t_ref[...] = jnp.zeros(t_ref.shape, t_ref.dtype)

    w = w_ref[...]                                              # (tv, D) bf16
    col = vj * tv + jax.lax.broadcasted_iota(jnp.int32, (tv, 1), 0)

    for bb in range(Bb):
        x = x_ref[bb]                                           # (D, T) bf16
        logits = jnp.dot(w, x, preferred_element_type=jnp.float32)   # (tv, T)
        logits_ref[bb] = logits

        # Padding columns (zero weight rows) can only appear in the LAST vocab
        # tile (v_pad - v_true < 128 <= tv), so tile 0 always contains real
        # vocab and the running max is finite from the first step: the
        # exp(m_prev - m_new) rescale below can never produce NaN.
        if has_padding:
            lg = jnp.where(col < v_true, logits, -jnp.inf)
        else:
            lg = logits

        # online log-sum-exp over the vocab (sublane) axis, f32.
        m_prev = m_ref[bb]
        m_new = jnp.maximum(m_prev, jnp.max(lg, axis=0, keepdims=True))
        l_ref[bb] = (jnp.exp(m_prev - m_new) * l_ref[bb]
                     + jnp.sum(jnp.exp(lg - m_new), axis=0, keepdims=True))
        m_ref[bb] = m_new

        # target-logit accumulation (each target id hits exactly one V tile).
        hit = (col == lab_ref[bb]).astype(jnp.float32)          # (tv, T)
        t_ref[bb] += jnp.sum(logits * hit, axis=0, keepdims=True)

    @pl.when(vj == pl.num_programs(1) - 1)
    def _():
        for bb in range(Bb):
            lse = m_ref[bb] + jnp.log(l_ref[bb])                # (1, T)
            tpos = jax.lax.broadcasted_iota(jnp.int32, lse.shape, 1)
            # last token has no next-token target; also honor ignore_index=-100
            valid = jnp.logical_and(tpos < lse.shape[1] - 1,
                                    lab_ref[bb] != -100).astype(jnp.float32)
            loss_sum = jnp.sum((lse - t_ref[bb]) * valid)
            count = jnp.sum(valid)
            lane = jax.lax.broadcasted_iota(jnp.int32, (1, 128), 1)
            loss_ref[bb] = jnp.where(lane == 0, loss_sum,
                                     jnp.where(lane == 1, count, 0.0))


def _pick_vocab_tile(v_pad, block_b, T, D, budget_bytes=8 << 20):
    # Per-tile VMEM: double-buffered logits output + double-buffered weight
    # tile.  The ~8 MiB budget is conservative enough for v5e's 16 MiB scoped
    # default and for v7x's 64 MiB physical VMEM.
    best = 128
    for tv in (256, 512, 1024, 2048):
        if v_pad % tv:
            continue
        need = 2 * block_b * tv * T * 4 + 2 * tv * D * 2
        if need <= budget_bytes:
            best = tv
    return best


def lm_head_ce(x_t, w_pad, lab_shift, v_true, block_b):
    B, D, T = x_t.shape
    v_pad = w_pad.shape[0]
    Bb = block_b
    tv = _pick_vocab_tile(v_pad, Bb, T, D)
    nv = v_pad // tv

    kernel = functools.partial(lm_head_ce_kernel, v_true=v_true,
                               has_padding=(v_pad != v_true))
    work = (2 * Bb * D * T * 2 + 2 * tv * D * 2
            + 3 * Bb * tv * T * 4 + 3 * Bb * T * 4)

    # TODO(synk): for B == 1 add a parallel T-tile grid axis so both v7x
    # TensorCores stay busy.
    return pl.pallas_call(
        kernel,
        out_shape=(
            jax.ShapeDtypeStruct((B, v_true, T), jnp.float32),   # logits, 'b e t' layout
            jax.ShapeDtypeStruct((B, 1, 128), jnp.float32),      # per-row [loss_sum, count]
        ),
        grid=(B // Bb, nv),
        in_specs=[
            pl.BlockSpec((Bb, D, T), lambda b, v: (b, 0, 0)),    # activations (resident over V)
            pl.BlockSpec((tv, D), lambda b, v: (v, 0)),          # head weight tile (bf16, [V,D])
            pl.BlockSpec((Bb, 1, T), lambda b, v: (b, 0, 0)),    # shifted labels
        ],
        out_specs=(
            pl.BlockSpec((Bb, tv, T), lambda b, v: (b, v, 0)),   # boundary block clipped at V
            pl.BlockSpec((Bb, 1, 128), lambda b, v: (b, 0, 0)),  # per-row loss accumulator
        ),
        scratch_shapes=[
            pltpu.VMEM((Bb, 1, T), jnp.float32),   # running max
            pltpu.VMEM((Bb, 1, T), jnp.float32),   # running sum-exp
            pltpu.VMEM((Bb, 1, T), jnp.float32),   # target logit accumulator
        ],
        compiler_params=pltpu.CompilerParams(
            dimension_semantics=("parallel", "arbitrary"),
            vmem_limit_bytes=_vmem_limit_bytes(work)),
    )(x_t, w_pad, lab_shift)


# ------------------------------- full forward --------------------------------

def language_mixer_forward(input_ids, labels, params, n_vocab):
    # embedding gather (plain JAX glue outside the kernels)
    x = params["wte"][input_ids].astype(jnp.float32)             # [B, T, D]
    B, T, D = x.shape
    block_b = 2 if B % 2 == 0 else 1

    x = mixer_stack(x, params, block_b)                          # fused depth loop

    # labels 'b p t -> b (p t)'; target for position t is labels[:, t+1].
    labels_flat = labels.reshape(labels.shape[0], -1)
    assert labels_flat.shape[1] == T, "labels must flatten to the token length"
    lab_shift = jnp.concatenate(
        [labels_flat[:, 1:], jnp.full((B, 1), -100, labels_flat.dtype)], axis=1
    ).astype(jnp.int32).reshape(B, 1, T)

    # tiny cast+transpose of the activations (B*T*D bf16) so the lm_head kernel
    # emits logits directly in the module's [B, V, T] layout -- this replaces
    # the (much larger) B*T*V f32 post-kernel transpose and the V slice.
    x_t = jnp.transpose(x.astype(jnp.bfloat16), (0, 2, 1))       # [B, D, T]

    logits, loss_parts = lm_head_ce(x_t, params["lm_head_w_pad"], lab_shift,
                                    n_vocab, block_b)
    loss = jnp.sum(loss_parts[:, 0, 0]) / jnp.sum(loss_parts[:, 0, 1])
    return loss, logits                                           # logits: [B, V, T]


# ---------------------------- pure-JAX reference ------------------------------

def forward_ref(input_ids, labels, params, n_vocab):
    x = params["wte"][input_ids].astype(jnp.float32)
    depth = params["w1c"].shape[0]
    D = x.shape[-1]
    inner = params["wf1"].shape[2]
    for d in range(depth):
        v = params["vecs"][d]
        xn = _layernorm(x, v[0, :D], v[1, :D])
        h = jnp.einsum("uv,bvd->bud", params["w1c"][d], xn.astype(jnp.bfloat16),
                       preferred_element_type=jnp.float32)
        h = _gelu(h)
        h = jnp.einsum("uv,bvd->bud", params["w2c"][d], h.astype(jnp.bfloat16),
                       preferred_element_type=jnp.float32)
        x = x + h
        xn = _layernorm(x, v[2, :D], v[3, :D])
        h = jnp.einsum("btd,di->bti", xn.astype(jnp.bfloat16), params["wf1"][d],
                       preferred_element_type=jnp.float32) + v[4, :inner]
        h = _gelu(h)
        h = jnp.einsum("bti,id->btd", h.astype(jnp.bfloat16), params["wf2"][d],
                       preferred_element_type=jnp.float32) + v[5, :D]
        x = x + h
    w = params["lm_head_w_pad"][:n_vocab]                        # [V, D] bf16
    logits = jnp.einsum("btd,vd->btv", x.astype(jnp.bfloat16), w,
                        preferred_element_type=jnp.float32)
    labels_flat = labels.reshape(labels.shape[0], -1)
    logp = jax.nn.log_softmax(logits[:, :-1, :], axis=-1)
    nll = -jnp.take_along_axis(
        logp, labels_flat[:, 1:, None].astype(jnp.int32), axis=-1)
    return jnp.mean(nll), jnp.transpose(logits, (0, 2, 1))


# ------------------------------- parameter init -------------------------------

def init_params(key, n_vocab, dim, length, depth, ff_expansion=4):
    inner = dim * ff_expansion
    maxw = max(dim, inner)
    keys = jax.random.split(key, 2 + depth)

    wte = jax.random.normal(keys[0], (n_vocab, dim), jnp.float32)

    # nn.Linear(dim, n_vocab, bias=False).weight is [V, D]; keep that layout,
    # bf16, zero-padded along V to a lane-dense multiple of 128 so every vocab
    # tile is uniform (padded logits are exactly 0, masked out of the LSE and
    # clipped from the output).
    lm_w = jax.random.normal(keys[1], (n_vocab, dim), jnp.float32) / jnp.sqrt(dim)
    v_pad = ((n_vocab + 127) // 128) * 128
    lm_head_w_pad = jnp.zeros((v_pad, dim), jnp.bfloat16)
    lm_head_w_pad = lm_head_w_pad.at[:n_vocab].set(lm_w.astype(jnp.bfloat16))

    # packed per-layer vectors: rows 0/1 seq-LN gamma/beta, 2/3 patch-LN
    # gamma/beta, 4 FF bias1 (inner wide), 5 FF bias2, rows 6/7 padding.
    vecs = jnp.zeros((depth, 8, maxw), jnp.float32)
    vecs = vecs.at[:, 0, :dim].set(1.0)
    vecs = vecs.at[:, 2, :dim].set(1.0)

    w1c, w2c, wf1, wf2 = [], [], [], []
    for i in range(depth):
        bk = jax.random.split(keys[2 + i], 6)
        # Conv1d(length, length, 1, bias=False) weights, causally (tril) masked
        # exactly as MixerBlock.forward masks them in place every call.
        w1c.append(jnp.tril(jax.random.normal(bk[0], (length, length), jnp.float32)
                            / jnp.sqrt(length)))
        w2c.append(jnp.tril(jax.random.normal(bk[1], (length, length), jnp.float32)
                            / jnp.sqrt(length)))
        wf1.append(jax.random.normal(bk[2], (dim, inner), jnp.float32) / jnp.sqrt(dim))
        wf2.append(jax.random.normal(bk[3], (inner, dim), jnp.float32) / jnp.sqrt(inner))
        vecs = vecs.at[i, 4, :inner].set(
            0.02 * jax.random.normal(bk[4], (inner,), jnp.float32))
        vecs = vecs.at[i, 5, :dim].set(
            0.02 * jax.random.normal(bk[5], (dim,), jnp.float32))

    return dict(
        wte=wte,
        lm_head_w_pad=lm_head_w_pad,
        vecs=vecs,
        w1c=jnp.stack(w1c).astype(jnp.bfloat16),
        w2c=jnp.stack(w2c).astype(jnp.bfloat16),
        wf1=jnp.stack(wf1).astype(jnp.bfloat16),
        wf2=jnp.stack(wf2).astype(jnp.bfloat16),
    )


# ----------------------------------- main ------------------------------------

if __name__ == "__main__":
    # Small analogue of (dim=128, tokenized_length=512, n_vocab~4k): keep the
    # real (lane-aligned) feature width but shrink T/depth/vocab.  V=300 is
    # deliberately NOT a multiple of 128 so vocab padding, the LSE mask and the
    # clipped boundary logits block are all exercised (3 vocab tiles).
    B, T, D, V, DEPTH = 4, 64, 128, 300, 2

    key = jax.random.PRNGKey(0)
    kp, ki = jax.random.split(key)
    params = init_params(kp, n_vocab=V, dim=D, length=T, depth=DEPTH)

    input_ids = jax.random.randint(ki, (B, T), 0, V, dtype=jnp.int32)
    labels = input_ids.reshape(B, 1, T)   # 'b p t' with p=1, as the module expects

    fwd = jax.jit(functools.partial(language_mixer_forward, n_vocab=V))
    loss, output = fwd(input_ids, labels, params)
    loss, output = jax.block_until_ready((loss, output))

    ref_loss, ref_out = forward_ref(input_ids, labels, params, V)

    assert output.shape == (B, V, T)
    assert bool(jnp.isfinite(loss))
    assert bool(jnp.allclose(output, ref_out, rtol=2e-2, atol=2e-2))
    assert bool(jnp.allclose(loss, ref_loss, rtol=2e-2, atol=2e-2))
    print("KERNEL_OK")
</pallas_src>

<mosaic_0001>
module attributes {stable_mosaic.version = 11 : i64} {
  func.func @mixer_stack_kernel(%arg0: i32, %arg1: i32, %arg2: memref<2x64x128xf32, #tpu.memory_space<vmem>>, %arg3: memref<1x8x512xf32, #tpu.memory_space<vmem>>, %arg4: memref<1x64x64xbf16, #tpu.memory_space<vmem>>, %arg5: memref<1x64x64xbf16, #tpu.memory_space<vmem>>, %arg6: memref<1x128x512xbf16, #tpu.memory_space<vmem>>, %arg7: memref<1x512x128xbf16, #tpu.memory_space<vmem>>, %arg8: memref<2x64x128xf32, #tpu.memory_space<vmem>>) attributes {dimension_semantics = [#tpu.dimension_semantics<parallel>, #tpu.dimension_semantics<arbitrary>], iteration_bounds = array<i64: 2, 2>, scalar_prefetch = 0 : i64, scratch_operands = 0 : i64, tpu.core_type = #tpu.core_type<tc>, window_params = [{transform_indices = @transform_0, window_bounds = array<i64: 2, 64, 128>}, {transform_indices = @transform_1, window_bounds = array<i64: 1, 8, 512>}, {transform_indices = @transform_2, window_bounds = array<i64: 1, 64, 64>}, {transform_indices = @transform_3, window_bounds = array<i64: 1, 64, 64>}, {transform_indices = @transform_4, window_bounds = array<i64: 1, 128, 512>}, {transform_indices = @transform_5, window_bounds = array<i64: 1, 512, 128>}, {transform_indices = @transform_6, window_bounds = array<i64: 2, 64, 128>}]} {
    %c0_i32 = arith.constant 0 : i32
    %0 = arith.cmpi eq, %arg1, %c0_i32 : i32
    %1 = arith.extui %0 : i1 to i32
    %c0_i32_0 = arith.constant 0 : i32
    %2 = arith.cmpi ne, %1, %c0_i32_0 : i32
    scf.if %2 {
      %c0_47 = arith.constant 0 : index
      %c0_48 = arith.constant 0 : index
      %c0_49 = arith.constant 0 : index
      %122 = vector.load %arg2[%c0_47, %c0_48, %c0_49] : memref<2x64x128xf32, #tpu.memory_space<vmem>>, vector<2x64x128xf32>
      %c0_50 = arith.constant 0 : index
      %c0_51 = arith.constant 0 : index
      %c0_52 = arith.constant 0 : index
      %123 = vector.load %arg8[%c0_50, %c0_51, %c0_52] : memref<2x64x128xf32, #tpu.memory_space<vmem>>, vector<2x64x128xf32>
      tpu.vector_store %arg8[%c0_50, %c0_51, %c0_52], %122 {strides = array<i32>} : memref<2x64x128xf32, #tpu.memory_space<vmem>>, vector<2x64x128xf32>,
    } else {
    }
    %c0 = arith.constant 0 : index
    %c0_1 = arith.constant 0 : index
    %c0_2 = arith.constant 0 : index
    %3 = vector.load %arg3[%c0, %c0_1, %c0_2] : memref<1x8x512xf32, #tpu.memory_space<vmem>>, vector<1x8x512xf32>
    %4 = vector.shape_cast %3 : vector<1x8x512xf32> to vector<8x512xf32>
    %5 = vector.extract_strided_slice %4 {offsets = [0, 0], sizes = [1, 128], strides = [1, 1]} : vector<8x512xf32> to vector<1x128xf32>
    %6 = vector.extract_strided_slice %4 {offsets = [1, 0], sizes = [1, 128], strides = [1, 1]} : vector<8x512xf32> to vector<1x128xf32>
    %7 = vector.extract_strided_slice %4 {offsets = [2, 0], sizes = [1, 128], strides = [1, 1]} : vector<8x512xf32> to vector<1x128xf32>
    %8 = vector.extract_strided_slice %4 {offsets = [3, 0], sizes = [1, 128], strides = [1, 1]} : vector<8x512xf32> to vector<1x128xf32>
    %9 = vector.extract_strided_slice %4 {offsets = [4, 0], sizes = [1, 512], strides = [1, 1]} : vector<8x512xf32> to vector<1x512xf32>
    %10 = vector.extract_strided_slice %4 {offsets = [5, 0], sizes = [1, 128], strides = [1, 1]} : vector<8x512xf32> to vector<1x128xf32>
    %c0_3 = arith.constant 0 : index
    %c0_4 = arith.constant 0 : index
    %c0_5 = arith.constant 0 : index
    %11 = vector.load %arg8[%c0_3, %c0_4, %c0_5] : memref<2x64x128xf32, #tpu.memory_space<vmem>>, vector<1x64x128xf32>
    %12 = vector.shape_cast %11 : vector<1x64x128xf32> to vector<64x128xf32>
    %c1 = arith.constant 1 : index
    %c0_6 = arith.constant 0 : index
    %c0_7 = arith.constant 0 : index
    %13 = vector.load %arg8[%c1, %c0_6, %c0_7] : memref<2x64x128xf32, #tpu.memory_space<vmem>>, vector<1x64x128xf32>
    %14 = vector.shape_cast %13 : vector<1x64x128xf32> to vector<64x128xf32>
    %15 = tpu.concatenate %12, %14 in 0 : vector<64x128xf32>, vector<64x128xf32> -> vector<128x128xf32>
    %cst = arith.constant dense<0.000000e+00> : vector<128xf32>
    %16 = vector.multi_reduction <add>, %15, %cst [1] : vector<128x128xf32> to vector<128xf32>
    %17 = vector.shape_cast %16 : vector<128xf32> to vector<128x1xf32>
    %cst_8 = arith.constant 1.280000e+02 : f32
    %18 = vector.broadcast %cst_8 : f32 to vector<128x1xf32>
    %19 = arith.divf %17, %18 : vector<128x1xf32>
    %20 = vector.broadcast %19 : vector<128x1xf32> to vector<128x128xf32>
    %21 = arith.subf %15, %20 : vector<128x128xf32>
    %22 = arith.mulf %21, %21 : vector<128x128xf32>
    %cst_9 = arith.constant dense<0.000000e+00> : vector<128xf32>
    %23 = vector.multi_reduction <add>, %22, %cst_9 [1] : vector<128x128xf32> to vector<128xf32>
    %24 = vector.shape_cast %23 : vector<128xf32> to vector<128x1xf32>
    %cst_10 = arith.constant 1.280000e+02 : f32
    %25 = vector.broadcast %cst_10 : f32 to vector<128x1xf32>
    %26 = arith.divf %24, %25 : vector<128x1xf32>
    %27 = vector.broadcast %19 : vector<128x1xf32> to vector<128x128xf32>
    %28 = arith.subf %15, %27 : vector<128x128xf32>
    %cst_11 = arith.constant 9.99999974E-6 : f32
    %29 = vector.broadcast %cst_11 : f32 to vector<128x1xf32>
    %30 = arith.addf %26, %29 : vector<128x1xf32>
    %31 = math.rsqrt %30 : vector<128x1xf32>
    %32 = vector.broadcast %31 : vector<128x1xf32> to vector<128x128xf32>
    %33 = arith.mulf %28, %32 : vector<128x128xf32>
    %34 = vector.broadcast %5 : vector<1x128xf32> to vector<128x128xf32>
    %35 = arith.mulf %33, %34 : vector<128x128xf32>
    %36 = vector.broadcast %6 : vector<1x128xf32> to vector<128x128xf32>
    %37 = arith.addf %35, %36 : vector<128x128xf32>
    %38 = vector.extract_strided_slice %37 {offsets = [0, 0], sizes = [64, 128], strides = [1, 1]} : vector<128x128xf32> to vector<64x128xf32>
    %39 = vector.extract_strided_slice %37 {offsets = [64, 0], sizes = [64, 128], strides = [1, 1]} : vector<128x128xf32> to vector<64x128xf32>
    %40 = tpu.concatenate %38, %39 in 1 : vector<64x128xf32>, vector<64x128xf32> -> vector<64x256xf32>
    %41 = arith.truncf %40 : vector<64x256xf32> to vector<64x256xbf16>
    %c0_12 = arith.constant 0 : index
    %c0_13 = arith.constant 0 : index
    %c0_14 = arith.constant 0 : index
    %42 = vector.load %arg4[%c0_12, %c0_13, %c0_14] : memref<1x64x64xbf16, #tpu.memory_space<vmem>>, vector<1x64x64xbf16>
    %43 = vector.shape_cast %42 : vector<1x64x64xbf16> to vector<64x64xbf16>
    %cst_15 = arith.constant dense<0.000000e+00> : vector<64x256xf32>
    %44 = tpu.matmul %43, %41, %cst_15 {dimension_numbers = #tpu.dot_dimension_numbers<[1], [0], [0], [1], [0, 0, 1, 1], [], []>} : vector<64x64xbf16>, vector<64x256xbf16>, vector<64x256xf32> -> vector<64x256xf32>
    %45 = arith.mulf %44, %44 : vector<64x256xf32>
    %46 = arith.mulf %45, %44 : vector<64x256xf32>
    %cst_16 = arith.constant 5.000000e-01 : f32
    %47 = vector.broadcast %cst_16 : f32 to vector<64x256xf32>
    %48 = arith.mulf %47, %44 : vector<64x256xf32>
    %cst_17 = arith.constant 4.471500e-02 : f32
    %49 = vector.broadcast %cst_17 : f32 to vector<64x256xf32>
    %50 = arith.mulf %49, %46 : vector<64x256xf32>
    %51 = arith.addf %44, %50 : vector<64x256xf32>
    %cst_18 = arith.constant 0.797884583 : f32
    %52 = vector.broadcast %cst_18 : f32 to vector<64x256xf32>
    %53 = arith.mulf %52, %51 : vector<64x256xf32>
    %54 = math.tanh %53 : vector<64x256xf32>
    %cst_19 = arith.constant 1.000000e+00 : f32
    %55 = vector.broadcast %cst_19 : f32 to vector<64x256xf32>
    %56 = arith.addf %55, %54 : vector<64x256xf32>
    %57 = arith.mulf %48, %56 : vector<64x256xf32>
    %c0_20 = arith.constant 0 : index
    %c0_21 = arith.constant 0 : index
    %c0_22 = arith.constant 0 : index
    %58 = vector.load %arg5[%c0_20, %c0_21, %c0_22] : memref<1x64x64xbf16, #tpu.memory_space<vmem>>, vector<1x64x64xbf16>
    %59 = vector.shape_cast %58 : vector<1x64x64xbf16> to vector<64x64xbf16>
    %60 = arith.truncf %57 : vector<64x256xf32> to vector<64x256xbf16>
    %cst_23 = arith.constant dense<0.000000e+00> : vector<64x256xf32>
    %61 = tpu.matmul %59, %60, %cst_23 {dimension_numbers = #tpu.dot_dimension_numbers<[1], [0], [0], [1], [0, 0, 1, 1], [], []>} : vector<64x64xbf16>, vector<64x256xbf16>, vector<64x256xf32> -> vector<64x256xf32>
    %62 = vector.extract_strided_slice %61 {offsets = [0, 0], sizes = [64, 128], strides = [1, 1]} : vector<64x256xf32> to vector<64x128xf32>
    %63 = vector.extract_strided_slice %61 {offsets = [0, 128], sizes = [64, 128], strides = [1, 1]} : vector<64x256xf32> to vector<64x128xf32>
    %64 = tpu.concatenate %62, %63 in 0 : vector<64x128xf32>, vector<64x128xf32> -> vector<128x128xf32>
    %65 = arith.addf %15, %64 : vector<128x128xf32>
    %cst_24 = arith.constant dense<0.000000e+00> : vector<128xf32>
    %66 = vector.multi_reduction <add>, %65, %cst_24 [1] : vector<128x128xf32> to vector<128xf32>
    %67 = vector.shape_cast %66 : vector<128xf32> to vector<128x1xf32>
    %cst_25 = arith.constant 1.280000e+02 : f32
    %68 = vector.broadcast %cst_25 : f32 to vector<128x1xf32>
    %69 = arith.divf %67, %68 : vector<128x1xf32>
    %70 = vector.broadcast %69 : vector<128x1xf32> to vector<128x128xf32>
    %71 = arith.subf %65, %70 : vector<128x128xf32>
    %72 = arith.mulf %71, %71 : vector<128x128xf32>
    %cst_26 = arith.constant dense<0.000000e+00> : vector<128xf32>
    %73 = vector.multi_reduction <add>, %72, %cst_26 [1] : vector<128x128xf32> to vector<128xf32>
    %74 = vector.shape_cast %73 : vector<128xf32> to vector<128x1xf32>
    %cst_27 = arith.constant 1.280000e+02 : f32
    %75 = vector.broadcast %cst_27 : f32 to vector<128x1xf32>
    %76 = arith.divf %74, %75 : vector<128x1xf32>
    %77 = vector.broadcast %69 : vector<128x1xf32> to vector<128x128xf32>
    %78 = arith.subf %65, %77 : vector<128x128xf32>
    %cst_28 = arith.constant 9.99999974E-6 : f32
    %79 = vector.broadcast %cst_28 : f32 to vector<128x1xf32>
    %80 = arith.addf %76, %79 : vector<128x1xf32>
    %81 = math.rsqrt %80 : vector<128x1xf32>
    %82 = vector.broadcast %81 : vector<128x1xf32> to vector<128x128xf32>
    %83 = arith.mulf %78, %82 : vector<128x128xf32>
    %84 = vector.broadcast %7 : vector<1x128xf32> to vector<128x128xf32>
    %85 = arith.mulf %83, %84 : vector<128x128xf32>
    %86 = vector.broadcast %8 : vector<1x128xf32> to vector<128x128xf32>
    %87 = arith.addf %85, %86 : vector<128x128xf32>
    %88 = arith.truncf %87 : vector<128x128xf32> to vector<128x128xbf16>
    %c0_29 = arith.constant 0 : index
    %c0_30 = arith.constant 0 : index
    %c0_31 = arith.constant 0 : index
    %89 = vector.load %arg6[%c0_29, %c0_30, %c0_31] : memref<1x128x512xbf16, #tpu.memory_space<vmem>>, vector<1x128x512xbf16>
    %90 = vector.shape_cast %89 : vector<1x128x512xbf16> to vector<128x512xbf16>
    %cst_32 = arith.constant dense<0.000000e+00> : vector<128x512xf32>
    %91 = tpu.matmul %88, %90, %cst_32 {dimension_numbers = #tpu.dot_dimension_numbers<[1], [0], [0], [1], [0, 0, 1, 1], [], []>} : vector<128x128xbf16>, vector<128x512xbf16>, vector<128x512xf32> -> vector<128x512xf32>
    %92 = vector.broadcast %9 : vector<1x512xf32> to vector<128x512xf32>
    %93 = arith.addf %91, %92 : vector<128x512xf32>
    %94 = arith.mulf %93, %93 : vector<128x512xf32>
    %95 = arith.mulf %94, %93 : vector<128x512xf32>
    %cst_33 = arith.constant 5.000000e-01 : f32
    %96 = vector.broadcast %cst_33 : f32 to vector<128x512xf32>
    %97 = arith.mulf %96, %93 : vector<128x512xf32>
    %cst_34 = arith.constant 4.471500e-02 : f32
    %98 = vector.broadcast %cst_34 : f32 to vector<128x512xf32>
    %99 = arith.mulf %98, %95 : vector<128x512xf32>
    %100 = arith.addf %93, %99 : vector<128x512xf32>
    %cst_35 = arith.constant 0.797884583 : f32
    %101 = vector.broadcast %cst_35 : f32 to vector<128x512xf32>
    %102 = arith.mulf %101, %100 : vector<128x512xf32>
    %103 = math.tanh %102 : vector<128x512xf32>
    %cst_36 = arith.constant 1.000000e+00 : f32
    %104 = vector.broadcast %cst_36 : f32 to vector<128x512xf32>
    %105 = arith.addf %104, %103 : vector<128x512xf32>
    %106 = arith.mulf %97, %105 : vector<128x512xf32>
    %107 = arith.truncf %106 : vector<128x512xf32> to vector<128x512xbf16>
    %c0_37 = arith.constant 0 : index
    %c0_38 = arith.constant 0 : index
    %c0_39 = arith.constant 0 : index
    %108 = vector.load %arg7[%c0_37, %c0_38, %c0_39] : memref<1x512x128xbf16, #tpu.memory_space<vmem>>, vector<1x512x128xbf16>
    %109 = vector.shape_cast %108 : vector<1x512x128xbf16> to vector<512x128xbf16>
    %cst_40 = arith.constant dense<0.000000e+00> : vector<128x128xf32>
    %110 = tpu.matmul %107, %109, %cst_40 {dimension_numbers = #tpu.dot_dimension_numbers<[1], [0], [0], [1], [0, 0, 1, 1], [], []>} : vector<128x512xbf16>, vector<512x128xbf16>, vector<128x128xf32> -> vector<128x128xf32>
    %111 = vector.broadcast %10 : vector<1x128xf32> to vector<128x128xf32>
    %112 = arith.addf %110, %111 : vector<128x128xf32>
    %113 = arith.addf %65, %112 : vector<128x128xf32>
    %114 = vector.extract_strided_slice %113 {offsets = [0, 0], sizes = [64, 128], strides = [1, 1]} : vector<128x128xf32> to vector<64x128xf32>
    %c0_41 = arith.constant 0 : index
    %c0_42 = arith.constant 0 : index
    %c0_43 = arith.constant 0 : index
    %115 = vector.load %arg8[%c0_41, %c0_42, %c0_43] : memref<2x64x128xf32, #tpu.memory_space<vmem>>, vector<1x64x128xf32>
    %116 = vector.shape_cast %115 : vector<1x64x128xf32> to vector<64x128xf32>
    %117 = vector.shape_cast %114 : vector<64x128xf32> to vector<1x64x128xf32>
    tpu.vector_store %arg8[%c0_41, %c0_42, %c0_43], %117 {strides = array<i32>} : memref<2x64x128xf32, #tpu.memory_space<vmem>>, vector<1x64x128xf32>,
    %118 = vector.extract_strided_slice %113 {offsets = [64, 0], sizes = [64, 128], strides = [1, 1]} : vector<128x128xf32> to vector<64x128xf32>
    %c1_44 = arith.constant 1 : index
    %c0_45 = arith.constant 0 : index
    %c0_46 = arith.constant 0 : index
    %119 = vector.load %arg8[%c1_44, %c0_45, %c0_46] : memref<2x64x128xf32, #tpu.memory_space<vmem>>, vector<1x64x128xf32>
    %120 = vector.shape_cast %119 : vector<1x64x128xf32> to vector<64x128xf32>
    %121 = vector.shape_cast %118 : vector<64x128xf32> to vector<1x64x128xf32>
    tpu.vector_store %arg8[%c1_44, %c0_45, %c0_46], %121 {strides = array<i32>} : memref<2x64x128xf32, #tpu.memory_space<vmem>>, vector<1x64x128xf32>,
    return
  }
  func.func @transform_0(%arg0: i32, %arg1: i32) -> (i32, i32, i32) {
    %c0_i32 = arith.constant 0 : i32
    %c0_i32_0 = arith.constant 0 : i32
    %c0_i32_1 = arith.constant 0 : i32
    return %arg0, %c0_i32, %c0_i32_0 : i32, i32, i32
  }
  func.func @transform_1(%arg0: i32, %arg1: i32) -> (i32, i32, i32) {
    %c0_i32 = arith.constant 0 : i32
    %c0_i32_0 = arith.constant 0 : i32
    %c0_i32_1 = arith.constant 0 : i32
    return %arg1, %c0_i32, %c0_i32_0 : i32, i32, i32
  }
  func.func @transform_2(%arg0: i32, %arg1: i32) -> (i32, i32, i32) {
    %c0_i32 = arith.constant 0 : i32
    %c0_i32_0 = arith.constant 0 : i32
    %c0_i32_1 = arith.constant 0 : i32
    return %arg1, %c0_i32, %c0_i32_0 : i32, i32, i32
  }
  func.func @transform_3(%arg0: i32, %arg1: i32) -> (i32, i32, i32) {
    %c0_i32 = arith.constant 0 : i32
    %c0_i32_0 = arith.constant 0 : i32
    %c0_i32_1 = arith.constant 0 : i32
    return %arg1, %c0_i32, %c0_i32_0 : i32, i32, i32
  }
  func.func @transform_4(%arg0: i32, %arg1: i32) -> (i32, i32, i32) {
    %c0_i32 = arith.constant 0 : i32
    %c0_i32_0 = arith.constant 0 : i32
    %c0_i32_1 = arith.constant 0 : i32
    return %arg1, %c0_i32, %c0_i32_0 : i32, i32, i32
  }
  func.func @transform_5(%arg0: i32, %arg1: i32) -> (i32, i32, i32) {
    %c0_i32 = arith.constant 0 : i32
    %c0_i32_0 = arith.constant 0 : i32
    %c0_i32_1 = arith.constant 0 : i32
    return %arg1, %c0_i32, %c0_i32_0 : i32, i32, i32
  }
  func.func @transform_6(%arg0: i32, %arg1: i32) -> (i32, i32, i32) {
    %c0_i32 = arith.constant 0 : i32
    %c0_i32_0 = arith.constant 0 : i32
    %c0_i32_1 = arith.constant 0 : i32
    return %arg0, %c0_i32, %c0_i32_0 : i32, i32, i32
  }
}

module attributes {stable_mosaic.version = 11 : i64} {
  func.func @lm_head_ce_kernel(%arg0: i32, %arg1: i32, %arg2: memref<2x128x64xbf16, #tpu.memory_space<vmem>>, %arg3: memref<128x128xbf16, #tpu.memory_space<vmem>>, %arg4: memref<2x1x64xi32, #tpu.memory_space<vmem>>, %arg5: memref<2x128x64xf32, #tpu.memory_space<vmem>>, %arg6: memref<2x1x128xf32, #tpu.memory_space<vmem>>, %arg7: memref<2x1x64xf32, #tpu.memory_space<vmem>>, %arg8: memref<2x1x64xf32, #tpu.memory_space<vmem>>, %arg9: memref<2x1x64xf32, #tpu.memory_space<vmem>>) attributes {dimension_semantics = [#tpu.dimension_semantics<parallel>, #tpu.dimension_semantics<arbitrary>], iteration_bounds = array<i64: 2, 3>, scalar_prefetch = 0 : i64, scratch_operands = 3 : i64, tpu.core_type = #tpu.core_type<tc>, window_params = [{transform_indices = @transform_0, window_bounds = array<i64: 2, 128, 64>}, {transform_indices = @transform_1, window_bounds = array<i64: 128, 128>}, {transform_indices = @transform_2, window_bounds = array<i64: 2, 1, 64>}, {transform_indices = @transform_3, window_bounds = array<i64: 2, 128, 64>}, {transform_indices = @transform_4, window_bounds = array<i64: 2, 1, 128>}]} {
    %c0_i32 = arith.constant 0 : i32
    %0 = arith.cmpi eq, %arg1, %c0_i32 : i32
    %1 = arith.extui %0 : i1 to i32
    %c0_i32_0 = arith.constant 0 : i32
    %2 = arith.cmpi ne, %1, %c0_i32_0 : i32
    scf.if %2 {
      %cst_66 = arith.constant 0xFF800000 : f32
      %111 = vector.broadcast %cst_66 : f32 to vector<2x1x64xf32>
      %c0_67 = arith.constant 0 : index
      %c0_68 = arith.constant 0 : index
      %c0_69 = arith.constant 0 : index
      %112 = vector.load %arg7[%c0_67, %c0_68, %c0_69] : memref<2x1x64xf32, #tpu.memory_space<vmem>>, vector<2x1x64xf32>
      tpu.vector_store %arg7[%c0_67, %c0_68, %c0_69], %111 {strides = array<i32>} : memref<2x1x64xf32, #tpu.memory_space<vmem>>, vector<2x1x64xf32>,
      %cst_70 = arith.constant 0.000000e+00 : f32
      %113 = vector.broadcast %cst_70 : f32 to vector<2x1x64xf32>
      %c0_71 = arith.constant 0 : index
      %c0_72 = arith.constant 0 : index
      %c0_73 = arith.constant 0 : index
      %114 = vector.load %arg8[%c0_71, %c0_72, %c0_73] : memref<2x1x64xf32, #tpu.memory_space<vmem>>, vector<2x1x64xf32>
      tpu.vector_store %arg8[%c0_71, %c0_72, %c0_73], %113 {strides = array<i32>} : memref<2x1x64xf32, #tpu.memory_space<vmem>>, vector<2x1x64xf32>,
      %cst_74 = arith.constant 0.000000e+00 : f32
      %115 = vector.broadcast %cst_74 : f32 to vector<2x1x64xf32>
      %c0_75 = arith.constant 0 : index
      %c0_76 = arith.constant 0 : index
      %c0_77 = arith.constant 0 : index
      %116 = vector.load %arg9[%c0_75, %c0_76, %c0_77] : memref<2x1x64xf32, #tpu.memory_space<vmem>>, vector<2x1x64xf32>
      tpu.vector_store %arg9[%c0_75, %c0_76, %c0_77], %115 {strides = array<i32>} : memref<2x1x64xf32, #tpu.memory_space<vmem>>, vector<2x1x64xf32>,
    } else {
    }
    %c0 = arith.constant 0 : index
    %c0_1 = arith.constant 0 : index
    %3 = vector.load %arg3[%c0, %c0_1] : memref<128x128xbf16, #tpu.memory_space<vmem>>, vector<128x128xbf16>
    %c128_i32 = arith.constant 128 : i32
    %4 = arith.muli %arg1, %c128_i32 : i32
    %5 = tpu.iota {dimensions = array<i32: 0>} : vector<128x1xi32>
    %6 = vector.broadcast %4 : i32 to vector<128x1xi32>
    %7 = arith.addi %6, %5 : vector<128x1xi32>
    %c0_2 = arith.constant 0 : index
    %c0_3 = arith.constant 0 : index
    %c0_4 = arith.constant 0 : index
    %8 = vector.load %arg2[%c0_2, %c0_3, %c0_4] : memref<2x128x64xbf16, #tpu.memory_space<vmem>>, vector<1x128x64xbf16>
    %9 = vector.shape_cast %8 : vector<1x128x64xbf16> to vector<128x64xbf16>
    %cst = arith.constant dense<0.000000e+00> : vector<128x64xf32>
    %10 = tpu.matmul %3, %9, %cst {dimension_numbers = #tpu.dot_dimension_numbers<[1], [0], [0], [1], [0, 0, 1, 1], [], []>} : vector<128x128xbf16>, vector<128x64xbf16>, vector<128x64xf32> -> vector<128x64xf32>
    %c0_5 = arith.constant 0 : index
    %c0_6 = arith.constant 0 : index
    %c0_7 = arith.constant 0 : index
    %11 = vector.load %arg5[%c0_5, %c0_6, %c0_7] : memref<2x128x64xf32, #tpu.memory_space<vmem>>, vector<1x128x64xf32>
    %12 = vector.shape_cast %11 : vector<1x128x64xf32> to vector<128x64xf32>
    %13 = vector.shape_cast %10 : vector<128x64xf32> to vector<1x128x64xf32>
    tpu.vector_store %arg5[%c0_5, %c0_6, %c0_7], %13 {strides = array<i32>} : memref<2x128x64xf32, #tpu.memory_space<vmem>>, vector<1x128x64xf32>,
    %c300_i32 = arith.constant 300 : i32
    %14 = vector.broadcast %c300_i32 : i32 to vector<128x1xi32>
    %15 = arith.cmpi slt, %7, %14 : vector<128x1xi32>
    %cst_8 = arith.constant 0xFF800000 : f32
    %16 = vector.shape_cast %15 : vector<128x1xi1> to vector<128x1xi1>
    %17 = vector.broadcast %16 : vector<128x1xi1> to vector<128x64xi1>
    %18 = vector.broadcast %cst_8 : f32 to vector<128x64xf32>
    %19 = arith.select %17, %10, %18 : vector<128x64xi1>, vector<128x64xf32>
    %c0_9 = arith.constant 0 : index
    %c0_10 = arith.constant 0 : index
    %c0_11 = arith.constant 0 : index
    %20 = vector.load %arg7[%c0_9, %c0_10, %c0_11] : memref<2x1x64xf32, #tpu.memory_space<vmem>>, vector<1x1x64xf32>
    %21 = vector.shape_cast %20 : vector<1x1x64xf32> to vector<1x64xf32>
    %cst_12 = arith.constant dense<0xFF800000> : vector<64xf32>
    %22 = vector.multi_reduction <maximumf>, %19, %cst_12 [0] : vector<128x64xf32> to vector<64xf32>
    %23 = vector.shape_cast %22 : vector<64xf32> to vector<1x64xf32>
    %24 = arith.maximumf %21, %23 : vector<1x64xf32>
    %25 = arith.subf %21, %24 : vector<1x64xf32>
    %26 = math.exp %25 : vector<1x64xf32>
    %c0_13 = arith.constant 0 : index
    %c0_14 = arith.constant 0 : index
    %c0_15 = arith.constant 0 : index
    %27 = vector.load %arg8[%c0_13, %c0_14, %c0_15] : memref<2x1x64xf32, #tpu.memory_space<vmem>>, vector<1x1x64xf32>
    %28 = vector.shape_cast %27 : vector<1x1x64xf32> to vector<1x64xf32>
    %29 = arith.mulf %26, %28 : vector<1x64xf32>
    %30 = vector.broadcast %24 : vector<1x64xf32> to vector<128x64xf32>
    %31 = arith.subf %19, %30 : vector<128x64xf32>
    %32 = math.exp %31 : vector<128x64xf32>
    %cst_16 = arith.constant dense<0.000000e+00> : vector<64xf32>
    %33 = vector.multi_reduction <add>, %32, %cst_16 [0] : vector<128x64xf32> to vector<64xf32>
    %34 = vector.shape_cast %33 : vector<64xf32> to vector<1x64xf32>
    %35 = arith.addf %29, %34 : vector<1x64xf32>
    %c0_17 = arith.constant 0 : index
    %c0_18 = arith.constant 0 : index
    %c0_19 = arith.constant 0 : index
    %36 = vector.load %arg8[%c0_17, %c0_18, %c0_19] : memref<2x1x64xf32, #tpu.memory_space<vmem>>, vector<1x1x64xf32>
    %37 = vector.shape_cast %36 : vector<1x1x64xf32> to vector<1x64xf32>
    %38 = vector.shape_cast %35 : vector<1x64xf32> to vector<1x1x64xf32>
    tpu.vector_store %arg8[%c0_17, %c0_18, %c0_19], %38 {strides = array<i32>} : memref<2x1x64xf32, #tpu.memory_space<vmem>>, vector<1x1x64xf32>,
    %c0_20 = arith.constant 0 : index
    %c0_21 = arith.constant 0 : index
    %c0_22 = arith.constant 0 : index
    %39 = vector.load %arg7[%c0_20, %c0_21, %c0_22] : memref<2x1x64xf32, #tpu.memory_space<vmem>>, vector<1x1x64xf32>
    %40 = vector.shape_cast %39 : vector<1x1x64xf32> to vector<1x64xf32>
    %41 = vector.shape_cast %24 : vector<1x64xf32> to vector<1x1x64xf32>
    tpu.vector_store %arg7[%c0_20, %c0_21, %c0_22], %41 {strides = array<i32>} : memref<2x1x64xf32, #tpu.memory_space<vmem>>, vector<1x1x64xf32>,
    %c0_23 = arith.constant 0 : index
    %c0_24 = arith.constant 0 : index
    %c0_25 = arith.constant 0 : index
    %42 = vector.load %arg4[%c0_23, %c0_24, %c0_25] : memref<2x1x64xi32, #tpu.memory_space<vmem>>, vector<1x1x64xi32>
    %43 = vector.shape_cast %42 : vector<1x1x64xi32> to vector<1x64xi32>
    %44 = vector.broadcast %7 : vector<128x1xi32> to vector<128x64xi32>
    %45 = vector.broadcast %43 : vector<1x64xi32> to vector<128x64xi32>
    %46 = arith.cmpi eq, %44, %45 : vector<128x64xi32>
    %47 = arith.extui %46 : vector<128x64xi1> to vector<128x64xi32>
    %48 = arith.sitofp %47 : vector<128x64xi32> to vector<128x64xf32>
    %c0_26 = arith.constant 0 : index
    %c0_27 = arith.constant 0 : index
    %c0_28 = arith.constant 0 : index
    %49 = vector.load %arg9[%c0_26, %c0_27, %c0_28] : memref<2x1x64xf32, #tpu.memory_space<vmem>>, vector<1x1x64xf32>
    %50 = vector.shape_cast %49 : vector<1x1x64xf32> to vector<1x64xf32>
    %51 = arith.mulf %10, %48 : vector<128x64xf32>
    %cst_29 = arith.constant dense<0.000000e+00> : vector<64xf32>
    %52 = vector.multi_reduction <add>, %51, %cst_29 [0] : vector<128x64xf32> to vector<64xf32>
    %53 = vector.shape_cast %52 : vector<64xf32> to vector<1x64xf32>
    %54 = arith.addf %50, %53 : vector<1x64xf32>
    %c0_30 = arith.constant 0 : index
    %c0_31 = arith.constant 0 : index
    %c0_32 = arith.constant 0 : index
    %55 = vector.load %arg9[%c0_30, %c0_31, %c0_32] : memref<2x1x64xf32, #tpu.memory_space<vmem>>, vector<1x1x64xf32>
    %56 = vector.shape_cast %55 : vector<1x1x64xf32> to vector<1x64xf32>
    %57 = vector.shape_cast %54 : vector<1x64xf32> to vector<1x1x64xf32>
    tpu.vector_store %arg9[%c0_30, %c0_31, %c0_32], %57 {strides = array<i32>} : memref<2x1x64xf32, #tpu.memory_space<vmem>>, vector<1x1x64xf32>,
    %c1 = arith.constant 1 : index
    %c0_33 = arith.constant 0 : index
    %c0_34 = arith.constant 0 : index
    %58 = vector.load %arg2[%c1, %c0_33, %c0_34] : memref<2x128x64xbf16, #tpu.memory_space<vmem>>, vector<1x128x64xbf16>
    %59 = vector.shape_cast %58 : vector<1x128x64xbf16> to vector<128x64xbf16>
    %cst_35 = arith.constant dense<0.000000e+00> : vector<128x64xf32>
    %60 = tpu.matmul %3, %59, %cst_35 {dimension_numbers = #tpu.dot_dimension_numbers<[1], [0], [0], [1], [0, 0, 1, 1], [], []>} : vector<128x128xbf16>, vector<128x64xbf16>, vector<128x64xf32> -> vector<128x64xf32>
    %c1_36 = arith.constant 1 : index
    %c0_37 = arith.constant 0 : index
    %c0_38 = arith.constant 0 : index
    %61 = vector.load %arg5[%c1_36, %c0_37, %c0_38] : memref<2x128x64xf32, #tpu.memory_space<vmem>>, vector<1x128x64xf32>
    %62 = vector.shape_cast %61 : vector<1x128x64xf32> to vector<128x64xf32>
    %63 = vector.shape_cast %60 : vector<128x64xf32> to vector<1x128x64xf32>
    tpu.vector_store %arg5[%c1_36, %c0_37, %c0_38], %63 {strides = array<i32>} : memref<2x128x64xf32, #tpu.memory_space<vmem>>, vector<1x128x64xf32>,
    %c300_i32_39 = arith.constant 300 : i32
    %64 = vector.broadcast %c300_i32_39 : i32 to vector<128x1xi32>
    %65 = arith.cmpi slt, %7, %64 : vector<128x1xi32>
    %cst_40 = arith.constant 0xFF800000 : f32
    %66 = vector.shape_cast %65 : vector<128x1xi1> to vector<128x1xi1>
    %67 = vector.broadcast %66 : vector<128x1xi1> to vector<128x64xi1>
    %68 = vector.broadcast %cst_40 : f32 to vector<128x64xf32>
    %69 = arith.select %67, %60, %68 : vector<128x64xi1>, vector<128x64xf32>
    %c1_41 = arith.constant 1 : index
    %c0_42 = arith.constant 0 : index
    %c0_43 = arith.constant 0 : index
    %70 = vector.load %arg7[%c1_41, %c0_42, %c0_43] : memref<2x1x64xf32, #tpu.memory_space<vmem>>, vector<1x1x64xf32>
    %71 = vector.shape_cast %70 : vector<1x1x64xf32> to vector<1x64xf32>
    %cst_44 = arith.constant dense<0xFF800000> : vector<64xf32>
    %72 = vector.multi_reduction <maximumf>, %69, %cst_44 [0] : vector<128x64xf32> to vector<64xf32>
    %73 = vector.shape_cast %72 : vector<64xf32> to vector<1x64xf32>
    %74 = arith.maximumf %71, %73 : vector<1x64xf32>
    %75 = arith.subf %71, %74 : vector<1x64xf32>
    %76 = math.exp %75 : vector<1x64xf32>
    %c1_45 = arith.constant 1 : index
    %c0_46 = arith.constant 0 : index
    %c0_47 = arith.constant 0 : index
    %77 = vector.load %arg8[%c1_45, %c0_46, %c0_47] : memref<2x1x64xf32, #tpu.memory_space<vmem>>, vector<1x1x64xf32>
    %78 = vector.shape_cast %77 : vector<1x1x64xf32> to vector<1x64xf32>
    %79 = arith.mulf %76, %78 : vector<1x64xf32>
    %80 = vector.broadcast %74 : vector<1x64xf32> to vector<128x64xf32>
    %81 = arith.subf %69, %80 : vector<128x64xf32>
    %82 = math.exp %81 : vector<128x64xf32>
    %cst_48 = arith.constant dense<0.000000e+00> : vector<64xf32>
    %83 = vector.multi_reduction <add>, %82, %cst_48 [0] : vector<128x64xf32> to vector<64xf32>
    %84 = vector.shape_cast %83 : vector<64xf32> to vector<1x64xf32>
    %85 = arith.addf %79, %84 : vector<1x64xf32>
    %c1_49 = arith.constant 1 : index
    %c0_50 = arith.constant 0 : index
    %c0_51 = arith.constant 0 : index
    %86 = vector.load %arg8[%c1_49, %c0_50, %c0_51] : memref<2x1x64xf32, #tpu.memory_space<vmem>>, vector<1x1x64xf32>
    %87 = vector.shape_cast %86 : vector<1x1x64xf32> to vector<1x64xf32>
    %88 = vector.shape_cast %85 : vector<1x64xf32> to vector<1x1x64xf32>
    tpu.vector_store %arg8[%c1_49, %c0_50, %c0_51], %88 {strides = array<i32>} : memref<2x1x64xf32, #tpu.memory_space<vmem>>, vector<1x1x64xf32>,
    %c1_52 = arith.constant 1 : index
    %c0_53 = arith.constant 0 : index
    %c0_54 = arith.constant 0 : index
    %89 = vector.load %arg7[%c1_52, %c0_53, %c0_54] : memref<2x1x64xf32, #tpu.memory_space<vmem>>, vector<1x1x64xf32>
    %90 = vector.shape_cast %89 : vector<1x1x64xf32> to vector<1x64xf32>
    %91 = vector.shape_cast %74 : vector<1x64xf32> to vector<1x1x64xf32>
    tpu.vector_store %arg7[%c1_52, %c0_53, %c0_54], %91 {strides = array<i32>} : memref<2x1x64xf32, #tpu.memory_space<vmem>>, vector<1x1x64xf32>,
    %c1_55 = arith.constant 1 : index
    %c0_56 = arith.constant 0 : index
    %c0_57 = arith.constant 0 : index
    %92 = vector.load %arg4[%c1_55, %c0_56, %c0_57] : memref<2x1x64xi32, #tpu.memory_space<vmem>>, vector<1x1x64xi32>
    %93 = vector.shape_cast %92 : vector<1x1x64xi32> to vector<1x64xi32>
    %94 = vector.broadcast %7 : vector<128x1xi32> to vector<128x64xi32>
    %95 = vector.broadcast %93 : vector<1x64xi32> to vector<128x64xi32>
    %96 = arith.cmpi eq, %94, %95 : vector<128x64xi32>
    %97 = arith.extui %96 : vector<128x64xi1> to vector<128x64xi32>
    %98 = arith.sitofp %97 : vector<128x64xi32> to vector<128x64xf32>
    %c1_58 = arith.constant 1 : index
    %c0_59 = arith.constant 0 : index
    %c0_60 = arith.constant 0 : index
    %99 = vector.load %arg9[%c1_58, %c0_59, %c0_60] : memref<2x1x64xf32, #tpu.memory_space<vmem>>, vector<1x1x64xf32>
    %100 = vector.shape_cast %99 : vector<1x1x64xf32> to vector<1x64xf32>
    %101 = arith.mulf %60, %98 : vector<128x64xf32>
    %cst_61 = arith.constant dense<0.000000e+00> : vector<64xf32>
    %102 = vector.multi_reduction <add>, %101, %cst_61 [0] : vector<128x64xf32> to vector<64xf32>
    %103 = vector.shape_cast %102 : vector<64xf32> to vector<1x64xf32>
    %104 = arith.addf %100, %103 : vector<1x64xf32>
    %c1_62 = arith.constant 1 : index
    %c0_63 = arith.constant 0 : index
    %c0_64 = arith.constant 0 : index
    %105 = vector.load %arg9[%c1_62, %c0_63, %c0_64] : memref<2x1x64xf32, #tpu.memory_space<vmem>>, vector<1x1x64xf32>
    %106 = vector.shape_cast %105 : vector<1x1x64xf32> to vector<1x64xf32>
    %107 = vector.shape_cast %104 : vector<1x64xf32> to vector<1x1x64xf32>
    tpu.vector_store %arg9[%c1_62, %c0_63, %c0_64], %107 {strides = array<i32>} : memref<2x1x64xf32, #tpu.memory_space<vmem>>, vector<1x1x64xf32>,
    %c2_i32 = arith.constant 2 : i32
    %108 = arith.cmpi eq, %arg1, %c2_i32 : i32
    %109 = arith.extui %108 : i1 to i32
    %c0_i32_65 = arith.constant 0 : i32
    %110 = arith.cmpi ne, %109, %c0_i32_65 : i32
    scf.if %110 {
      %c0_66 = arith.constant 0 : index
      %c0_67 = arith.constant 0 : index
      %c0_68 = arith.constant 0 : index
      %111 = vector.load %arg7[%c0_66, %c0_67, %c0_68] : memref<2x1x64xf32, #tpu.memory_space<vmem>>, vector<1x1x64xf32>
      %112 = vector.shape_cast %111 : vector<1x1x64xf32> to vector<1x64xf32>
      %c0_69 = arith.constant 0 : index
      %c0_70 = arith.constant 0 : index
      %c0_71 = arith.constant 0 : index
      %113 = vector.load %arg8[%c0_69, %c0_70, %c0_71] : memref<2x1x64xf32, #tpu.memory_space<vmem>>, vector<1x1x64xf32>
      %114 = vector.shape_cast %113 : vector<1x1x64xf32> to vector<1x64xf32>
      %115 = math.log %114 : vector<1x64xf32>
      %116 = arith.addf %112, %115 : vector<1x64xf32>
      %117 = tpu.iota {dimensions = array<i32: 1>} : vector<1x64xi32>
      %c63_i32 = arith.constant 63 : i32
      %118 = vector.broadcast %c63_i32 : i32 to vector<1x64xi32>
      %119 = arith.cmpi slt, %117, %118 : vector<1x64xi32>
      %c0_72 = arith.constant 0 : index
      %c0_73 = arith.constant 0 : index
      %c0_74 = arith.constant 0 : index
      %120 = vector.load %arg4[%c0_72, %c0_73, %c0_74] : memref<2x1x64xi32, #tpu.memory_space<vmem>>, vector<1x1x64xi32>
      %121 = vector.shape_cast %120 : vector<1x1x64xi32> to vector<1x64xi32>
      %c-100_i32 = arith.constant -100 : i32
      %122 = vector.broadcast %c-100_i32 : i32 to vector<1x64xi32>
      %123 = arith.cmpi ne, %121, %122 : vector<1x64xi32>
      %124 = arith.andi %119, %123 : vector<1x64xi1>
      %125 = arith.extui %124 : vector<1x64xi1> to vector<1x64xi32>
      %126 = arith.sitofp %125 : vector<1x64xi32> to vector<1x64xf32>
      %c0_75 = arith.constant 0 : index
      %c0_76 = arith.constant 0 : index
      %c0_77 = arith.constant 0 : index
      %127 = vector.load %arg9[%c0_75, %c0_76, %c0_77] : memref<2x1x64xf32, #tpu.memory_space<vmem>>, vector<1x1x64xf32>
      %128 = vector.shape_cast %127 : vector<1x1x64xf32> to vector<1x64xf32>
      %129 = arith.subf %116, %128 : vector<1x64xf32>
      %130 = arith.mulf %129, %126 : vector<1x64xf32>
      %131 = vector.shape_cast %130 : vector<1x64xf32> to vector<1x1x64xf32>
      %cst_78 = arith.constant dense<0.000000e+00> : vector<1xf32>
      %132 = vector.multi_reduction <add>, %131, %cst_78 [1, 2] : vector<1x1x64xf32> to vector<1xf32>
      %133 = vector.shape_cast %132 : vector<1xf32> to vector<1x1x1xf32>
      %134 = vector.extract %133[0, 0, 0] : f32 from vector<1x1x1xf32>
      %135 = vector.shape_cast %126 : vector<1x64xf32> to vector<1x1x64xf32>
      %cst_79 = arith.constant dense<0.000000e+00> : vector<1xf32>
      %136 = vector.multi_reduction <add>, %135, %cst_79 [1, 2] : vector<1x1x64xf32> to vector<1xf32>
      %137 = vector.shape_cast %136 : vector<1xf32> to vector<1x1x1xf32>
      %138 = vector.extract %137[0, 0, 0] : f32 from vector<1x1x1xf32>
      %139 = tpu.iota {dimensions = array<i32: 1>} : vector<1x128xi32>
      %c0_i32_80 = arith.constant 0 : i32
      %140 = vector.broadcast %c0_i32_80 : i32 to vector<1x128xi32>
      %141 = arith.cmpi eq, %139, %140 : vector<1x128xi32>
      %c1_i32 = arith.constant 1 : i32
      %142 = vector.broadcast %c1_i32 : i32 to vector<1x128xi32>
      %143 = arith.cmpi eq, %139, %142 : vector<1x128xi32>
      %cst_81 = arith.constant 0.000000e+00 : f32
      %144 = vector.broadcast %138 : f32 to vector<1x128xf32>
      %145 = vector.broadcast %cst_81 : f32 to vector<1x128xf32>
      %146 = arith.select %143, %144, %145 : vector<1x128xi1>, vector<1x128xf32>
      %147 = vector.broadcast %134 : f32 to vector<1x128xf32>
      %148 = arith.select %141, %147, %146 : vector<1x128xi1>, vector<1x128xf32>
      %c0_82 = arith.constant 0 : index
      %c0_83 = arith.constant 0 : index
      %c0_84 = arith.constant 0 : index
      %149 = vector.load %arg6[%c0_82, %c0_83, %c0_84] : memref<2x1x128xf32, #tpu.memory_space<vmem>>, vector<1x1x128xf32>
      %150 = vector.shape_cast %149 : vector<1x1x128xf32> to vector<1x128xf32>
      %151 = vector.shape_cast %148 : vector<1x128xf32> to vector<1x1x128xf32>
      tpu.vector_store %arg6[%c0_82, %c0_83, %c0_84], %151 {strides = array<i32>} : memref<2x1x128xf32, #tpu.memory_space<vmem>>, vector<1x1x128xf32>,
      %c1_85 = arith.constant 1 : index
      %c0_86 = arith.constant 0 : index
      %c0_87 = arith.constant 0 : index
      %152 = vector.load %arg7[%c1_85, %c0_86, %c0_87] : memref<2x1x64xf32, #tpu.memory_space<vmem>>, vector<1x1x64xf32>
      %153 = vector.shape_cast %152 : vector<1x1x64xf32> to vector<1x64xf32>
      %c1_88 = arith.constant 1 : index
      %c0_89 = arith.constant 0 : index
      %c0_90 = arith.constant 0 : index
      %154 = vector.load %arg8[%c1_88, %c0_89, %c0_90] : memref<2x1x64xf32, #tpu.memory_space<vmem>>, vector<1x1x64xf32>
      %155 = vector.shape_cast %154 : vector<1x1x64xf32> to vector<1x64xf32>
      %156 = math.log %155 : vector<1x64xf32>
      %157 = arith.addf %153, %156 : vector<1x64xf32>
      %158 = tpu.iota {dimensions = array<i32: 1>} : vector<1x64xi32>
      %c63_i32_91 = arith.constant 63 : i32
      %159 = vector.broadcast %c63_i32_91 : i32 to vector<1x64xi32>
      %160 = arith.cmpi slt, %158, %159 : vector<1x64xi32>
      %c1_92 = arith.constant 1 : index
      %c0_93 = arith.constant 0 : index
      %c0_94 = arith.constant 0 : index
      %161 = vector.load %arg4[%c1_92, %c0_93, %c0_94] : memref<2x1x64xi32, #tpu.memory_space<vmem>>, vector<1x1x64xi32>
      %162 = vector.shape_cast %161 : vector<1x1x64xi32> to vector<1x64xi32>
      %c-100_i32_95 = arith.constant -100 : i32
      %163 = vector.broadcast %c-100_i32_95 : i32 to vector<1x64xi32>
      %164 = arith.cmpi ne, %162, %163 : vector<1x64xi32>
      %165 = arith.andi %160, %164 : vector<1x64xi1>
      %166 = arith.extui %165 : vector<1x64xi1> to vector<1x64xi32>
      %167 = arith.sitofp %166 : vector<1x64xi32> to vector<1x64xf32>
      %c1_96 = arith.constant 1 : index
      %c0_97 = arith.constant 0 : index
      %c0_98 = arith.constant 0 : index
      %168 = vector.load %arg9[%c1_96, %c0_97, %c0_98] : memref<2x1x64xf32, #tpu.memory_space<vmem>>, vector<1x1x64xf32>
      %169 = vector.shape_cast %168 : vector<1x1x64xf32> to vector<1x64xf32>
      %170 = arith.subf %157, %169 : vector<1x64xf32>
      %171 = arith.mulf %170, %167 : vector<1x64xf32>
      %172 = vector.shape_cast %171 : vector<1x64xf32> to vector<1x1x64xf32>
      %cst_99 = arith.constant dense<0.000000e+00> : vector<1xf32>
      %173 = vector.multi_reduction <add>, %172, %cst_99 [1, 2] : vector<1x1x64xf32> to vector<1xf32>
      %174 = vector.shape_cast %173 : vector<1xf32> to vector<1x1x1xf32>
      %175 = vector.extract %174[0, 0, 0] : f32 from vector<1x1x1xf32>
      %176 = vector.shape_cast %167 : vector<1x64xf32> to vector<1x1x64xf32>
      %cst_100 = arith.constant dense<0.000000e+00> : vector<1xf32>
      %177 = vector.multi_reduction <add>, %176, %cst_100 [1, 2] : vector<1x1x64xf32> to vector<1xf32>
      %178 = vector.shape_cast %177 : vector<1xf32> to vector<1x1x1xf32>
      %179 = vector.extract %178[0, 0, 0] : f32 from vector<1x1x1xf32>
      %180 = tpu.iota {dimensions = array<i32: 1>} : vector<1x128xi32>
      %c0_i32_101 = arith.constant 0 : i32
      %181 = vector.broadcast %c0_i32_101 : i32 to vector<1x128xi32>
      %182 = arith.cmpi eq, %180, %181 : vector<1x128xi32>
      %c1_i32_102 = arith.constant 1 : i32
      %183 = vector.broadcast %c1_i32_102 : i32 to vector<1x128xi32>
      %184 = arith.cmpi eq, %180, %183 : vector<1x128xi32>
      %cst_103 = arith.constant 0.000000e+00 : f32
      %185 = vector.broadcast %179 : f32 to vector<1x128xf32>
      %186 = vector.broadcast %cst_103 : f32 to vector<1x128xf32>
      %187 = arith.select %184, %185, %186 : vector<1x128xi1>, vector<1x128xf32>
      %188 = vector.broadcast %175 : f32 to vector<1x128xf32>
      %189 = arith.select %182, %188, %187 : vector<1x128xi1>, vector<1x128xf32>
      %c1_104 = arith.constant 1 : index
      %c0_105 = arith.constant 0 : index
      %c0_106 = arith.constant 0 : index
      %190 = vector.load %arg6[%c1_104, %c0_105, %c0_106] : memref<2x1x128xf32, #tpu.memory_space<vmem>>, vector<1x1x128xf32>
      %191 = vector.shape_cast %190 : vector<1x1x128xf32> to vector<1x128xf32>
      %192 = vector.shape_cast %189 : vector<1x128xf32> to vector<1x1x128xf32>
      tpu.vector_store %arg6[%c1_104, %c0_105, %c0_106], %192 {strides = array<i32>} : memref<2x1x128xf32, #tpu.memory_space<vmem>>, vector<1x1x128xf32>,
    } else {
    }
    return
  }
  func.func @transform_0(%arg0: i32, %arg1: i32) -> (i32, i32, i32) {
    %c0_i32 = arith.constant 0 : i32
    %c0_i32_0 = arith.constant 0 : i32
    %c0_i32_1 = arith.constant 0 : i32
    return %arg0, %c0_i32, %c0_i32_0 : i32, i32, i32
  }
  func.func @transform_1(%arg0: i32, %arg1: i32) -> (i32, i32) {
    %c0_i32 = arith.constant 0 : i32
    %c0_i32_0 = arith.constant 0 : i32
    return %arg1, %c0_i32 : i32, i32
  }
  func.func @transform_2(%arg0: i32, %arg1: i32) -> (i32, i32, i32) {
    %c0_i32 = arith.constant 0 : i32
    %c0_i32_0 = arith.constant 0 : i32
    %c0_i32_1 = arith.constant 0 : i32
    return %arg0, %c0_i32, %c0_i32_0 : i32, i32, i32
  }
  func.func @transform_3(%arg0: i32, %arg1: i32) -> (i32, i32, i32) {
    %c0_i32 = arith.constant 0 : i32
    %c0_i32_0 = arith.constant 0 : i32
    return %arg0, %arg1, %c0_i32 : i32, i32, i32
  }
  func.func @transform_4(%arg0: i32, %arg1: i32) -> (i32, i32, i32) {
    %c0_i32 = arith.constant 0 : i32
    %c0_i32_0 = arith.constant 0 : i32
    %c0_i32_1 = arith.constant 0 : i32
    return %arg0, %c0_i32, %c0_i32_0 : i32, i32, i32
  }
}

</mosaic_0001>

<bundles_post_ra>
// kernel: language_mixer_forward.3
= control target key start
LH: loop header
LB: loop body
LE: loop exit
PB: predicated region body
PF: predicated region fallthrough
CT: control target
= control target key end

     0   :  { %s2419_s15 = smov 0   ;;  %s2421_s16 = smov 0   ;;  %s3532_s0 = inlined_call_operand.vmem [shape: bf16[4,128,64], index: 0, kind: input, shape index: {}]   ;;  %s3533_s1 = inlined_call_operand.vmem [shape: bf16[384,128], index: 1, kind: input, shape index: {}]   ;;  %s3534_s2 = inlined_call_operand.vmem [shape: s32[4,1,64], index: 2, kind: input, shape index: {}]   ;;  %s3535_s3 = inlined_call_operand.vmem [shape: f32[4,300,64], index: 3, kind: output, shape index: {0}]   ;;  %s3536_s4 = inlined_call_operand.vmem [shape: f32[4,1,128], index: 4, kind: output, shape index: {1}]  }
   0x1   :  { %s2423_s17 = smov 0   ;;  %s2425_s18 = smov 0  }
   0x2   :  { %s2427_s19 = smov 0   ;;  %s2429_s20 = smov 0  }
   0x3   :  { %s2431_s21 = smov 0  }
   0x4 LB: > { %s24_s22 = sadd.s32 1, %s2348_s19  ;;  %s27_s23 = sadd.s32 1, %s2352_s20  ;;  %s2356_s21 = sphi %s2431_s21, %s15_s21   ;;  %s2352_s20 = sphi %s2429_s20, %s3581_s20   ;;  %s2348_s19 = sphi %s2427_s19, %s3580_s19   ;;  %s2344_s18 = sphi %s2425_s18, %s3579_s18   ;;  %s2340_s17 = sphi %s2423_s17, %s3578_s17   ;;  %s2336_s16 = sphi %s2421_s16, %s3577_s16   ;;  %s2332_s15 = sphi %s2419_s15, %s3576_s15  }
   0x5   : > { %p25_p0 = scmp.ge.s32.totalorder %s24_s22, 3  ;;  %s1812_s24 = sadd.s32 4294967295, %s2356_s21  }
   0x6   : > { %p124_p1 = scmp.ne.s32.totalorder %s2336_s16, %s2332_s15  ;;  %p125_p2 = scmp.eq.s32.totalorder %s1812_s24, 5 }
   0x7   : > { %s3583_s22 = smov (%p25_p0, %s24_s22), 0  ;;  %s3585_s23 = smov (!%p25_p0, %s27_s23), %s2352_s20 }
   0x8   : > { %3550 = sst [smem:[#allocation6_spill]] %s3583_s22  ;;  %s110_s25 = ssub.s32 %s2348_s19, %s3583_s22 }
   0x9   : > { %p29_p3 = scmp.ge.s32.totalorder %s3585_s23, 2  ;;  %p1816_p4 = scmp.ge.s32.totalorder %s2356_s21, 1 }
   0xa   : > { %p2465_p5 = por %p125_p2, %p124_p1  ;;  %p202_p6 = scmp.lt.s32.totalorder %s2356_s21, 7 }
   0xb   : > { %s3587_s23 = smov (%p29_p3, %s3585_s23), 0  ;;  %s114_s29 = sadd.s32 1, %s2336_s16 }
   0xc   : > { %3552 = sst [smem:[#allocation7_spill]] %s3587_s23  ;;  %p203_p7 = pnand %p1816_p4, %p202_p6 }
   0xd   : > { %s109_s27 = ssub.s32 %s2352_s20, %s3587_s23 }
   0xe   : > { %s111_s28 = sor.u32 %s110_s25, %s109_s27  ;;  %206 = sbr.rel (%p203_p7) target bundleno = 727 (0x2d7), region = 32 }
   0xf   : > { %p112_p8 = scmp.eq.s32.totalorder %s111_s28, 0 }
  0x11   : > { %s2476_s30 = scalar_select %p112_p8, %s2336_s16, %s114_s29  }
  0x15   : > { %s232_s5 = sand.u32 1, %s2332_s15   ;;  %s1818_s6 = sshll.u32 %s2344_s18, 1 }
  0x16   : > { %s1817_s7 = sshll.u32 %s232_s5, 8  ;;  %p242_p9 = scmp.lt.s32.totalorder %s1818_s6, 3 }
  0x17   : > { %s2481_s8 = sshll.u32 %s2340_s17, 4  ;;  %s2505_s10 = scalar_lea.vmem [#allocation5], %s1817_s7  }
  0x18   : > { %s3589_s6 = smov (!%p242_p9, %s1818_s6), 3  ;;  %p249_p10 = scmp.lt.s32.totalorder %s2481_s8, 47 }
  0x19   : > { %s1942_s9 = sshll.u32 %s3589_s6, 6  ;;  %s2487_s12 = scalar_lea.vmem %s3534_s2, %s3589_s6 }
  0x1a   : > { %s2492_s24 = scalar_lea.vmem %s3532_s0, %s1942_s9  ;;  %s2497_s27 = scalar_lea.vmem %s3536_s4, %s3589_s6 }
  0x1b   : > { %s250_s28 = scalar_select %p249_p10, %s2481_s8, 47 }
  0x1c   : > { %p1825_p11 = scmp.ne.s32.totalorder %s2340_s17, 0 }
  0x1d   : > { %s1822_s29 = sshll.u32 %s250_s28, 2  ;;  %vm275_vm0 = vcmask (!%p1825_p11), 516096   ;;  %v2390_v0 = vmov (!%p1825_p11), -inf   ;;  %v2391_v1 = vmov (!%p1825_p11), 0.0  }
  0x1e   : > { %s2503_s22 = scalar_lea.vmem %s3533_s1, %s1822_s29  ;;  %274 = sbr.rel (%p1825_p11) target bundleno = 37 (0x25), region = 36  ;;  %276 = vst.msk [vmem:[#allocation2] sm:$0x1] (!%p1825_p11), %vm275_vm0, %v2390_v0  ;;  %277 = vst.msk [vmem:[#allocation2 + $0x1] sm:$0x1] (!%p1825_p11), %vm275_vm0, %v2390_v0 }
  0x1f   : > { %278 = vst.msk [vmem:[#allocation3] sm:$0x1] (!%p1825_p11), %vm275_vm0, %v2391_v1  ;;  %279 = vst.msk [vmem:[#allocation3 + $0x1] sm:$0x1] (!%p1825_p11), %vm275_vm0, %v2391_v1 }
  0x20   : > { %280 = vst.msk [vmem:[#allocation4] sm:$0x1] (!%p1825_p11), %vm275_vm0, %v2391_v1  ;;  %281 = vst.msk [vmem:[#allocation4 + $0x1] sm:$0x1] (!%p1825_p11), %vm275_vm0, %v2391_v1 }
  0x25 PF: > { %v2174_v2 = vld [vmem:[%s2492_s24] sm:$0xff]   ;;  %v2176_v4 = vld [vmem:[%s2492_s24 + $0x8] sm:$0xff]   ;;  %v2178_v6 = vld [vmem:[%s2492_s24 + $0x10] sm:$0xff]   ;;  %v3539_v26 = vlaneseq  ;;  %s1826_s23 = sshll.u32 %s2340_s17, 7  ;;  %v3541_v43 = vmov 0.0   ;;  %vm542_vm13 = vcmask 523264  }
  0x26   : > { %v2175_v3 = vld [vmem:[%s2492_s24 + $0x40] sm:$0xff]   ;;  %1977 = vmatprep.subr.bf16.mxu0 %v2174_v2  ;;  %v2177_v5 = vld [vmem:[%s2492_s24 + $0x48] sm:$0xff]   ;;  %v2179_v7 = vld [vmem:[%s2492_s24 + $0x50] sm:$0xff]   ;;  %v2537_v29 = vstv %s1826_s23  ;;  %p1918_p12 = scmp.ne.s32.totalorder %s2340_s17, 2 }
  0x27   : > { %2009 = vmatprep.subr.bf16.mxu1 %v2175_v3  ;;  %1978 = vmatpush3.bf16.msra.mxu0 %v2174_v2  ;;  %v2180_v8 = vld [vmem:[%s2492_s24 + $0x18] sm:$0xff]   ;;  %v2182_v10 = vld [vmem:[%s2492_s24 + $0x20] sm:$0xff]   ;;  %v2184_v12 = vld [vmem:[%s2492_s24 + $0x28] sm:$0xff]   ;;  %v2533_v27 = vshrl.u32 %v3539_v26, 7 }
  0x28   : > { %2010 = vmatpush3.bf16.msra.mxu1 %v2175_v3  ;;  %1979 = vmatprep.subr.bf16.mxu0 %v2176_v4  ;;  %v2181_v9 = vld [vmem:[%s2492_s24 + $0x58] sm:$0xff]   ;;  %v2183_v11 = vld [vmem:[%s2492_s24 + $0x60] sm:$0xff]   ;;  %v2185_v14 = vld [vmem:[%s2492_s24 + $0x68] sm:$0xff]  }
  0x29   : > { %2011 = vmatprep.subr.bf16.mxu1 %v2177_v5  ;;  %v2190_v13 = vld [vmem:[%s2503_s22] sm:$0xff]   ;;  %v2186_v15 = vld [vmem:[%s2492_s24 + $0x30] sm:$0xff]   ;;  %v2188_v17 = vld [vmem:[%s2492_s24 + $0x38] sm:$0xff]   ;;  %v302_v28 = vadd.s32 16, %v2533_v27  ;;  %v303_v30 = vadd.s32 24, %v2533_v27  ;;  %v2548_v33 = vadd.s32 %v2537_v29, %v2533_v27  ;;  %v301_v34 = vadd.s32 8, %v2533_v27 }
  0x2a   : > { %1993 = vmatprep.mubr.bf16.mxu0 %v2190_v13  ;;  %2025 = vmatprep.mubr.bf16.mxu1 %v2190_v13  ;;  %v2187_v16 = vld [vmem:[%s2492_s24 + $0x70] sm:$0xff]   ;;  %v2189_v18 = vld [vmem:[%s2492_s24 + $0x78] sm:$0xff]   ;;  %v2191_v19 = vld [vmem:[%s2503_s22 + $0x8] sm:$0xff]   ;;  %v306_v36 = vadd.s32 48, %v2533_v27  ;;  %v304_v39 = vadd.s32 32, %v2533_v27  ;;  %v307_v41 = vadd.s32 56, %v2533_v27 }
  0x2b   : > { %1980 = vmatpush3.bf16.msra.mxu0 %v2176_v4  ;;  %v2192_v20 = vld [vmem:[%s2503_s22 + $0x10] sm:$0xff]   ;;  %v2193_v21 = vld [vmem:[%s2503_s22 + $0x18] sm:$0xff]   ;;  %v2194_v22 = vld [vmem:[%s2503_s22 + $0x20] sm:$0xff]   ;;  %v2541_v31 = vadd.s32 %v2537_v29, %v302_v28  ;;  %v2556_v37 = vadd.s32 %v2537_v29, %v303_v30  ;;  %v2565_v38 = vadd.s32 %v2537_v29, %v301_v34  ;;  %v305_v42 = vadd.s32 40, %v2533_v27 }
  0x2c   : > { %2012 = vmatpush3.bf16.msra.mxu1 %v2177_v5  ;;  %1981 = vmatprep.subr.bf16.mxu0 %v2178_v6  ;;  %v2195_v23 = vld [vmem:[%s2503_s22 + $0x28] sm:$0xff]   ;;  %v2196_v24 = vld [vmem:[%s2503_s22 + $0x30] sm:$0xff]   ;;  %v2197_v25 = vld [vmem:[%s2503_s22 + $0x38] sm:$0xff]   ;;  %v2571_v40 = vadd.s32 %v2537_v29, %v306_v36  ;;  %v2596_v48 = vadd.s32 %v2537_v29, %v304_v39  ;;  %v2604_v50 = vadd.s32 %v2537_v29, %v307_v41  ;;  %v310_v51 = vadd.s32 80, %v2533_v27 }
  0x2d   : > { %2013 = vmatprep.subr.bf16.mxu1 %v2179_v7  ;;  %v2544_v32 = vld [vmem:[%s2487_s12] ss:$0 sm:$0xff]  ;;  %v2552_v35 = vld [vmem:[%s2487_s12 + $0x1] ss:$0 sm:$0xff]  ;;  %v2613_v53 = vadd.s32 %v2537_v29, %v305_v42  ;;  %v308_v54 = vadd.s32 64, %v2533_v27  ;;  %v311_v57 = vadd.s32 88, %v2533_v27 }
  0x2e   : > { %vm769_vm1 = vcmp.eq.s32.totalorder %v2541_v31, %v2544_v32  ;;  %vm1214_vm2 = vcmp.eq.s32.totalorder %v2541_v31, %v2552_v35  ;;  %vm767_vm3 = vcmp.eq.s32.totalorder %v2548_v33, %v2544_v32  ;;  %vm1212_vm4 = vcmp.eq.s32.totalorder %v2548_v33, %v2552_v35 }
  0x2f   : > { %1982 = vmatpush3.bf16.msra.mxu0 %v2178_v6  ;;  %vm770_vm5 = vcmp.eq.s32.totalorder %v2556_v37, %v2544_v32  ;;  %v2578_v44 = vsel %vm769_vm1, 1.0, %v3541_v43  ;;  %v2581_v45 = vsel %vm1214_vm2, 1.0, %v3541_v43  ;;  %v2584_v46 = vsel %vm767_vm3, 1.0, %v3541_v43 }
  0x30   : > { %2014 = vmatpush3.bf16.msra.mxu1 %v2179_v7  ;;  %1983 = vmatprep.subr.bf16.mxu0 %v2180_v8  ;;  %vm1215_vm6 = vcmp.eq.s32.totalorder %v2556_v37, %v2552_v35  ;;  %v2589_v47 = vsel %vm1212_vm4, 1.0, %v3541_v43  ;;  %vm768_vm7 = vcmp.eq.s32.totalorder %v2565_v38, %v2544_v32  ;;  %vm1213_vm8 = vcmp.eq.s32.totalorder %v2565_v38, %v2552_v35 }
  0x31   : > { %2015 = vmatprep.subr.bf16.mxu1 %v2181_v9  ;;  %v2599_v49 = vsel %vm770_vm5, 1.0, %v3541_v43  ;;  %vm773_vm9 = vcmp.eq.s32.totalorder %v2571_v40, %v2544_v32  ;;  %v2608_v52 = vsel %vm1215_vm6, 1.0, %v3541_v43  ;;  %vm1218_vm10 = vcmp.eq.s32.totalorder %v2571_v40, %v2552_v35 }
  0x32   : > { %v2617_v55 = vsel %vm768_vm7, 1.0, %v3541_v43  ;;  %v2620_v56 = vsel %vm1213_vm8, 1.0, %v3541_v43  ;;  %v309_v58 = vadd.s32 72, %v2533_v27  ;;  %v2625_v59 = vsel %vm773_vm9, 1.0, %v3541_v43 }
  0x33   : > { %1984 = vmatpush3.bf16.msra.mxu0 %v2180_v8  ;;  %vm771_vm11 = vcmp.eq.s32.totalorder %v2596_v48, %v2544_v32  ;;  %vm1216_vm12 = vcmp.eq.s32.totalorder %v2596_v48, %v2552_v35  ;;  %v314_v60 = vadd.s32 112, %v2533_v27  ;;  %vm561_vm14 = vcmp.lt.s32.totalorder %v2541_v31, 300 }
  0x34   : > { %2016 = vmatpush3.bf16.msra.mxu1 %v2181_v9  ;;  %1985 = vmatprep.subr.bf16.mxu0 %v2182_v10  ;;  %v2634_v61 = vsel %vm1218_vm10, 1.0, %v3541_v43  ;;  %vm774_vm15 = vcmp.eq.s32.totalorder %v2604_v50, %v2544_v32  ;;  %vm1219_vm0 = vcmp.eq.s32.totalorder %v2604_v50, %v2552_v35  ;;  %v2641_v62 = vadd.s32 %v2537_v29, %v310_v51 }
  0x35   : > { %2017 = vmatprep.subr.bf16.mxu1 %v2183_v11  ;;  %vm559_vm1 = vcmp.lt.s32.totalorder %v2548_v33, 300  ;;  %vm772_vm2 = vcmp.eq.s32.totalorder %v2613_v53, %v2544_v32  ;;  %vm1217_vm3 = vcmp.eq.s32.totalorder %v2613_v53, %v2552_v35  ;;  %v2649_v63 = vadd.s32 %v2537_v29, %v308_v54 }
  0x36   : > { %v312_v0 = vadd.s32 96, %v2533_v27  ;;  %v2653_v1 = vsel %vm771_vm11, 1.0, %v3541_v43  ;;  %v2656_v2 = vsel %vm1216_vm12, 1.0, %v3541_v43  ;;  %v2659_v3 = vadd.s32 %v2537_v29, %v311_v57 }
  0x37   : > { %1986 = vmatpush3.bf16.msra.mxu0 %v2182_v10  ;;  %v2662_v4 = vadd.s32 %v2537_v29, %v309_v58  ;;  %v2665_v5 = vsel %vm774_vm15, 1.0, %v3541_v43  ;;  %v2668_v6 = vadd.s32 %v2537_v29, %v314_v60  ;;  %v315_v7 = vadd.s32 120, %v2533_v27 }
  0x38   : > { %2018 = vmatpush3.bf16.msra.mxu1 %v2183_v11  ;;  %1987 = vmatprep.subr.bf16.mxu0 %v2184_v12  ;;  %v313_v8 = vadd.s32 104, %v2533_v27  ;;  %vm562_vm4 = vcmp.lt.s32.totalorder %v2556_v37, 300  ;;  %v2677_v9 = vsel %vm1219_vm0, 1.0, %v3541_v43  ;;  %v2680_v10 = vsel %vm772_vm2, 1.0, %v3541_v43 }
  0x39   : > { %2019 = vmatprep.subr.bf16.mxu1 %v2185_v14  ;;  %v2683_v11 = vsel %vm1217_vm3, 1.0, %v3541_v43  ;;  %vm777_vm5 = vcmp.eq.s32.totalorder %v2641_v62, %v2544_v32  ;;  %vm1222_vm6 = vcmp.eq.s32.totalorder %v2641_v62, %v2552_v35  ;;  %vm775_vm7 = vcmp.eq.s32.totalorder %v2649_v63, %v2544_v32 }
  0x3a   : > { %vm1220_vm8 = vcmp.eq.s32.totalorder %v2649_v63, %v2552_v35  ;;  %vm778_vm9 = vcmp.eq.s32.totalorder %v2659_v3, %v2544_v32  ;;  %vm1223_vm10 = vcmp.eq.s32.totalorder %v2659_v3, %v2552_v35  ;;  %vm776_vm11 = vcmp.eq.s32.totalorder %v2662_v4, %v2544_v32 }
  0x3b   : > { %1988 = vmatpush3.bf16.msra.mxu0 %v2184_v12  ;;  %v2694_v12 = vadd.s32 %v2537_v29, %v312_v0  ;;  %vm1221_vm12 = vcmp.eq.s32.totalorder %v2662_v4, %v2552_v35  ;;  %vm560_vm15 = vcmp.lt.s32.totalorder %v2565_v38, 300  ;;  %vm781_vm0 = vcmp.eq.s32.totalorder %v2668_v6, %v2544_v32 }
  0x3c   : > { %2020 = vmatpush3.bf16.msra.mxu1 %v2185_v14  ;;  %1989 = vmatprep.subr.bf16.mxu0 %v2186_v15  ;;  %vm1226_vm2 = vcmp.eq.s32.totalorder %v2668_v6, %v2552_v35  ;;  %v2710_v13 = vadd.s32 %v2537_v29, %v315_v7  ;;  %v2713_v14 = vadd.s32 %v2537_v29, %v313_v8  ;;  %vm565_vm3 = vcmp.lt.s32.totalorder %v2571_v40, 300 }
  0x3d   : > { %2021 = vmatprep.subr.bf16.mxu1 %v2187_v16 }
  0x3f   : > { %1990 = vmatpush3.bf16.msra.mxu0 %v2186_v15  ;;  %v2716_v15 = vsel %vm777_vm5, 1.0, %v3541_v43  ;;  %vm779_vm5 = vcmp.eq.s32.totalorder %v2694_v12, %v2544_v32 }
  0x40   : > { %2022 = vmatpush3.bf16.msra.mxu1 %v2187_v16  ;;  %1991 = vmatprep.subr.bf16.mxu0 %v2188_v17  ;;  %v2719_v16 = vsel %vm1222_vm6, 1.0, %v3541_v43  ;;  %vm1224_vm6 = vcmp.eq.s32.totalorder %v2694_v12, %v2552_v35  ;;  %v2783_v51 = vsel %vm779_vm5, 1.0, %v3541_v43  ;;  %vm1227_vm5 = vcmp.eq.s32.totalorder %v2710_v13, %v2552_v35 }
  0x41   : > { %2023 = vmatprep.subr.bf16.mxu1 %v2189_v18  ;;  %v2798_v0 = vsel %vm1224_vm6, 1.0, %v3541_v43  ;;  %vm572_vm6 = vcmp.lt.s32.totalorder %v2713_v14, 300 }
  0x43   : > { %1992 = vmatpush3.bf16.msra.mxu0 %v2188_v17  ;;  %v2722_v17 = vsel %vm775_vm7, 1.0, %v3541_v43  ;;  %vm782_vm7 = vcmp.eq.s32.totalorder %v2710_v13, %v2544_v32 }
  0x44   : > { %2024 = vmatpush3.bf16.msra.mxu1 %v2189_v18  ;;  %v2725_v18 = vsel %vm1220_vm8, 1.0, %v3541_v43  ;;  %vm780_vm8 = vcmp.eq.s32.totalorder %v2713_v14, %v2544_v32 }
  0x46   : > { %1994 = vmatmul.mubr.bf16.vlgmr.msra.gmra.mrb[0].mxu0 %v2191_v19 }
  0x47   : > { %2026 = vmatmul.mubr.bf16.vlgmr.msra.gmra.mrb[0].mxu1 %v2191_v19  ;;  %1997 = vmatprep.mubr.bf16.mxu0 %v2192_v20  ;;  %v2729_v19 = vsel %vm778_vm9, 1.0, %v3541_v43  ;;  %vm563_vm9 = vcmp.lt.s32.totalorder %v2596_v48, 300 }
  0x48   : > { %2029 = vmatprep.mubr.bf16.mxu1 %v2192_v20  ;;  %v2732_v20 = vsel %vm1223_vm10, 1.0, %v3541_v43  ;;  %vm567_vm10 = vcmp.lt.s32.totalorder %v2649_v63, 300 }
  0x4e   : > { %1998 = vmatmul.mubr.bf16.gmra.mrb[4].mxu0 %v2193_v21 }
  0x4f   : > { %2030 = vmatmul.mubr.bf16.gmra.mrb[4].mxu1 %v2193_v21  ;;  %2001 = vmatprep.mubr.bf16.mxu0 %v2194_v22  ;;  %v2735_v21 = vsel %vm776_vm11, 1.0, %v3541_v43  ;;  %vm570_vm11 = vcmp.lt.s32.totalorder %v2659_v3, 300 }
  0x50   : > { %2033 = vmatprep.mubr.bf16.mxu1 %v2194_v22 }
  0x56   : > { %2002 = vmatmul.mubr.bf16.gmra.mrb[8].mxu0 %v2195_v23 }
  0x57   : > { %2034 = vmatmul.mubr.bf16.gmra.mrb[8].mxu1 %v2195_v23  ;;  %2005 = vmatprep.mubr.bf16.mxu0 %v2196_v24  ;;  %v2743_v23 = vsel %vm1221_vm12, 1.0, %v3541_v43  ;;  %vm568_vm12 = vcmp.lt.s32.totalorder %v2662_v4, 300 }
  0x58   : > { %2037 = vmatprep.mubr.bf16.mxu1 %v2196_v24  ;;  %v2746_v24 = vsel %vm781_vm0, 1.0, %v3541_v43  ;;  %vm571_vm0 = vcmp.lt.s32.totalorder %v2694_v12, 300 }
  0x5e   : > { %2006 = vmatmul.mubr.bf16.gmra.mrb[12].mxu0 %v2197_v25 }
  0x5f   : > { %2038 = vmatmul.mubr.bf16.gmra.mrb[12].mxu1 %v2197_v25  ;;  %v2749_v25 = vsel %vm1226_vm2, 1.0, %v3541_v43  ;;  %vm574_vm2 = vcmp.lt.s32.totalorder %v2710_v13, 300 }
 0x119   : > { %v1995_v22 = vpop.f32.mrb[0].mxu0 }
 0x11a   : > { %545 = vst.msk [vmem:[%s2505_s10 + $0x10] sm:$0xff] %vm542_vm13, %v1995_v22  ;;  %v2757_v28 = vsel %vm561_vm14, %v1995_v22, -inf  ;;  %v818_v29 = vmul.f32 %v1995_v22, %v2578_v44  ;;  %v2027_v30 = vpop.f32.mrb[0].mxu1  ;;  %v479_v34 = vpop.f32.mrb[1].mxu0  ;;  %v2812_v22 = vsel %vm782_vm7, 1.0, %v3541_v43  ;;  %vm759_vm7 = vcmask 516096  }
 0x11b   : > { %3553 = vst [vmem:[#allocation8_spill] sm:$0xff] %v2757_v28  ;;  %v626_v36 = vsel %vm542_vm13, %v2757_v28, -inf  ;;  %1886 = vst.msk [vmem:[%s2505_s10 + $0x90] sm:$0xff] %vm542_vm13, %v2027_v30  ;;  %v2770_v39 = vsel %vm561_vm14, %v2027_v30, -inf  ;;  %v2776_v41 = vsel %vm559_vm1, %v479_v34, -inf  ;;  %v970_v42 = vpop.f32.mrb[1].mxu1  ;;  %v816_v57 = vmul.f32 %v2584_v46, %v479_v34 }
 0x11c   : > { %3554 = vst [vmem:[#allocation9_spill] sm:$0xff] %v2770_v39  ;;  %543 = vst.msk [vmem:[%s2505_s10] sm:$0xff] %vm542_vm13, %v479_v34  ;;  %v1996_v44 = vpop.f32.mrb[2].mxu0  ;;  %v1070_v31 = vsel %vm542_vm13, %v2770_v39, -inf  ;;  %v624_v54 = vsel %vm542_vm13, %v2776_v41, -inf  ;;  %v2028_v58 = vpop.f32.mrb[2].mxu1  ;;  %v1262_v32 = vmul.f32 %v2589_v47, %v970_v42 }
 0x11d   : > { %3555 = vst [vmem:[#allocation10_spill] sm:$0xff] %v2776_v41  ;;  %1884 = vst.msk [vmem:[%s2505_s10 + $0x80] sm:$0xff] %vm542_vm13, %v970_v42  ;;  %v482_v60 = vpop.f32.mrb[3].mxu0  ;;  %v633_v7 = vmax.f32 %v626_v36, %v624_v54  ;;  %v2802_v8 = vsel %vm559_vm1, %v970_v42, -inf  ;;  %v973_v46 = vpop.f32.mrb[3].mxu1  ;;  %v2818_v34 = vsel %vm780_vm8, 1.0, %v3541_v43  ;;  %v1264_v36 = vmul.f32 %v2027_v30, %v2581_v45 }
 0x11e   : > { %546 = vst.msk [vmem:[%s2505_s10 + $0x18] sm:$0xff] %vm542_vm13, %v1996_v44  ;;  %3556 = vst [vmem:[#allocation11_spill] sm:$0xff] %v2802_v8  ;;  %v835_v33 = vsel %vm542_vm13, %v818_v29, 0.0  ;;  %v1068_v54 = vsel %vm542_vm13, %v2802_v8, -inf  ;;  %v2826_v26 = vsel %vm562_vm4, %v1996_v44, -inf  ;;  %vm566_vm14 = vcmp.lt.s32.totalorder %v2604_v50, 300 }
 0x11f   : > { %1887 = vst.msk [vmem:[%s2505_s10 + $0x98] sm:$0xff] %vm542_vm13, %v2028_v58  ;;  %544 = vst.msk [vmem:[%s2505_s10 + $0x8] sm:$0xff] %vm542_vm13, %v482_v60  ;;  %v1077_v39 = vmax.f32 %v1070_v31, %v1068_v54  ;;  %v627_v29 = vsel %vm542_vm13, %v2826_v26, -inf  ;;  %v2836_v45 = vsel %vm562_vm4, %v2028_v58, -inf  ;;  %v832_v30 = vsel %vm542_vm13, %v816_v57, 0.0 }
 0x120   : > { %1885 = vst.msk [vmem:[%s2505_s10 + $0x88] sm:$0xff] %vm542_vm13, %v973_v46  ;;  %3557 = vst [vmem:[#allocation12_spill] sm:$0xff] %v2836_v45  ;;  %v629_v43 = vmax.f32 %v627_v29, %v633_v7  ;;  %v819_v8 = vmul.f32 %v1996_v44, %v2599_v49  ;;  %v1071_v28 = vsel %vm542_vm13, %v2836_v45, -inf  ;;  %v2844_v47 = vsel %vm560_vm15, %v482_v60, -inf }
 0x121   : > { %v1073_v41 = vmax.f32 %v1071_v28, %v1077_v39  ;;  %v817_v42 = vmul.f32 %v2617_v55, %v482_v60  ;;  %v2849_v37 = vsel %vm560_vm15, %v973_v46, -inf  ;;  %v1999_v31 = vpop.f32.mrb[4].mxu0  ;;  %v1265_v57 = vmul.f32 %v2028_v58, %v2608_v52 }
 0x122   : > { %3558 = vst [vmem:[#allocation13_spill] sm:$0xff] %v2849_v37  ;;  %v625_v49 = vsel %vm542_vm13, %v2844_v47, -inf  ;;  %v1069_v28 = vsel %vm542_vm13, %v2849_v37, -inf  ;;  %v1263_v39 = vmul.f32 %v2620_v56, %v973_v46  ;;  %549 = vst.msk [vmem:[%s2505_s10 + $0x30] sm:$0xff] %vm542_vm13, %v1999_v31  ;;  %v2031_v55 = vpop.f32.mrb[4].mxu1  ;;  %v495_v38 = vpop.f32.mrb[5].mxu0 }
 0x123   : > { %vm564_vm1 = vcmp.lt.s32.totalorder %v2613_v53, 300  ;;  %v635_v44 = vmax.f32 %v625_v49, %v629_v43  ;;  %v833_v60 = vsel %vm542_vm13, %v817_v42, 0.0  ;;  %v1079_v52 = vmax.f32 %v1069_v28, %v1073_v41  ;;  %1890 = vst.msk [vmem:[%s2505_s10 + $0xb0] sm:$0xff] %vm542_vm13, %v2031_v55  ;;  %547 = vst.msk [vmem:[%s2505_s10 + $0x20] sm:$0xff] %vm542_vm13, %v495_v38  ;;  %v986_v56 = vpop.f32.mrb[5].mxu1  ;;  %v2000_v7 = vpop.f32.mrb[6].mxu0 }
 0x124   : > { %v2863_v58 = vsel %vm565_vm3, %v1999_v31, -inf  ;;  %v1278_v46 = vsel %vm542_vm13, %v1262_v32, 0.0  ;;  %v834_v54 = vadd.f32 %v833_v60, %v832_v30  ;;  %v1279_v43 = vsel %vm542_vm13, %v1263_v39, 0.0  ;;  %1888 = vst.msk [vmem:[%s2505_s10 + $0xa0] sm:$0xff] %vm542_vm13, %v986_v56  ;;  %550 = vst.msk [vmem:[%s2505_s10 + $0x38] sm:$0xff] %vm542_vm13, %v2000_v7  ;;  %v2032_v29 = vpop.f32.mrb[6].mxu1 }
 0x125   : > { %v632_v41 = vsel %vm542_vm13, %v2863_v58, -inf  ;;  %v498_v42 = vpop.f32.mrb[7].mxu0  ;;  %vm569_vm4 = vcmp.lt.s32.totalorder %v2641_v62, 300  ;;  %v1281_v49 = vsel %vm542_vm13, %v1264_v36, 0.0  ;;  %v1280_v28 = vadd.f32 %v1279_v43, %v1278_v46  ;;  %1891 = vst.msk [vmem:[%s2505_s10 + $0xb8] sm:$0xff] %vm542_vm13, %v2032_v29  ;;  %v989_v30 = vpop.f32.mrb[7].mxu1 }
 0x126   : > { %v631_v45 = vmax.f32 %v632_v41, %v635_v44  ;;  %v2881_v32 = vsel %vm565_vm3, %v2031_v55, -inf  ;;  %548 = vst.msk [vmem:[%s2505_s10 + $0x28] sm:$0xff] %vm542_vm13, %v498_v42  ;;  %v837_v39 = vsel %vm542_vm13, %v819_v8, 0.0  ;;  %v836_v60 = vadd.f32 %v835_v33, %v834_v54  ;;  %1889 = vst.msk [vmem:[%s2505_s10 + $0xa8] sm:$0xff] %vm542_vm13, %v989_v30 }
 0x127   : > { %3559 = vst [vmem:[#allocation14_spill] sm:$0xff] %v2881_v32  ;;  %v1076_v37 = vsel %vm542_vm13, %v2881_v32, -inf  ;;  %v2892_v36 = vsel %vm563_vm9, %v495_v38, -inf  ;;  %v1283_v40 = vsel %vm542_vm13, %v1265_v57, 0.0  ;;  %v1282_v44 = vadd.f32 %v1281_v49, %v1280_v28 }
 0x128   : > { %v1075_v46 = vmax.f32 %v1076_v37, %v1079_v52  ;;  %v628_v43 = vsel %vm542_vm13, %v2892_v36, -inf  ;;  %v820_v33 = vmul.f32 %v2653_v1, %v495_v38  ;;  %v838_v54 = vadd.f32 %v837_v39, %v836_v60 }
 0x129   : > { %v641_v8 = vmax.f32 %v628_v43, %v631_v45  ;;  %v2903_v41 = vsel %vm563_vm9, %v986_v56, -inf  ;;  %v1266_v57 = vmul.f32 %v2656_v2, %v986_v56  ;;  %v1284_v37 = vadd.f32 %v1283_v40, %v1282_v44  ;;  %v2912_v45 = vpop.f32.mrb[8].mxu0 }
 0x12a   : > { %v1072_v32 = vsel %vm542_vm13, %v2903_v41, -inf  ;;  %v2910_v52 = vsel %vm566_vm14, %v2000_v7, -inf  ;;  %v822_v1 = vmul.f32 %v1999_v31, %v2625_v59  ;;  %v839_v48 = vsel %vm542_vm13, %v820_v33, 0.0  ;;  %553 = vst.msk [vmem:[%s2505_s10 + $0x50] sm:$0xff] %vm542_vm13, %v2912_v45  ;;  %v2921_v2 = vpop.f32.mrb[8].mxu1  ;;  %v511_v56 = vpop.f32.mrb[9].mxu0 }
 0x12b   : > { %v1085_v38 = vmax.f32 %v1072_v32, %v1075_v46  ;;  %v634_v49 = vsel %vm542_vm13, %v2910_v52, -inf  ;;  %v840_v28 = vadd.f32 %v839_v48, %v838_v54  ;;  %v1285_v39 = vsel %vm542_vm13, %v1266_v57, 0.0  ;;  %1894 = vst.msk [vmem:[%s2505_s10 + $0xd0] sm:$0xff] %vm542_vm13, %v2921_v2  ;;  %551 = vst.msk [vmem:[%s2505_s10 + $0x40] sm:$0xff] %vm542_vm13, %v511_v56  ;;  %v1002_v32 = vpop.f32.mrb[9].mxu1  ;;  %v2934_v60 = vpop.f32.mrb[10].mxu0 }
 0x12c   : > { %v637_v59 = vmax.f32 %v634_v49, %v641_v8  ;;  %v2927_v31 = vsel %vm566_vm14, %v2032_v29, -inf  ;;  %v1268_v40 = vmul.f32 %v2031_v55, %v2634_v61  ;;  %v1286_v44 = vadd.f32 %v1285_v39, %v1284_v37  ;;  %1892 = vst.msk [vmem:[%s2505_s10 + $0xc0] sm:$0xff] %vm542_vm13, %v1002_v32  ;;  %554 = vst.msk [vmem:[%s2505_s10 + $0x58] sm:$0xff] %vm542_vm13, %v2934_v60  ;;  %v2945_v43 = vpop.f32.mrb[10].mxu1  ;;  %v2947_v8 = vpop.f32.mrb[11].mxu0 }
 0x12d   : > { %v823_v46 = vmul.f32 %v2000_v7, %v2665_v5  ;;  %v1078_v50 = vsel %vm542_vm13, %v2927_v31, -inf  ;;  %v2951_v61 = vsel %vm564_vm1, %v498_v42, -inf  ;;  %v821_v5 = vmul.f32 %v2680_v10, %v498_v42  ;;  %1895 = vst.msk [vmem:[%s2505_s10 + $0xd8] sm:$0xff] %vm542_vm13, %v2945_v43  ;;  %552 = vst.msk [vmem:[%s2505_s10 + $0x48] sm:$0xff] %vm542_vm13, %v2947_v8  ;;  %v2964_v7 = vpop.f32.mrb[11].mxu1 }
 0x12e   : > { %v1081_v33 = vmax.f32 %v1078_v50, %v1085_v38  ;;  %v2956_v55 = vsel %vm564_vm1, %v989_v30, -inf  ;;  %v1269_v54 = vmul.f32 %v2032_v29, %v2677_v9  ;;  %v630_v57 = vsel %vm542_vm13, %v2951_v61, -inf  ;;  %1893 = vst.msk [vmem:[%s2505_s10 + $0xc8] sm:$0xff] %vm542_vm13, %v2964_v7 }
 0x12f   : > { %v1074_v10 = vsel %vm542_vm13, %v2956_v55, -inf  ;;  %v1267_v53 = vmul.f32 %v2683_v11, %v989_v30  ;;  %v643_v42 = vmax.f32 %v630_v57, %v637_v59  ;;  %v841_v37 = vsel %vm542_vm13, %v821_v5, 0.0 }
 0x130   : > { %v1087_v48 = vmax.f32 %v1074_v10, %v1081_v33  ;;  %v2980_v9 = vsel %vm569_vm4, %v2912_v45, -inf  ;;  %v843_v29 = vsel %vm542_vm13, %v822_v1, 0.0  ;;  %v842_v38 = vadd.f32 %v841_v37, %v840_v28 }
 0x131   : > { %v1287_v11 = vsel %vm542_vm13, %v1267_v53, 0.0  ;;  %v640_v30 = vsel %vm542_vm13, %v2980_v9, -inf  ;;  %vm573_vm15 = vcmp.lt.s32.totalorder %v2668_v6, 300  ;;  %v1289_v49 = vsel %vm542_vm13, %v1268_v40, 0.0  ;;  %v2993_v1 = vpop.f32.mrb[12].mxu0 }
 0x132   : > { %v1288_v39 = vadd.f32 %v1287_v11, %v1286_v44  ;;  %v639_v59 = vmax.f32 %v640_v30, %v643_v42  ;;  %v2991_v50 = vsel %vm569_vm4, %v2921_v2, -inf  ;;  %v845_v28 = vsel %vm542_vm13, %v823_v46, 0.0  ;;  %557 = vst.msk [vmem:[%s2505_s10 + $0x70] sm:$0xff] %vm542_vm13, %v2993_v1  ;;  %v3005_v44 = vpop.f32.mrb[12].mxu1  ;;  %v3007_v62 = vpop.f32.mrb[13].mxu0 }
 0x133   : > { %v844_v33 = vadd.f32 %v843_v29, %v842_v38  ;;  %v1084_v5 = vsel %vm542_vm13, %v2991_v50, -inf  ;;  %v3000_v40 = vsel %vm567_vm10, %v511_v56, -inf  ;;  %v1291_v57 = vsel %vm542_vm13, %v1269_v54, 0.0  ;;  %1898 = vst.msk [vmem:[%s2505_s10 + $0xf0] sm:$0xff] %vm542_vm13, %v3005_v44  ;;  %555 = vst.msk [vmem:[%s2505_s10 + $0x60] sm:$0xff] %vm542_vm13, %v3007_v62  ;;  %v3019_v42 = vpop.f32.mrb[13].mxu1 }
 0x134   : > { %v1290_v46 = vadd.f32 %v1289_v49, %v1288_v39  ;;  %v1083_v10 = vmax.f32 %v1084_v5, %v1087_v48  ;;  %v636_v53 = vsel %vm542_vm13, %v3000_v40, -inf  ;;  %v3021_v37 = vpop.f32.mrb[14].mxu0  ;;  %v824_v48 = vmul.f32 %v2722_v17, %v511_v56  ;;  %1896 = vst.msk [vmem:[%s2505_s10 + $0xe0] sm:$0xff] %vm542_vm13, %v3019_v42  ;;  %v3034_v11 = vpop.f32.mrb[14].mxu1 }
 0x135   : > { %v649_v54 = vmax.f32 %v636_v53, %v639_v59  ;;  %v846_v29 = vadd.f32 %v845_v28, %v844_v33  ;;  %v3026_v38 = vsel %vm567_vm10, %v1002_v32, -inf  ;;  %558 = vst.msk [vmem:[%s2505_s10 + $0x78] sm:$0xff] %vm542_vm13, %v3021_v37  ;;  %v3036_v30 = vpop.f32.mrb[15].mxu0  ;;  %v1270_v17 = vmul.f32 %v2725_v18, %v1002_v32  ;;  %1899 = vst.msk [vmem:[%s2505_s10 + $0xf8] sm:$0xff] %vm542_vm13, %v3034_v11  ;;  %v3052_v39 = vpop.f32.mrb[15].mxu1 }
 0x136   : > { %v1080_v49 = vsel %vm542_vm13, %v3026_v38, -inf  ;;  %v1292_v56 = vadd.f32 %v1291_v57, %v1290_v46  ;;  %v3044_v63 = vsel %vm570_vm11, %v2934_v60, -inf  ;;  %556 = vst.msk [vmem:[%s2505_s10 + $0x68] sm:$0xff] %vm542_vm13, %v3036_v30  ;;  %v826_v59 = vmul.f32 %v2912_v45, %v2716_v15  ;;  %1897 = vst.msk [vmem:[%s2505_s10 + $0xe8] sm:$0xff] %vm542_vm13, %v3052_v39 }
 0x137   : > { %v847_v28 = vsel %vm542_vm13, %v824_v48, 0.0  ;;  %v1093_v18 = vmax.f32 %v1080_v49, %v1083_v10  ;;  %v642_v32 = vsel %vm542_vm13, %v3044_v63, -inf  ;;  %v1293_v5 = vsel %vm542_vm13, %v1270_v17, 0.0 }
 0x138   : > { %v848_v33 = vadd.f32 %v847_v28, %v846_v29  ;;  %v645_v57 = vmax.f32 %v642_v32, %v649_v54  ;;  %v3067_v46 = vsel %vm570_vm11, %v2945_v43, -inf  ;;  %vm1225_vm3 = vcmp.eq.s32.totalorder %v2713_v14, %v2552_v35 }
 0x139   : > { %v1272_v15 = vmul.f32 %v2921_v2, %v2719_v16  ;;  %v1294_v45 = vadd.f32 %v1293_v5, %v1292_v56  ;;  %v827_v10 = vmul.f32 %v2934_v60, %v2729_v19  ;;  %v1086_v53 = vsel %vm542_vm13, %v3067_v46, -inf }
 0x13a   : > { %v1089_v48 = vmax.f32 %v1086_v53, %v1093_v18  ;;  %v3080_v3 = vsel %vm568_vm12, %v2947_v8, -inf  ;;  %v825_v54 = vmul.f32 %v2735_v21, %v2947_v8  ;;  %v3087_v16 = vsel %vm568_vm12, %v2964_v7, -inf }
 0x13b   : > { %v1273_v19 = vmul.f32 %v2945_v43, %v2732_v20  ;;  %v638_v2 = vsel %vm542_vm13, %v3080_v3, -inf  ;;  %v1082_v60 = vsel %vm542_vm13, %v3087_v16, -inf  ;;  %v1271_v21 = vmul.f32 %v2743_v23, %v2964_v7 }
 0x13c   : > { %v651_v4 = vmax.f32 %v638_v2, %v645_v57  ;;  %v849_v8 = vsel %vm542_vm13, %v825_v54, 0.0  ;;  %v1095_v29 = vmax.f32 %v1082_v60, %v1089_v48  ;;  %v3104_v49 = vsel %vm573_vm15, %v2993_v1, -inf }
 0x13d   : > { %v851_v20 = vsel %vm542_vm13, %v826_v59, 0.0  ;;  %v850_v43 = vadd.f32 %v849_v8, %v848_v33  ;;  %v1295_v17 = vsel %vm542_vm13, %v1271_v21, 0.0  ;;  %v648_v56 = vsel %vm542_vm13, %v3104_v49, -inf }
 0x13e   : > { %v1297_v23 = vsel %vm542_vm13, %v1272_v15, 0.0  ;;  %v1296_v7 = vadd.f32 %v1295_v17, %v1294_v45  ;;  %v653_v28 = vmax.f32 %v648_v56, %v651_v4  ;;  %v3114_v18 = vsel %vm573_vm15, %v3005_v44, -inf }
 0x13f   : > { %v853_v32 = vsel %vm542_vm13, %v827_v10, 0.0  ;;  %v852_v5 = vadd.f32 %v851_v20, %v850_v43  ;;  %v1092_v59 = vsel %vm542_vm13, %v3114_v18, -inf  ;;  %v3122_v33 = vsel %vm571_vm0, %v3007_v62, -inf }
 0x140   : > { %v1299_v57 = vsel %vm542_vm13, %v1273_v19, 0.0  ;;  %v1298_v15 = vadd.f32 %v1297_v23, %v1296_v7  ;;  %v1097_v45 = vmax.f32 %v1092_v59, %v1095_v29  ;;  %v644_v6 = vsel %vm542_vm13, %v3122_v33, -inf }
 0x141   : > { %v647_v53 = vmax.f32 %v644_v6, %v653_v28  ;;  %v828_v10 = vmul.f32 %v2783_v51, %v3007_v62  ;;  %v854_v48 = vadd.f32 %v853_v32, %v852_v5  ;;  %v3132_v54 = vsel %vm571_vm0, %v3019_v42, -inf }
 0x142   : > { %v1088_v2 = vsel %vm542_vm13, %v3132_v54, -inf  ;;  %v1274_v19 = vmul.f32 %v2798_v0, %v3019_v42  ;;  %v1300_v60 = vadd.f32 %v1299_v57, %v1298_v15  ;;  %v3141_v21 = vsel %vm574_vm2, %v3021_v37, -inf }
 0x143   : > { %v855_v51 = vsel %vm542_vm13, %v828_v10, 0.0  ;;  %v1091_v62 = vmax.f32 %v1088_v2, %v1097_v45  ;;  %v650_v12 = vsel %vm542_vm13, %v3141_v21, -inf  ;;  %v3560_v4 = vmov 0.0  }
 0x144   : > { %v1915_v8 = vsel %vm1225_vm3, 1.0, %v3560_v4  ;;  %v856_v29 = vadd.f32 %v855_v51, %v854_v48  ;;  %v1301_v0 = vsel %vm542_vm13, %v1274_v19, 0.0  ;;  %v652_v42 = vmax.f32 %v650_v12, %v647_v53 }
 0x145   : > { %v3154_v20 = vsel %vm574_vm2, %v3034_v11, -inf  ;;  %v830_v43 = vmul.f32 %v2993_v1, %v2746_v24  ;;  %v1302_v17 = vadd.f32 %v1301_v0, %v1300_v60  ;;  %v1917_v23 = vsel %vm1227_vm5, 1.0, %v3560_v4 }
 0x146   : > { %v1094_v56 = vsel %vm542_vm13, %v3154_v20, -inf  ;;  %v3167_v28 = vsel %vm572_vm6, %v3036_v30, -inf  ;;  %v829_v32 = vmul.f32 %v2818_v34, %v3036_v30  ;;  %v3174_v24 = vsel %vm572_vm6, %v3052_v39, -inf }
 0x147   : > { %v1096_v7 = vmax.f32 %v1094_v56, %v1091_v62  ;;  %v1276_v1 = vmul.f32 %v3005_v44, %v2749_v25  ;;  %v646_v35 = vsel %vm542_vm13, %v3167_v28, -inf  ;;  %v1090_v13 = vsel %vm542_vm13, %v3174_v24, -inf  ;;  %v3194_v56 = vld [vmem:[#allocation2 + $0x1] sm:$0x1] }
 0x148   : > { %v1275_v5 = vmul.f32 %v1915_v8, %v3052_v39  ;;  %v831_v59 = vmul.f32 %v3021_v37, %v2812_v22  ;;  %v654_v34 = vmax.f32 %v652_v42, %v646_v35  ;;  %v857_v30 = vsel %vm542_vm13, %v829_v32, 0.0 }
 0x149   : > { %v1098_v14 = vmax.f32 %v1096_v7, %v1090_v13  ;;  %v1277_v57 = vmul.f32 %v3034_v11, %v1917_v23  ;;  %v858_v15 = vadd.f32 %v857_v30, %v856_v29  ;;  %v859_v44 = vsel %vm542_vm13, %v830_v43, 0.0  ;;  %v3192_v43 = vld [vmem:[#allocation2] sm:$0x1] }
 0x14a   : > { %v1303_v25 = vsel %vm542_vm13, %v1275_v5, 0.0  ;;  %v655_v45 = vrot.slane %v654_v34, 4  ;;  %v1305_v10 = vsel %vm542_vm13, %v1276_v1, 0.0  ;;  %v861_v48 = vsel %vm542_vm13, %v831_v59, 0.0 }
 0x14b   : > { %v1099_v6 = vrot.slane %v1098_v14, 4  ;;  %v1304_v53 = vadd.f32 %v1303_v25, %v1302_v17  ;;  %v860_v39 = vadd.f32 %v859_v44, %v858_v15  ;;  %v1307_v19 = vsel %vm542_vm13, %v1277_v57, 0.0  ;;  %v3562_v57 = vld [vmem:[#allocation8_spill] sm:$0xff] }
 0x14c   : > { %v656_v22 = vmax.f32 %v654_v34, %v655_v45  ;;  %v670_v7 = vsub.s32 0, %v2533_v27  ;;  %v3561_v27 = vld [vmem:[#allocation10_spill] sm:$0xff] }
 0x14d   : > { %v1100_v37 = vmax.f32 %v1098_v14, %v1099_v6  ;;  %v1306_v2 = vadd.f32 %v1305_v10, %v1304_v53  ;;  %v862_v60 = vadd.f32 %v861_v48, %v860_v39  ;;  %v815_v48 = vld [vmem:[#allocation4] sm:$0x1] }
 0x14e   : > { %v657_v11 = vrot.slane %v656_v22, 2 }
 0x14f   : > { %v1101_v51 = vrot.slane %v1100_v37, 2  ;;  %v1308_v62 = vadd.f32 %v1307_v19, %v1306_v2  ;;  %v863_v12 = vrot.slane %v862_v60, 4 }
 0x150   : > { %v658_v4 = vmax.f32 %v656_v22, %v657_v11 }
 0x151   : > { %v1102_v8 = vmax.f32 %v1100_v37, %v1101_v51  ;;  %v864_v29 = vadd.f32 %v863_v12, %v862_v60  ;;  %v3563_v12 = vld [vmem:[#allocation13_spill] sm:$0xff] }
 0x152   : > { %v659_v0 = vrot.slane %v658_v4, 1 }
 0x153   : > { %v1103_v42 = vrot.slane %v1102_v8, 1  ;;  %v865_v17 = vrot.slane %v864_v29, 2 }
 0x154   : > { %v660_v23 = vmax.f32 %v658_v4, %v659_v0 }
 0x155   : > { %v1104_v32 = vmax.f32 %v1102_v8, %v1103_v42  ;;  %v866_v1 = vadd.f32 %v865_v17, %v864_v29  ;;  %v3564_v42 = vld [vmem:[#allocation14_spill] sm:$0xff] }
 0x156   : > { %v3198_v35 = vmax.f32 %v3192_v43, %v660_v23 }
 0x157   : > { %v3201_v13 = vmax.f32 %v3194_v56, %v1104_v32  ;;  %v867_v5 = vrot.slane %v866_v1, 1 }
 0x158   : > { %v3204_v59 = vrot.slane %v3198_v35, %v670_v7  ;;  %761 = vst.msk [vmem:[#allocation2] sm:$0x1] %vm759_vm7, %v3198_v35 }
 0x159   : > { %v1106_v34 = vsub.f32 %v3194_v56, %v3201_v13  ;;  %1205 = vst.msk [vmem:[#allocation2 + $0x1] sm:$0x1] %vm759_vm7, %v3201_v13  ;;  %v868_v25 = vadd.f32 %v867_v5, %v866_v1 }
 0x15a   : > { %v673_v30 = vsub.f32 %v3561_v27, %v3204_v59  ;;  %v674_v14 = vsub.f32 %v2844_v47, %v3204_v59  ;;  %v675_v15 = vsub.f32 %v3562_v57, %v3204_v59  ;;  %v676_v44 = vsub.f32 %v2826_v26, %v3204_v59 }
 0x15b   : > { %v677_v45 = vsub.f32 %v2892_v36, %v3204_v59  ;;  %v678_v6 = vsub.f32 %v2951_v61, %v3204_v59  ;;  %v679_v53 = vsub.f32 %v2863_v58, %v3204_v59  ;;  %v680_v10 = vsub.f32 %v2910_v52, %v3204_v59 }
 0x15c   : > { %v681_v47 = vsub.f32 %v3000_v40, %v3204_v59  ;;  %v682_v39 = vsub.f32 %v3080_v3, %v3204_v59  ;;  %v1309_v26 = vrot.slane %v1308_v62, 4  ;;  %v683_v36 = vsub.f32 %v2980_v9, %v3204_v59 }
 0x15d   : > { %v684_v61 = vsub.f32 %v3044_v63, %v3204_v59  ;;  %v685_v58 = vsub.f32 %v3122_v33, %v3204_v59  ;;  %v686_v52 = vsub.f32 %v3167_v28, %v3204_v59  ;;  %v687_v40 = vsub.f32 %v3104_v49, %v3204_v59 }
 0x15e   : > { %v688_v3 = vsub.f32 %v3141_v21, %v3204_v59  ;;  %v689_v22 = vmul.f32 1.442695, %v673_v30  ;;  %v691_v37 = vmul.f32 1.442695, %v674_v14  ;;  %v693_v2 = vmul.f32 1.442695, %v675_v15 }
 0x15f   : > { %v695_v19 = vmul.f32 1.442695, %v676_v44  ;;  %v869_v9 = vadd.f32 %v868_v25, %v815_v48  ;;  %v3245_v63 = vrot.slane %v3201_v13, %v670_v7  ;;  %v697_v60 = vmul.f32 1.442695, %v677_v45  ;;  %v3565_v14 = vld [vmem:[#allocation11_spill] sm:$0xff]  ;;  %v3566_v48 = vld [vmem:[#allocation9_spill] sm:$0xff] }
 0x160   : > { %2198 = vpow2.f32 %v689_v22  ;;  %v1310_v11 = vadd.f32 %v1309_v26, %v1308_v62  ;;  %v699_v51 = vmul.f32 1.442695, %v678_v6  ;;  %v701_v8 = vmul.f32 1.442695, %v679_v53  ;;  %v1110_v13 = vld [vmem:[#allocation3 + $0x1] sm:$0x1] }
 0x161   : > { %2200 = vpow2.f32 %v691_v37  ;;  %870 = vst.msk [vmem:[#allocation4] sm:$0x1] %vm759_vm7, %v869_v9  ;;  %v1119_v4 = vsub.f32 %v3563_v12, %v3245_v63  ;;  %v1122_v29 = vsub.f32 %v2903_v41, %v3245_v63  ;;  %v1123_v0 = vsub.f32 %v2956_v55, %v3245_v63 }
 0x162   : > { %2202 = vpow2.f32 %v693_v2  ;;  %v1124_v17 = vsub.f32 %v3564_v42, %v3245_v63  ;;  %v1125_v23 = vsub.f32 %v2927_v31, %v3245_v63  ;;  %v1126_v62 = vsub.f32 %v3026_v38, %v3245_v63 }
 0x163   : > { %2204 = vpow2.f32 %v695_v19  ;;  %v1311_v7 = vrot.slane %v1310_v11, 2  ;;  %v703_v32 = vmul.f32 1.442695, %v680_v10  ;;  %v1127_v1 = vsub.f32 %v3087_v16, %v3245_v63  ;;  %v3567_v19 = vld [vmem:[#allocation12_spill] sm:$0xff] }
 0x164   : > { %2206 = vpow2.f32 %v697_v60  ;;  %v1128_v41 = vsub.f32 %v2991_v50, %v3245_v63  ;;  %v705_v5 = vmul.f32 1.442695, %v681_v47  ;;  %v1129_v55 = vsub.f32 %v3067_v46, %v3245_v63 }
 0x165   : > { %2208 = vpow2.f32 %v699_v51  ;;  %v1130_v27 = vsub.f32 %v3132_v54, %v3245_v63  ;;  %v1131_v30 = vsub.f32 %v3174_v24, %v3245_v63  ;;  %v1118_v57 = vsub.f32 %v3565_v14, %v3245_v63 }
 0x166   : > { %2210 = vpow2.f32 %v701_v8  ;;  %v1132_v15 = vsub.f32 %v3114_v18, %v3245_v63  ;;  %v1133_v25 = vsub.f32 %v3154_v20, %v3245_v63  ;;  %v707_v45 = vmul.f32 1.442695, %v682_v39 }
 0x167   : > { %v1312_v6 = vadd.f32 %v1311_v7, %v1310_v11  ;;  %2212 = vpow2.f32 %v703_v32  ;;  %v709_v10 = vmul.f32 1.442695, %v683_v36  ;;  %v1120_v26 = vsub.f32 %v3566_v48, %v3245_v63 }
 0x168   : > { %v711_v37 = vmul.f32 1.442695, %v684_v61  ;;  %v1121_v9 = vsub.f32 %v3567_v19, %v3245_v63  ;;  %2214 = vpow2.f32 %v705_v5  ;;  %v1134_v39 = vmul.f32 1.442695, %v1118_v57  ;;  %v1261_v57 = vld [vmem:[#allocation4 + $0x1] sm:$0x1] }
 0x169   : > { %2216 = vpow2.f32 %v707_v45  ;;  %v1136_v36 = vmul.f32 1.442695, %v1119_v4  ;;  %v1313_v12 = vrot.slane %v1312_v6, 1  ;;  %v1138_v32 = vmul.f32 1.442695, %v1120_v26 }
 0x16a   : > { %v2199_v44 = vpop.eup %2198  ;;  %2218 = vpow2.f32 %v709_v10  ;;  %v1140_v14 = vmul.f32 1.442695, %v1121_v9  ;;  %v713_v5 = vmul.f32 1.442695, %v685_v58  ;;  %v1142_v4 = vmul.f32 1.442695, %v1122_v29 }
 0x16b   : > { %v2201_v53 = vpop.eup %2200  ;;  %v721_v47 = vsel %vm542_vm13, %v2199_v44, 0.0  ;;  %2220 = vpow2.f32 %v711_v37  ;;  %v715_v48 = vmul.f32 1.442695, %v686_v52  ;;  %v1144_v33 = vmul.f32 1.442695, %v1123_v0 }
 0x16c   : > { %v2203_v22 = vpop.eup %2202  ;;  %v722_v2 = vsel %vm542_vm13, %v2201_v53, 0.0  ;;  %2222 = vpow2.f32 %v1134_v39  ;;  %v1146_v28 = vmul.f32 1.442695, %v1124_v17  ;;  %v719_v0 = vmul.f32 1.442695, %v688_v3 }
 0x16d   : > { %v2205_v60 = vpop.eup %2204  ;;  %v723_v51 = vadd.f32 %v722_v2, %v721_v47  ;;  %v724_v11 = vsel %vm542_vm13, %v2203_v22, 0.0  ;;  %2224 = vpow2.f32 %v1136_v36  ;;  %v1314_v47 = vadd.f32 %v1313_v12, %v1312_v6 }
 0x16e   : > { %v2207_v8 = vpop.eup %2206  ;;  %v726_v61 = vsel %vm542_vm13, %v2205_v60, 0.0  ;;  %2226 = vpow2.f32 %v1138_v32  ;;  %v717_v2 = vmul.f32 1.442695, %v687_v40  ;;  %v1148_v40 = vmul.f32 1.442695, %v1125_v23 }
 0x16f   : > { %v725_v7 = vadd.f32 %v724_v11, %v723_v51  ;;  %v2209_v44 = vpop.eup %2208  ;;  %v728_v45 = vsel %vm542_vm13, %v2207_v8, 0.0  ;;  %2228 = vpow2.f32 %v1140_v14  ;;  %v1315_v58 = vadd.f32 %v1314_v47, %v1261_v57 }
 0x170   : > { %v2211_v10 = vpop.eup %2210  ;;  %v730_v22 = vsel %vm542_vm13, %v2209_v44, 0.0  ;;  %2230 = vpow2.f32 %v713_v5  ;;  %v1150_v21 = vmul.f32 1.442695, %v1126_v62  ;;  %v1152_v31 = vmul.f32 1.442695, %v1127_v1 }
 0x171   : > { %v727_v53 = vadd.f32 %v726_v61, %v725_v7  ;;  %v2213_v37 = vpop.eup %2212  ;;  %v732_v6 = vsel %vm542_vm13, %v2211_v10, 0.0  ;;  %2232 = vpow2.f32 %v1142_v4  ;;  %1316 = vst.msk [vmem:[#allocation4 + $0x1] sm:$0x1] %vm759_vm7, %v1315_v58  ;;  %v1154_v62 = vmul.f32 1.442695, %v1128_v41 }
 0x172   : > { %v2215_v52 = vpop.eup %2214  ;;  %2234 = vpow2.f32 %v715_v48  ;;  %v734_v49 = vsel %vm542_vm13, %v2213_v37, 0.0  ;;  %v662_v16 = vsub.f32 %v3192_v43, %v3198_v35  ;;  %v1158_v43 = vmul.f32 1.442695, %v1130_v27 }
 0x173   : > { %v729_v26 = vadd.f32 %v728_v45, %v727_v53  ;;  %v2217_v9 = vpop.eup %2216  ;;  %2236 = vpow2.f32 %v1144_v33  ;;  %v736_v51 = vsel %vm542_vm13, %v2215_v52, 0.0  ;;  %v1156_v53 = vmul.f32 1.442695, %v1129_v55 }
 0x174   : > { %v2219_v60 = vpop.eup %2218  ;;  %2238 = vpow2.f32 %v717_v2  ;;  %v738_v11 = vsel %vm542_vm13, %v2217_v9, 0.0  ;;  %v663_v48 = vmul.f32 1.442695, %v662_v16  ;;  %v1160_v33 = vmul.f32 1.442695, %v1131_v30 }
 0x175   : > { %v731_v29 = vadd.f32 %v730_v22, %v729_v26  ;;  %v2221_v17 = vpop.eup %2220  ;;  %2240 = vpow2.f32 %v1146_v28  ;;  %v740_v38 = vsel %vm542_vm13, %v2219_v60, 0.0 }
 0x176   : > { %v2223_v59 = vpop.eup %2222  ;;  %2242 = vpow2.f32 %v719_v0  ;;  %v742_v5 = vsel %vm542_vm13, %v2221_v17, 0.0 }
 0x177   : > { %v733_v19 = vadd.f32 %v732_v6, %v731_v29  ;;  %v2225_v39 = vpop.eup %2224  ;;  %2244 = vpow2.f32 %v1148_v40  ;;  %v1166_v23 = vsel %vm542_vm13, %v2223_v59, 0.0  ;;  %v1162_v6 = vmul.f32 1.442695, %v1132_v15 }
 0x178   : > { %v2227_v36 = vpop.eup %2226  ;;  %v1167_v8 = vsel %vm542_vm13, %v2225_v39, 0.0  ;;  %2246 = vpow2.f32 %v1150_v21 }
 0x179   : > { %v735_v42 = vadd.f32 %v734_v49, %v733_v19  ;;  %v2229_v7 = vpop.eup %2228  ;;  %v1168_v32 = vadd.f32 %v1167_v8, %v1166_v23  ;;  %v1169_v14 = vsel %vm542_vm13, %v2227_v36, 0.0  ;;  %2248 = vpow2.f32 %v1152_v31  ;;  %v665_v8 = vld [vmem:[#allocation3] sm:$0x1] }
 0x17a   : > { %v2231_v61 = vpop.eup %2230  ;;  %v1171_v41 = vsel %vm542_vm13, %v2229_v7, 0.0  ;;  %2250 = vpow2.f32 %v1154_v62  ;;  %v1164_v19 = vmul.f32 1.442695, %v1133_v25 }
 0x17b   : > { %v737_v3 = vadd.f32 %v736_v51, %v735_v42  ;;  %v2233_v44 = vpop.eup %2232  ;;  %v1170_v57 = vadd.f32 %v1169_v14, %v1168_v32  ;;  %v744_v47 = vsel %vm542_vm13, %v2231_v61, 0.0  ;;  %2252 = vpow2.f32 %v1156_v53 }
 0x17c   : > { %v2235_v45 = vpop.eup %2234  ;;  %v1173_v46 = vsel %vm542_vm13, %v2233_v44, 0.0  ;;  %2254 = vpow2.f32 %v1158_v43  ;;  %v1107_v14 = vmul.f32 1.442695, %v1106_v34 }
 0x17d   : > { %v739_v12 = vadd.f32 %v738_v11, %v737_v3  ;;  %v2237_v4 = vpop.eup %2236  ;;  %v1172_v35 = vadd.f32 %v1171_v41, %v1170_v57  ;;  %v746_v22 = vsel %vm542_vm13, %v2235_v45, 0.0  ;;  %2256 = vpow2.f32 %v663_v48 }
 0x17e   : > { %v2239_v10 = vpop.eup %2238  ;;  %v1175_v54 = vsel %vm542_vm13, %v2237_v4, 0.0  ;;  %2258 = vpow2.f32 %v1160_v33  ;;  %v3568_v33 = vlaneseq (!%p1918_p12) }
 0x17f   : > { %v741_v1 = vadd.f32 %v740_v38, %v739_v12  ;;  %v2241_v55 = vpop.eup %2240  ;;  %v1174_v58 = vadd.f32 %v1173_v46, %v1172_v35  ;;  %v748_v29 = vsel %vm542_vm13, %v2239_v10, 0.0  ;;  %2260 = vpow2.f32 %v1162_v6 }
 0x180   : > { %v2243_v37 = vpop.eup %2242  ;;  %v1177_v0 = vsel %vm542_vm13, %v2241_v55, 0.0  ;;  %2262 = vpow2.f32 %v1164_v19 }
 0x181   : > { %v743_v50 = vadd.f32 %v742_v5, %v741_v1  ;;  %v2245_v27 = vpop.eup %2244  ;;  %v1176_v28 = vadd.f32 %v1175_v54, %v1174_v58  ;;  %v750_v30 = vsel %vm542_vm13, %v2243_v37, 0.0  ;;  %2264 = vpow2.f32 %v1107_v14  ;;  %v1920_v37 = vld [vmem:[%s2487_s12 + $0x1] sm:$0x1] (!%p1918_p12) }
 0x182   : > { %v2247_v24 = vpop.eup %2246  ;;  %v1179_v40 = vsel %vm542_vm13, %v2245_v27, 0.0  ;;  %v3364_v58 = vand.u32 (!%p1918_p12), 127, %v3568_v33  ;;  %vm1370_vm8 = vcmp.ne.s32.totalorder (!%p1918_p12), %v1920_v37, 4294967196  ;;  %v1364_v27 = vld [vmem:[#allocation2 + $0x1] sm:$0x1] (!%p1918_p12) }
 0x183   : > { %v745_v26 = vadd.f32 %v744_v47, %v743_v50  ;;  %v1178_v9 = vadd.f32 %v1177_v0, %v1176_v28  ;;  %v2249_v60 = vpop.eup %2248  ;;  %v1181_v42 = vsel %vm542_vm13, %v2247_v24, 0.0  ;;  %v1374_v28 = vld [vmem:[#allocation4 + $0x1] sm:$0x1] (!%p1918_p12) }
 0x184   : > { %v2251_v17 = vpop.eup %2250  ;;  %v1183_v59 = vsel %vm542_vm13, %v2249_v60, 0.0  ;;  %vm1358_vm4 = vcmp.eq.s32.totalorder (!%p1918_p12), %v3364_v58, 1  ;;  %vm1357_vm10 = vcmp.eq.s32.totalorder (!%p1918_p12), %v3364_v58, 0 }
 0x185   : > { %v747_v2 = vadd.f32 %v746_v22, %v745_v26  ;;  %v1180_v18 = vadd.f32 %v1179_v40, %v1178_v9  ;;  %v2253_v3 = vpop.eup %2252  ;;  %v1185_v63 = vsel %vm542_vm13, %v2251_v17, 0.0  ;;  %v1334_v9 = vld [vmem:[#allocation4] sm:$0x1] (!%p1918_p12) }
 0x186   : > { %v2255_v25 = vpop.eup %2254  ;;  %v1187_v36 = vsel %vm542_vm13, %v2253_v3, 0.0 }
 0x187   : > { %v749_v52 = vadd.f32 %v748_v29, %v747_v2  ;;  %v1182_v51 = vadd.f32 %v1181_v42, %v1180_v18  ;;  %v2257_v31 = vpop.eup %2256  ;;  %v1189_v62 = vsel %vm542_vm13, %v2255_v25, 0.0  ;;  %v1329_v2 = vld [vmem:[%s2487_s12] sm:$0x1] (!%p1918_p12) }
 0x188   : > { %v2259_v12 = vpop.eup %2258  ;;  %v666_v16 = vmul.f32 %v2257_v31, %v665_v8  ;;  %vm1330_vm9 = vcmp.ne.s32.totalorder (!%p1918_p12), %v1329_v2, 4294967196 }
 0x189   : > { %v751_v49 = vadd.f32 %v750_v30, %v749_v52  ;;  %v1184_v39 = vadd.f32 %v1183_v59, %v1182_v51  ;;  %v2261_v32 = vpop.eup %2260  ;;  %v1191_v44 = vsel %vm542_vm13, %v2259_v12, 0.0  ;;  %v1321_v52 = vld [vmem:[#allocation2] sm:$0x1] (!%p1918_p12)  ;;  %v2393_v30 = vmov (!%p1918_p12), 0.0  }
 0x18a   : > { %v2263_v5 = vpop.eup %2262  ;;  %v1193_v45 = vsel %vm542_vm13, %v2261_v32, 0.0 }
 0x18b   : > { %v752_v15 = vrot.slane %v751_v49, 4  ;;  %v1186_v11 = vadd.f32 %v1185_v63, %v1184_v39  ;;  %v1195_v41 = vsel %vm542_vm13, %v2263_v5, 0.0  ;;  %v2265_v56 = vpop.eup %2264  ;;  %vm1328_vm13 = vcmp.lt.s32.totalorder (!%p1918_p12), %v3364_v58, 63 }
 0x18c   : > { %v1111_v48 = vmul.f32 %v2265_v56, %v1110_v13  ;;  %vm1371_vm14 = vmand (!%p1918_p12), %vm1328_vm13, %vm1370_vm8 }
 0x18d   : > { %v753_v21 = vadd.f32 %v752_v15, %v751_v49  ;;  %v1188_v7 = vadd.f32 %v1187_v36, %v1186_v11  ;;  %vm1331_vm1 = vmand (!%p1918_p12), %vm1328_vm13, %vm1330_vm9  ;;  %v1921_v19 = vsel (!%p1918_p12), %vm1371_vm14, 1.0, %v2393_v30 }
 0x18e   : > { %v1919_v60 = vsel (!%p1918_p12), %vm1331_vm1, 1.0, %v2393_v30 }
 0x18f   : > { %v754_v20 = vrot.slane %v753_v21, 2  ;;  %v1190_v61 = vadd.f32 %v1189_v62, %v1188_v7  ;;  %v1347_v59 = vsel (!%p1918_p12), %vm759_vm7, %v1919_v60, 0.0 }
 0x191   : > { %v755_v23 = vadd.f32 %v754_v20, %v753_v21  ;;  %v1192_v53 = vadd.f32 %v1191_v44, %v1190_v61  ;;  %v1387_v21 = vsel (!%p1918_p12), %vm759_vm7, %v1921_v19, 0.0 }
 0x193   : > { %v756_v38 = vrot.slane %v755_v23, 1  ;;  %v1194_v50 = vadd.f32 %v1193_v45, %v1192_v53 }
 0x195   : > { %v757_v1 = vadd.f32 %v756_v38, %v755_v23  ;;  %v1196_v4 = vadd.f32 %v1195_v41, %v1194_v50 }
 0x197   : > { %v758_v57 = vadd.f32 %v757_v1, %v666_v16  ;;  %v1197_v47 = vrot.slane %v1196_v4, 4 }
 0x199   : > { %760 = vst.msk [vmem:[#allocation3] sm:$0x1] %vm759_vm7, %v758_v57  ;;  %v1198_v43 = vadd.f32 %v1197_v47, %v1196_v4 }
 0x19b   : > { %v1199_v35 = vrot.slane %v1198_v43, 2 }
 0x19d   : > { %v1200_v10 = vadd.f32 %v1199_v35, %v1198_v43 }
 0x19f   : > { %v1201_v34 = vrot.slane %v1200_v10, 1  ;;  %1320 = sbr.rel (%p1918_p12) target bundleno = 664 (0x298), region = 40 }
 0x1a0   : > { %v1322_v22 = vld [vmem:[#allocation3] sm:$0x1] (!%p1918_p12) }
 0x1a1   : > { %v1202_v26 = vadd.f32 %v1201_v34, %v1200_v10 }
 0x1a3   : > { %v1203_v46 = vadd.f32 %v1202_v26, %v1111_v48 }
 0x1a5   : > { %1204 = vst.msk [vmem:[#allocation3 + $0x1] sm:$0x1] %vm759_vm7, %v1203_v46 }
 0x1ac   : > { %v1365_v55 = vld [vmem:[#allocation3 + $0x1] sm:$0x1] }
 0x1ad   : > { %2266 = vlog2.f32 %v1365_v55 }
 0x1ae   : > { %2268 = vlog2.f32 %v1322_v22 }
 0x1b7   : > { %v2267_v54 = vpop.eup %2266 }
 0x1b8   : > { %v1367_v29 = vmul.f32 0.6931472, %v2267_v54  ;;  %v2269_v6 = vpop.eup %2268 }
 0x1b9   : > { %v1324_v24 = vmul.f32 0.6931472, %v2269_v6 }
 0x1ba   : > { %v1368_v0 = vadd.f32 %v1367_v29, %v1364_v27 }
 0x1bb   : > { %v1325_v40 = vadd.f32 %v1324_v24, %v1321_v52 }
 0x1bc   : > { %v1375_v49 = vsub.f32 %v1368_v0, %v1374_v28 }
 0x1bd   : > { %v1335_v15 = vsub.f32 %v1325_v40, %v1334_v9 }
 0x1be   : > { %v1376_v18 = vmul.f32 %v1921_v19, %v1375_v49 }
 0x1bf   : > { %v1336_v17 = vmul.f32 %v1919_v60, %v1335_v15 }
 0x1c0   : > { %v1377_v42 = vsel %vm759_vm7, %v1376_v18, 0.0 }
 0x1c1   : > { %1378 = vadd.xlane.f32.xlu1 %v1377_v42  ;;  %v1337_v51 = vsel %vm759_vm7, %v1336_v17, 0.0 }
 0x1c2   : > { %1338 = vadd.xlane.f32.xlu0 %v1337_v51 }
 0x1c5   : > { %1388 = vadd.xlane.f32.xlu1 %v1387_v21 }
 0x1c6   : > { %1348 = vadd.xlane.f32.xlu0 %v1347_v59 }
 0x24e   : > { %v1379_v3 = vpop.xlane.xlu1 %1378 }
 0x24f   : > { %v1380_v39 = vrot.slane %v1379_v3, 4  ;;  %v1339_v20 = vpop.xlane.xlu0 %1338 }
 0x250   : > { %v1340_v25 = vrot.slane %v1339_v20, 4 }
 0x251   : > { %v1381_v63 = vadd.f32 %v1380_v39, %v1379_v3 }
 0x252   : > { %v1389_v11 = vpop.xlane.xlu1 %1388  ;;  %v1341_v31 = vadd.f32 %v1340_v25, %v1339_v20 }
 0x253   : > { %v1390_v23 = vrot.slane %v1389_v11, 4  ;;  %v1382_v36 = vrot.slane %v1381_v63, 2  ;;  %v1349_v12 = vpop.xlane.xlu0 %1348 }
 0x254   : > { %v1342_v8 = vrot.slane %v1341_v31, 2  ;;  %v1350_v38 = vrot.slane %v1349_v12, 4 }
 0x255   : > { %v1391_v7 = vadd.f32 %v1390_v23, %v1389_v11  ;;  %v1383_v16 = vadd.f32 %v1382_v36, %v1381_v63 }
 0x256   : > { %v1351_v32 = vadd.f32 %v1350_v38, %v1349_v12  ;;  %v1343_v61 = vadd.f32 %v1342_v8, %v1341_v31 }
 0x257   : > { %v1392_v62 = vrot.slane %v1391_v7, 2  ;;  %v1384_v45 = vrot.slane %v1383_v16, 1 }
 0x258   : > { %v1352_v14 = vrot.slane %v1351_v32, 2  ;;  %v1344_v44 = vrot.slane %v1343_v61, 1 }
 0x259   : > { %v1393_v1 = vadd.f32 %v1392_v62, %v1391_v7  ;;  %v1385_v47 = vadd.f32 %v1384_v45, %v1383_v16 }
 0x25a   : > { %v1353_v5 = vadd.f32 %v1352_v14, %v1351_v32  ;;  %v1345_v53 = vadd.f32 %v1344_v44, %v1343_v61 }
 0x25b   : > { %v1394_v57 = vrot.slane %v1393_v1, 1 }
 0x25c   : > { %2041 = vpush %v1345_v53  ;;  %v1354_v50 = vrot.slane %v1353_v5, 1 }
 0x25d   : > { %v1395_v4 = vadd.f32 %v1394_v57, %v1393_v1 }
 0x25e   : > { %v1355_v41 = vadd.f32 %v1354_v50, %v1353_v5 }
 0x260   : > { %2043 = vpush %v1355_v41 }
 0x261   : > { %2045 = vpush %v1385_v47 }
 0x262   : > { %2047 = vpush %v1395_v4 }
 0x28d   : > { %s2042_s17 = spop %2041 }
 0x28e   : > { %v1361_v35 = vstv %s2042_s17 }
 0x291   : > { %s2044_s22 = spop %2043 }
 0x292   : > { %v1359_v43 = vstv %s2044_s22  ;;  %s2046_s6 = spop %2045 }
 0x293   : > { %v1360_v10 = vsel %vm1358_vm4, %v1359_v43, 0.0  ;;  %v1399_v56 = vstv %s2046_s6  ;;  %s2048_s7 = spop %2047 }
 0x294   : > { %v1362_v13 = vsel %vm1357_vm10, %v1361_v35, %v1360_v10  ;;  %v1397_v34 = vstv %s2048_s7 }
 0x295   : > { %1363 = vst [vmem:[%s2497_s27] sm:$0x1] %v1362_v13  ;;  %v1398_v48 = vsel %vm1358_vm4, %v1397_v34, 0.0 }
 0x296   : > { %v1400_v26 = vsel %vm1357_vm10, %v1399_v56, %v1398_v48 }
 0x297   : > { %1922 = vst [vmem:[%s2497_s27 + $0x1] sm:$0x1] %v1400_v26 }
 0x298 PF: > { %1413 = sbr.rel (!%p2465_p5) target bundleno = 727 (0x2d7), region = 44  ;;  %s1416_s9 = ssub.s32 (%p2465_p5), 38, %s2481_s8 }
 0x299   : > { %s2049_s11 = smul.u32 (%p2465_p5), 76, %s2344_s18  ;;  %p1417_p13 = scmp.lt.s32.totalorder (%p2465_p5), %s1416_s9, 16 }
 0x29b   : > { %s1422_s12 = sadd.s32 (%p2465_p5), %s2049_s11, %s2481_s8 }
 0x29c   : > { %s1929_s13 = sshll.u32 (%p2465_p5), %s1422_s12, 3 }
 0x29d   : > { %s3388_s25 = scalar_lea.vmem (%p2465_p5), %s3535_s3, %s1929_s13  }
 0x29f   : > { %s3591_s9 = smov (!%p1417_p13, %s1416_s9), 16 }
 0x2a0   : > { %s1926_s14 = sshll.u32 %s3591_s9, 8 }
 0x2a1   : > { %p1930_p0 = scmp.eq.s32.totalorder %s1926_s14, 0 }
 0x2a2   : > { %s3391_s26 = sshrl.u32 (!%p1930_p0), %s3591_s9, 4 }
 0x2a3   : > { %1427 = sbr.rel (%p1930_p0) target bundleno = 727 (0x2d7), region = 48  ;;  %p1931_p1 = scmp.le.s32.totalorder (!%p1930_p0), %s3391_s26, 0 }
 0x2aa   : > { %1736 = sbr.rel (%p1931_p1) target bundleno = 706 (0x2c2), region = 149  ;;  %s3569_s18 = smov (!%p1931_p1), %s3388_s25 }
 0x2ab   : > { %s3570_s8 = smov (!%p1931_p1), %s2505_s10  ;;  %s3400_s27 = smov (!%p1931_p1), 0  }
 0x2ac   : > { %s3402_s28 = smov (!%p1931_p1), 0  }
 0x2b1 LB: >> { %v1553_v46 = vld [vmem:[%s2364_s8] sm:$0xff]  ;;  %v1555_v55 = vld [vmem:[%s2364_s8 + $0x8] sm:$0xff]  ;;  %v1557_v22 = vld [vmem:[%s2364_s8 + $0x10] sm:$0xff]  ;;  %s1617_s29 = sadd.s32 1, %s2368_s27  ;;  %s1547_s28 = sadd.s32 1, %s2372_s28   ;;  %s2372_s28 = sphi %s3402_s28, %s1547_s28   ;;  %s2368_s27 = sphi %s3400_s27, %s3573_s27   ;;  %s2364_s8 = sphi %s3570_s8, %s3572_s8   ;;  %s2360_s18 = sphi %s3569_s18, %s3571_s18  }
 0x2b2   : >> { %1554 = vst [vmem:[%s2360_s18] sm:$0xff] %v1553_v46  ;;  %1556 = vst [vmem:[%s2360_s18 + $0x8] sm:$0xff] %v1555_v55  ;;  %v1559_v33 = vld [vmem:[%s2364_s8 + $0x18] sm:$0xff]  ;;  %v1561_v58 = vld [vmem:[%s2364_s8 + $0x20] sm:$0xff]  ;;  %p1618_p2 = scmp.ge.s32.totalorder %s1617_s29, %s3391_s26  ;;  %p1546_p3 = scmp.ge.s32.totalorder %s1547_s28, %s3391_s26 }
 0x2b3   : >> { %1558 = vst [vmem:[%s2360_s18 + $0x10] sm:$0xff] %v1557_v22  ;;  %v1563_v37 = vld [vmem:[%s2364_s8 + $0x28] sm:$0xff]  ;;  %1560 = vst [vmem:[%s2360_s18 + $0x18] sm:$0xff] %v1559_v33  ;;  %v1565_v2 = vld [vmem:[%s2364_s8 + $0x30] sm:$0xff] }
 0x2b4   : >> { %1562 = vst [vmem:[%s2360_s18 + $0x20] sm:$0xff] %v1561_v58  ;;  %1564 = vst [vmem:[%s2360_s18 + $0x28] sm:$0xff] %v1563_v37  ;;  %v1567_v54 = vld [vmem:[%s2364_s8 + $0x38] sm:$0xff]  ;;  %v1569_v27 = vld [vmem:[%s2364_s8 + $0x40] sm:$0xff]  ;;  %s3593_s29 = smov (%p1618_p2, %s1617_s29), 0 }
 0x2b5   : >> { %1566 = vst [vmem:[%s2360_s18 + $0x30] sm:$0xff] %v1565_v2  ;;  %1568 = vst [vmem:[%s2360_s18 + $0x38] sm:$0xff] %v1567_v54  ;;  %v1571_v29 = vld [vmem:[%s2364_s8 + $0x48] sm:$0xff]  ;;  %v1573_v6 = vld [vmem:[%s2364_s8 + $0x50] sm:$0xff]  ;;  %s1932_s5 = sshll.u32 %s3593_s29, 7  ;;  %s3573_s27 = smov %s3593_s29 }
 0x2b6   : >> { %1570 = vst [vmem:[%s2360_s18 + $0x40] sm:$0xff] %v1569_v27  ;;  %v1575_v28 = vld [vmem:[%s2364_s8 + $0x58] sm:$0xff]  ;;  %1572 = vst [vmem:[%s2360_s18 + $0x48] sm:$0xff] %v1571_v29  ;;  %v1577_v52 = vld [vmem:[%s2364_s8 + $0x60] sm:$0xff]  ;;  %s3458_s23 = scalar_lea.vmem %s2505_s10, %s1932_s5 [#allocation5]   ;;  %s1623_s17 = scalar_lea.vmem %s3388_s25, %s1932_s5  }
 0x2b7   : >> { %1574 = vst [vmem:[%s2360_s18 + $0x50] sm:$0xff] %v1573_v6  ;;  %1576 = vst [vmem:[%s2360_s18 + $0x58] sm:$0xff] %v1575_v28  ;;  %v1579_v0 = vld [vmem:[%s2364_s8 + $0x68] sm:$0xff]  ;;  %v1581_v24 = vld [vmem:[%s2364_s8 + $0x70] sm:$0xff] }
 0x2b8   : >> { %1578 = vst [vmem:[%s2360_s18 + $0x60] sm:$0xff] %v1577_v52  ;;  %1580 = vst [vmem:[%s2360_s18 + $0x68] sm:$0xff] %v1579_v0  ;;  %v1583_v30 = vld [vmem:[%s2364_s8 + $0x78] sm:$0xff]  ;;  %v1585_v19 = vld [vmem:[%s2364_s8 + $0x80] sm:$0xff] }
 0x2b9   : >> { %1582 = vst [vmem:[%s2360_s18 + $0x70] sm:$0xff] %v1581_v24  ;;  %v1587_v9 = vld [vmem:[%s2364_s8 + $0x88] sm:$0xff]  ;;  %1584 = vst [vmem:[%s2360_s18 + $0x78] sm:$0xff] %v1583_v30  ;;  %v1589_v49 = vld [vmem:[%s2364_s8 + $0x90] sm:$0xff] }
 0x2ba   : >> { %1586 = vst [vmem:[%s2360_s18 + $0x130] sm:$0xff] %v1585_v19  ;;  %1588 = vst [vmem:[%s2360_s18 + $0x138] sm:$0xff] %v1587_v9  ;;  %v1591_v40 = vld [vmem:[%s2364_s8 + $0x98] sm:$0xff]  ;;  %v1593_v60 = vld [vmem:[%s2364_s8 + $0xa0] sm:$0xff] }
 0x2bb   : >> { %1590 = vst [vmem:[%s2360_s18 + $0x140] sm:$0xff] %v1589_v49  ;;  %1592 = vst [vmem:[%s2360_s18 + $0x148] sm:$0xff] %v1591_v40  ;;  %v1595_v18 = vld [vmem:[%s2364_s8 + $0xa8] sm:$0xff]  ;;  %v1597_v15 = vld [vmem:[%s2364_s8 + $0xb0] sm:$0xff]  ;;  %1549 = sbr.rel (!%p1546_p3) target bundleno = 689 (0x2b1), region = 155 }
 0x2bc   : >> { %1594 = vst [vmem:[%s2360_s18 + $0x150] sm:$0xff] %v1593_v60  ;;  %v1599_v42 = vld [vmem:[%s2364_s8 + $0xb8] sm:$0xff]  ;;  %1596 = vst [vmem:[%s2360_s18 + $0x158] sm:$0xff] %v1595_v18  ;;  %v1601_v17 = vld [vmem:[%s2364_s8 + $0xc0] sm:$0xff] }
 0x2bd   : >> { %1598 = vst [vmem:[%s2360_s18 + $0x160] sm:$0xff] %v1597_v15  ;;  %1600 = vst [vmem:[%s2360_s18 + $0x168] sm:$0xff] %v1599_v42  ;;  %v1603_v51 = vld [vmem:[%s2364_s8 + $0xc8] sm:$0xff]  ;;  %v1605_v21 = vld [vmem:[%s2364_s8 + $0xd0] sm:$0xff] }
 0x2be   : >> { %1602 = vst [vmem:[%s2360_s18 + $0x170] sm:$0xff] %v1601_v17  ;;  %1604 = vst [vmem:[%s2360_s18 + $0x178] sm:$0xff] %v1603_v51  ;;  %v1607_v59 = vld [vmem:[%s2364_s8 + $0xd8] sm:$0xff]  ;;  %v1609_v3 = vld [vmem:[%s2364_s8 + $0xe0] sm:$0xff] }
 0x2bf   : >> { %1606 = vst [vmem:[%s2360_s18 + $0x180] sm:$0xff] %v1605_v21  ;;  %v1611_v39 = vld [vmem:[%s2364_s8 + $0xe8] sm:$0xff]  ;;  %1608 = vst [vmem:[%s2360_s18 + $0x188] sm:$0xff] %v1607_v59  ;;  %v1613_v20 = vld [vmem:[%s2364_s8 + $0xf0] sm:$0xff] }
 0x2c0   : >> { %1610 = vst [vmem:[%s2360_s18 + $0x190] sm:$0xff] %v1609_v3  ;;  %1612 = vst [vmem:[%s2360_s18 + $0x198] sm:$0xff] %v1611_v39  ;;  %v1615_v63 = vld [vmem:[%s2364_s8 + $0xf8] sm:$0xff]  ;;  %s3572_s8 = smov %s3458_s23 }
 0x2c1   : >> { %1614 = vst [vmem:[%s2360_s18 + $0x1a0] sm:$0xff] %v1613_v20  ;;  %1616 = vst [vmem:[%s2360_s18 + $0x1a8] sm:$0xff] %v1615_v63  ;;  %s3571_s18 = smov %s1623_s17 }
 0x2c2 PF: > { %s3499_s22 = sand.u32 15, %s3591_s9   ;;  %s1943_s6 = sshll.u32 %s3391_s26, 7 }
 0x2c3   : > { %s3503_s7 = scalar_lea.vmem %s2505_s10, %s1943_s6 [#allocation5]   ;;  %s1630_s11 = scalar_lea.vmem %s3388_s25, %s1943_s6  }
 0x2c4   : > { %p1937_p4 = scmp.le.s32.totalorder %s3499_s22, 0 }
 0x2c5   : > { %s2374_s12 = smov (!%p1937_p4), %s1630_s11   ;;  %s2378_s13 = smov (!%p1937_p4), %s3503_s7  }
 0x2c6   : > { %1750 = sbr.rel (%p1937_p4) target bundleno = 727 (0x2d7), region = 160  ;;  %s2382_s14 = smov (!%p1937_p4), 0  }
 0x2c7   : > { %s2386_s24 = smov (!%p1937_p4), 0  }
 0x2cd LB: >> { %v1640_v25 = vld [vmem:[%s2380_s13] sm:$0xff]  ;;  %s1644_s10 = sadd.s32 1, %s2384_s14  ;;  %s1634_s24 = sadd.s32 1, %s2388_s24   ;;  %s2388_s24 = sphi %s2386_s24, %s1634_s24   ;;  %s2384_s14 = sphi %s2382_s14, %s2383_s14   ;;  %s2380_s13 = sphi %s2378_s13, %s1649_s13   ;;  %s2376_s12 = sphi %s2374_s12, %s1650_s12  }
 0x2ce   : >> { %v1642_v11 = vld [vmem:[%s2380_s13 + $0x80] sm:$0xff]  ;;  %1641 = vst [vmem:[%s2376_s12] sm:$0xff] %v1640_v25  ;;  %p1645_p5 = scmp.ge.s32.totalorder %s1644_s10, %s3499_s22  ;;  %p1633_p6 = scmp.ge.s32.totalorder %s1634_s24, %s3499_s22 }
 0x2cf   : >> { %1643 = vst [vmem:[%s2376_s12 + $0x130] sm:$0xff] %v1642_v11 }
 0x2d0   : >> { %s3595_s10 = smov (%p1645_p5, %s1644_s10), 0  ;;  %1636 = sbr.rel (!%p1633_p6) target bundleno = 717 (0x2cd), region = 166 }
 0x2d1   : >> { %s1938_s9 = sshll.u32 %s3595_s10, 3  ;;  %s2383_s14 = smov %s3595_s10  }
 0x2d2   : >> { %s1649_s13 = scalar_lea.vmem %s3503_s7, %s1938_s9 [#allocation5]   ;;  %s1650_s12 = scalar_lea.vmem %s1630_s11, %s1938_s9  }
 0x2d7 PF: > { %s15_s21 = sadd.s32 1, %s2356_s21   ;;  %s3574_s25 = sld [smem:[#allocation6_spill]] }
 0x2d8   : > { %p12_p7 = scmp.ge.s32.totalorder %s15_s21, 8   ;;  %s3575_s26 = sld [smem:[#allocation7_spill]] }
 0x2d9   : > { %s3576_s15 = smov %s2336_s16  ;;  %s3577_s16 = smov %s2476_s30 }
 0x2da   : > { %s3578_s17 = smov %s2348_s19  ;;  %s3579_s18 = smov %s2352_s20 }
 0x2db   :  { %14 = sbr.rel (!%p12_p7) target bundleno = 4 (0x4), region = 177 }
 0x2dd   : > { %s3580_s19 = smov %s3574_s25 }
 0x2de   : > { %s3581_s20 = smov %s3575_s26 }

// kernel: language_mixer_forward.2
= control target key start
LH: loop header
LB: loop body
LE: loop exit
PB: predicated region body
PF: predicated region fallthrough
CT: control target
= control target key end

     0   :  { %s3634_s21 = smov 0   ;;  %s3636_s22 = smov 0   ;;  %s5208_s0 = inlined_call_operand.vmem [shape: f32[4,64,128], index: 0, kind: input, shape index: {}, may-alias: {0,6}]   ;;  %s5209_s1 = inlined_call_operand.vmem [shape: f32[2,8,512], index: 1, kind: input, shape index: {}]   ;;  %s5210_s2 = inlined_call_operand.vmem [shape: bf16[2,64,64], index: 2, kind: input, shape index: {}]   ;;  %s5211_s3 = inlined_call_operand.vmem [shape: bf16[2,64,64], index: 3, kind: input, shape index: {}]   ;;  %s5212_s4 = inlined_call_operand.vmem [shape: bf16[2,128,512], index: 4, kind: input, shape index: {}]   ;;  %s5213_s5 = inlined_call_operand.vmem [shape: bf16[2,512,128], index: 5, kind: input, shape index: {}]   ;;  %s5214_s6 = inlined_call_operand.vmem [shape: f32[4,64,128], index: 6, kind: output, shape index: {}, may-alias: {0,6}]  }
   0x1   :  { %5263 = sst [smem:[#allocation66_spill]] %s5208_s0  ;;  %s3638_s23 = smov 0  }
   0x2   :  { %s3640_s24 = smov 0   ;;  %s3642_s25 = smov 0  }
   0x3 LB: > { %s25_s26 = sadd.s32 1, %s3588_s23  ;;  %s28_s27 = sadd.s32 1, %s3592_s24  ;;  %s3596_s25 = sphi %s3642_s25, %s16_s25   ;;  %s3592_s24 = sphi %s3640_s24, %s5420_s24   ;;  %s3588_s23 = sphi %s3638_s23, %s5419_s23   ;;  %s3584_s22 = sphi %s3636_s22, %s5418_s22   ;;  %s3580_s21 = sphi %s3634_s21, %s5417_s21  }
   0x4   : > { %p26_p0 = scmp.ge.s32.totalorder %s25_s26, 2  ;;  %p2936_p1 = scmp.ge.s32.totalorder %s3596_s25, 1 }
   0x5   : > { %p276_p2 = scmp.lt.s32.totalorder %s3596_s25, 5 }
   0x6   : > { %s5422_s26 = smov (%p26_p0, %s25_s26), 0  ;;  %s5424_s27 = smov (!%p26_p0, %s28_s27), %s3592_s24 }
   0x7   : > { %p277_p3 = pnand %p2936_p1, %p276_p2  ;;  %p30_p4 = scmp.ge.s32.totalorder %s5424_s27, 2 }
   0x9   : > { %s5426_s27 = smov (%p30_p4, %s5424_s27), 0  ;;  %280 = sbr.rel (%p277_p3) target bundleno = 1836 (0x72c), region = 44 }
  0x10   : > { %s2937_s28 = sshll.u32 %s3584_s22, 1  ;;  %p340_p5 = scmp.lt.s32.totalorder %s3580_s21, 1 }
  0x11   : > { %p334_p6 = scmp.lt.s32.totalorder %s2937_s28, 3  ;;  %s5264_s0 = sld [smem:[#allocation66_spill]] }
  0x12   : > { %s341_s29 = scalar_select %p340_p5, %s3580_s21, 1 }
  0x13   : > { %s5428_s28 = smov (!%p334_p6, %s2937_s28), 3  ;;  %p2953_p7 = scmp.ne.s32.totalorder %s3580_s21, 0 }
  0x14   : > { %s3053_s30 = sshll.u32 %s341_s29, 5  ;;  %s3056_s7 = sshll.u32 %s341_s29, 8 }
  0x15   : > { %s3052_s8 = sshll.u32 %s5428_s28, 6  ;;  %s3671_s11 = scalar_lea.vmem %s5209_s1, %s3053_s30 }
  0x16   : > { %s3681_s17 = scalar_lea.vmem %s5210_s2, %s3053_s30  ;;  %s3686_s20 = scalar_lea.vmem %s5211_s3, %s3053_s30 }
  0x17   : > { %s3676_s14 = scalar_lea.vmem %s5264_s0, %s3052_s8  ;;  %s3691_s29 = scalar_lea.vmem %s5212_s4, %s3056_s7 }
  0x18   : > { %s3696_s12 = scalar_lea.vmem %s5213_s5, %s3056_s7  ;;  %s3701_s15 = scalar_lea.vmem %s5214_s6, %s3052_s8  ;;  %v377_v0 = vld [vmem:[%s3676_s14] sm:$0xff] (!%p2953_p7)  ;;  %v378_v2 = vld [vmem:[%s3676_s14 + $0x8] sm:$0xff] (!%p2953_p7) }
  0x19   : > { %376 = sbr.rel (%p2953_p7) target bundleno = 76 (0x4c), region = 48  ;;  %v385_v1 = vld [vmem:[%s3676_s14 + $0x40] sm:$0xff] (!%p2953_p7) }
  0x1a   : > { %393 = vst [vmem:[%s3701_s15] sm:$0xff] (!%p2953_p7), %v377_v0 }
  0x21   : > { %v386_v3 = vld [vmem:[%s3676_s14 + $0x48] sm:$0xff]  ;;  %v379_v4 = vld [vmem:[%s3676_s14 + $0x10] sm:$0xff] }
  0x22   : > { %v387_v5 = vld [vmem:[%s3676_s14 + $0x50] sm:$0xff] }
  0x23   : > { %401 = vst [vmem:[%s3701_s15 + $0x40] sm:$0xff] %v385_v1  ;;  %394 = vst [vmem:[%s3701_s15 + $0x8] sm:$0xff] %v378_v2 }
  0x24   : > { %395 = vst [vmem:[%s3701_s15 + $0x10] sm:$0xff] %v379_v4 }
  0x2b   : > { %v380_v6 = vld [vmem:[%s3676_s14 + $0x18] sm:$0xff]  ;;  %v381_v8 = vld [vmem:[%s3676_s14 + $0x20] sm:$0xff] }
  0x2c   : > { %v388_v7 = vld [vmem:[%s3676_s14 + $0x58] sm:$0xff] }
  0x2d   : > { %402 = vst [vmem:[%s3701_s15 + $0x48] sm:$0xff] %v386_v3  ;;  %403 = vst [vmem:[%s3701_s15 + $0x50] sm:$0xff] %v387_v5 }
  0x2e   : > { %396 = vst [vmem:[%s3701_s15 + $0x18] sm:$0xff] %v380_v6 }
  0x35   : > { %v389_v9 = vld [vmem:[%s3676_s14 + $0x60] sm:$0xff]  ;;  %v382_v10 = vld [vmem:[%s3676_s14 + $0x28] sm:$0xff] }
  0x36   : > { %v390_v11 = vld [vmem:[%s3676_s14 + $0x68] sm:$0xff] }
  0x37   : > { %404 = vst [vmem:[%s3701_s15 + $0x58] sm:$0xff] %v388_v7  ;;  %397 = vst [vmem:[%s3701_s15 + $0x20] sm:$0xff] %v381_v8 }
  0x38   : > { %398 = vst [vmem:[%s3701_s15 + $0x28] sm:$0xff] %v382_v10 }
  0x3f   : > { %v383_v12 = vld [vmem:[%s3676_s14 + $0x30] sm:$0xff]  ;;  %v384_v14 = vld [vmem:[%s3676_s14 + $0x38] sm:$0xff] }
  0x40   : > { %v391_v13 = vld [vmem:[%s3676_s14 + $0x70] sm:$0xff] }
  0x41   : > { %405 = vst [vmem:[%s3701_s15 + $0x60] sm:$0xff] %v389_v9  ;;  %406 = vst [vmem:[%s3701_s15 + $0x68] sm:$0xff] %v390_v11 }
  0x42   : > { %399 = vst [vmem:[%s3701_s15 + $0x30] sm:$0xff] %v383_v12 }
  0x49   : > { %v392_v15 = vld [vmem:[%s3676_s14 + $0x78] sm:$0xff] }
  0x4a   : > { %407 = vst [vmem:[%s3701_s15 + $0x70] sm:$0xff] %v391_v13  ;;  %400 = vst [vmem:[%s3701_s15 + $0x38] sm:$0xff] %v384_v14 }
  0x4b   : > { %408 = vst [vmem:[%s3701_s15 + $0x78] sm:$0xff] %v392_v15 }
  0x4c PF: > { %v2954_v16 = vld [vmem:[%s3701_s15 + $0x40] sm:$0xff]  ;;  %v2955_v18 = vld [vmem:[%s3701_s15 + $0x48] sm:$0xff]  ;;  %v2956_v20 = vld [vmem:[%s3701_s15 + $0x50] sm:$0xff]  ;;  %vm683_vm0 = vcmask 523264  }
  0x4d   : > { %v413_v17 = vld [vmem:[%s3701_s15] sm:$0xff]  ;;  %446 = vadd.xlane.f32.xlu0 %v2954_v16  ;;  %v414_v19 = vld [vmem:[%s3701_s15 + $0x8] sm:$0xff]  ;;  %v2957_v21 = vld [vmem:[%s3701_s15 + $0x58] sm:$0xff] }
  0x4e   : > { %430 = vadd.xlane.f32.xlu1 %v413_v17  ;;  %v415_v22 = vld [vmem:[%s3701_s15 + $0x10] sm:$0xff]  ;;  %v416_v23 = vld [vmem:[%s3701_s15 + $0x18] sm:$0xff]  ;;  %v2958_v24 = vld [vmem:[%s3701_s15 + $0x60] sm:$0xff] }
  0x4f   : > { %v2959_v25 = vld [vmem:[%s3701_s15 + $0x68] sm:$0xff]  ;;  %v3747_v26 = vld [vmem:[%s3701_s15 + $0x20] sm:$0xff]  ;;  %v3761_v30 = vld [vmem:[%s3701_s15 + $0x30] sm:$0xff] }
  0x50   : > { %v3750_v27 = vld [vmem:[%s3701_s15 + $0x28] sm:$0xff] }
  0x51   : > { %448 = vadd.xlane.f32.xlu0 %v2955_v18  ;;  %v3753_v28 = vld [vmem:[%s3701_s15 + $0x70] sm:$0xff]  ;;  %v3764_v31 = vld [vmem:[%s3701_s15 + $0x38] sm:$0xff] }
  0x52   : > { %432 = vadd.xlane.f32.xlu1 %v414_v19  ;;  %v3756_v29 = vld [vmem:[%s3701_s15 + $0x78] sm:$0xff] }
  0x55   : > { %450 = vadd.xlane.f32.xlu0 %v2956_v20 }
  0x56   : > { %452 = vadd.xlane.f32.xlu1 %v2957_v21 }
  0x59   : > { %434 = vadd.xlane.f32.xlu0 %v415_v22 }
  0x5a   : > { %436 = vadd.xlane.f32.xlu1 %v416_v23 }
  0x5d   : > { %454 = vadd.xlane.f32.xlu0 %v2958_v24 }
  0x5e   : > { %456 = vadd.xlane.f32.xlu1 %v2959_v25 }
  0x61   : > { %438 = vadd.xlane.f32.xlu0 %v3747_v26 }
  0x62   : > { %440 = vadd.xlane.f32.xlu1 %v3750_v27 }
  0x65   : > { %458 = vadd.xlane.f32.xlu0 %v3753_v28 }
  0x66   : > { %460 = vadd.xlane.f32.xlu1 %v3756_v29 }
  0x69   : > { %442 = vadd.xlane.f32.xlu0 %v3761_v30 }
  0x6a   : > { %444 = vadd.xlane.f32.xlu1 %v3764_v31 }
  0xda   : > { %v447_v32 = vpop.xlane.xlu0 %446 }
  0xdb   : > { %v431_v33 = vpop.xlane.xlu1 %430  ;;  %v471_v34 = vmul.f32 0.0078125, %v447_v32 }
  0xdc   : > { %v463_v35 = vmul.f32 0.0078125, %v431_v33 }
  0xdd   : > { %v3770_v36 = vsub.f32 %v2954_v16, %v471_v34  ;;  %v3598_v34 = vmov 0  }
  0xde   : > { %v3772_v37 = vsub.f32 %v413_v17, %v463_v35  ;;  %v449_v38 = vpop.xlane.xlu0 %448  ;;  %728 = vmatprep.mubr.bf16.mxu0 %v3598_v34  ;;  %993 = vmatprep.mubr.bf16.mxu1 %v3598_v34 }
  0xdf   : > { %v433_v39 = vpop.xlane.xlu1 %432  ;;  %v472_v40 = vmul.f32 0.0078125, %v449_v38  ;;  %v503_v41 = vmul.f32 %v3770_v36, %v3770_v36 }
  0xe0   : > { %v464_v42 = vmul.f32 0.0078125, %v433_v39  ;;  %v495_v45 = vmul.f32 %v3772_v37, %v3772_v37 }
  0xe1   : > { %v3776_v43 = vsub.f32 %v2955_v18, %v472_v40  ;;  %527 = vadd.xlane.f32.xlu0 %v503_v41  ;;  %v607_v40 = vlaneseq }
  0xe2   : > { %v3778_v44 = vsub.f32 %v414_v19, %v464_v42  ;;  %v451_v46 = vpop.xlane.xlu0 %450 }
  0xe3   : > { %v453_v47 = vpop.xlane.xlu1 %452  ;;  %v473_v48 = vmul.f32 0.0078125, %v451_v46  ;;  %v504_v49 = vmul.f32 %v3776_v43, %v3776_v43 }
  0xe4   : > { %v474_v50 = vmul.f32 0.0078125, %v453_v47  ;;  %v496_v53 = vmul.f32 %v3778_v44, %v3778_v44 }
  0xe5   : > { %v3784_v51 = vsub.f32 %v2956_v20, %v473_v48  ;;  %529 = vadd.xlane.f32.xlu1 %v504_v49  ;;  %511 = vadd.xlane.f32.xlu0 %v495_v45  ;;  %v3842_v49 = vshrl.u32 %v607_v40, 7 }
  0xe6   : > { %v3786_v52 = vsub.f32 %v2957_v21, %v474_v50  ;;  %v435_v54 = vpop.xlane.xlu0 %434 }
  0xe7   : > { %v437_v55 = vpop.xlane.xlu1 %436  ;;  %v465_v56 = vmul.f32 0.0078125, %v435_v54  ;;  %v505_v57 = vmul.f32 %v3784_v51, %v3784_v51  ;;  %5265 = vst [vmem:[#allocation2_spill] sm:$0xff] %v3842_v49 }
  0xe8   : > { %v466_v58 = vmul.f32 0.0078125, %v437_v55  ;;  %v506_v61 = vmul.f32 %v3786_v52, %v3786_v52 }
  0xe9   : > { %v3792_v59 = vsub.f32 %v415_v22, %v465_v56  ;;  %531 = vadd.xlane.f32.xlu0 %v505_v57  ;;  %513 = vadd.xlane.f32.xlu1 %v496_v53 }
  0xea   : > { %v3794_v60 = vsub.f32 %v416_v23, %v466_v58  ;;  %v455_v62 = vpop.xlane.xlu0 %454  ;;  %v609_v58 = vsub.s32 0, %v3842_v49 }
  0xeb   : > { %v457_v63 = vpop.xlane.xlu1 %456  ;;  %v475_v0 = vmul.f32 0.0078125, %v455_v62  ;;  %v497_v1 = vmul.f32 %v3792_v59, %v3792_v59 }
  0xec   : > { %v476_v2 = vmul.f32 0.0078125, %v457_v63  ;;  %v498_v5 = vmul.f32 %v3794_v60, %v3794_v60  ;;  %v409_v63 = vld [vmem:[%s3671_s11] sm:$0xff] }
  0xed   : > { %v3800_v3 = vsub.f32 %v2958_v24, %v475_v0  ;;  %515 = vadd.xlane.f32.xlu0 %v497_v1  ;;  %533 = vadd.xlane.f32.xlu1 %v506_v61 }
  0xee   : > { %v3802_v4 = vsub.f32 %v2959_v25, %v476_v2  ;;  %v439_v6 = vpop.xlane.xlu0 %438 }
  0xef   : > { %v441_v7 = vpop.xlane.xlu1 %440  ;;  %v467_v8 = vmul.f32 0.0078125, %v439_v6  ;;  %v507_v9 = vmul.f32 %v3800_v3, %v3800_v3 }
  0xf0   : > { %v468_v10 = vmul.f32 0.0078125, %v441_v7  ;;  %v508_v13 = vmul.f32 %v3802_v4, %v3802_v4 }
  0xf1   : > { %v3809_v11 = vsub.f32 %v3747_v26, %v467_v8  ;;  %535 = vadd.xlane.f32.xlu0 %v507_v9  ;;  %517 = vadd.xlane.f32.xlu1 %v498_v5  ;;  %v3847_v8 = vrot.slane %v409_v63, %v609_v58  ;;  %v629_v9 = vsub.s32 1, %v3842_v49 }
  0xf2   : > { %v3812_v12 = vsub.f32 %v3750_v27, %v468_v10  ;;  %v459_v14 = vpop.xlane.xlu0 %458 }
  0xf3   : > { %v461_v15 = vpop.xlane.xlu1 %460  ;;  %v477_v16 = vmul.f32 0.0078125, %v459_v14  ;;  %v499_v17 = vmul.f32 %v3809_v11, %v3809_v11 }
  0xf4   : > { %v478_v18 = vmul.f32 0.0078125, %v461_v15  ;;  %v500_v21 = vmul.f32 %v3812_v12, %v3812_v12 }
  0xf5   : > { %v3819_v19 = vsub.f32 %v3753_v28, %v477_v16  ;;  %519 = vadd.xlane.f32.xlu0 %v499_v17  ;;  %537 = vadd.xlane.f32.xlu1 %v508_v13 }
  0xf6   : > { %v3822_v20 = vsub.f32 %v3756_v29, %v478_v18  ;;  %v443_v22 = vpop.xlane.xlu0 %442 }
  0xf7   : > { %v445_v23 = vpop.xlane.xlu1 %444  ;;  %v469_v24 = vmul.f32 0.0078125, %v443_v22  ;;  %v509_v25 = vmul.f32 %v3819_v19, %v3819_v19 }
  0xf8   : > { %v470_v26 = vmul.f32 0.0078125, %v445_v23  ;;  %v510_v29 = vmul.f32 %v3822_v20, %v3822_v20  ;;  %v3851_v23 = vrot.slane %v409_v63, %v629_v9 }
  0xf9   : > { %v3829_v27 = vsub.f32 %v3761_v30, %v469_v24  ;;  %539 = vadd.xlane.f32.xlu0 %v509_v25  ;;  %521 = vadd.xlane.f32.xlu1 %v500_v21 }
  0xfa   : > { %v3832_v28 = vsub.f32 %v3764_v31, %v470_v26 }
  0xfb   : > { %v501_v32 = vmul.f32 %v3829_v27, %v3829_v27 }
  0xfc   : > { %v502_v33 = vmul.f32 %v3832_v28, %v3832_v28 }
  0xfd   : > { %523 = vadd.xlane.f32.xlu0 %v501_v32  ;;  %541 = vadd.xlane.f32.xlu1 %v510_v29 }
 0x101   : > { %525 = vadd.xlane.f32.xlu1 %v502_v33 }
 0x16e   : > { %v528_v30 = vpop.xlane.xlu0 %527 }
 0x16f   : > { %v551_v31 = vmul.f32 0.0078125, %v528_v30 }
 0x171   : > { %v567_v35 = vadd.f32 1e-05, %v551_v31 }
 0x172   : > { %v512_v38 = vpop.xlane.xlu0 %511  ;;  %v530_v39 = vpop.xlane.xlu1 %529 }
 0x173   : > { %3316 = vrsqrt.f32 %v567_v35  ;;  %v543_v41 = vmul.f32 0.0078125, %v512_v38  ;;  %v552_v42 = vmul.f32 0.0078125, %v530_v39 }
 0x175   : > { %v559_v45 = vadd.f32 1e-05, %v543_v41  ;;  %v568_v46 = vadd.f32 1e-05, %v552_v42 }
 0x176   : > { %v532_v47 = vpop.xlane.xlu0 %531  ;;  %v514_v48 = vpop.xlane.xlu1 %513 }
 0x177   : > { %3318 = vrsqrt.f32 %v559_v45  ;;  %v553_v50 = vmul.f32 0.0078125, %v532_v47  ;;  %v544_v53 = vmul.f32 0.0078125, %v514_v48 }
 0x178   : > { %3320 = vrsqrt.f32 %v568_v46 }
 0x179   : > { %v569_v54 = vadd.f32 1e-05, %v553_v50  ;;  %v560_v55 = vadd.f32 1e-05, %v544_v53 }
 0x17a   : > { %v516_v56 = vpop.xlane.xlu0 %515  ;;  %v534_v57 = vpop.xlane.xlu1 %533 }
 0x17b   : > { %3322 = vrsqrt.f32 %v569_v54  ;;  %v545_v61 = vmul.f32 0.0078125, %v516_v56  ;;  %v554_v62 = vmul.f32 0.0078125, %v534_v57 }
 0x17c   : > { %3324 = vrsqrt.f32 %v560_v55 }
 0x17d   : > { %v3317_v0 = vpop.eup %3316  ;;  %v561_v1 = vadd.f32 1e-05, %v545_v61  ;;  %v570_v2 = vadd.f32 1e-05, %v554_v62 }
 0x17e   : > { %v536_v5 = vpop.xlane.xlu0 %535  ;;  %v518_v6 = vpop.xlane.xlu1 %517  ;;  %v599_v7 = vmul.f32 %v3317_v0, %v3770_v36 }
 0x17f   : > { %3326 = vrsqrt.f32 %v561_v1  ;;  %v555_v10 = vmul.f32 0.0078125, %v536_v5  ;;  %v546_v13 = vmul.f32 0.0078125, %v518_v6 }
 0x180   : > { %3328 = vrsqrt.f32 %v570_v2  ;;  %v619_v22 = vmul.f32 %v3847_v8, %v599_v7 }
 0x181   : > { %v3319_v14 = vpop.eup %3318  ;;  %v571_v15 = vadd.f32 1e-05, %v555_v10  ;;  %v562_v16 = vadd.f32 1e-05, %v546_v13 }
 0x182   : > { %v3321_v17 = vpop.eup %3320  ;;  %v520_v18 = vpop.xlane.xlu0 %519  ;;  %v591_v26 = vmul.f32 %v3319_v14, %v3772_v37  ;;  %v639_v39 = vadd.f32 %v3851_v23, %v619_v22 }
 0x183   : > { %v538_v21 = vpop.xlane.xlu1 %537  ;;  %3330 = vrsqrt.f32 %v571_v15  ;;  %v547_v36 = vmul.f32 0.0078125, %v520_v18  ;;  %v600_v25 = vmul.f32 %v3321_v17, %v3776_v43 }
 0x184   : > { %v556_v24 = vmul.f32 0.0078125, %v538_v21  ;;  %3332 = vrsqrt.f32 %v562_v16  ;;  %v611_v45 = vmul.f32 %v3847_v8, %v591_v26 }
 0x185   : > { %v3323_v29 = vpop.eup %3322  ;;  %v563_v32 = vadd.f32 1e-05, %v547_v36  ;;  %v620_v30 = vmul.f32 %v3847_v8, %v600_v25 }
 0x186   : > { %v572_v33 = vadd.f32 1e-05, %v556_v24  ;;  %v3325_v31 = vpop.eup %3324  ;;  %v540_v35 = vpop.xlane.xlu0 %539  ;;  %v601_v40 = vmul.f32 %v3323_v29, %v3784_v51  ;;  %v631_v62 = vadd.f32 %v3851_v23, %v611_v45 }
 0x187   : > { %v522_v38 = vpop.xlane.xlu1 %521  ;;  %3334 = vrsqrt.f32 %v563_v32  ;;  %v557_v41 = vmul.f32 0.0078125, %v540_v35  ;;  %v640_v43 = vadd.f32 %v3851_v23, %v620_v30  ;;  %v592_v37 = vmul.f32 %v3325_v31, %v3778_v44 }
 0x188   : > { %v548_v42 = vmul.f32 0.0078125, %v522_v38  ;;  %3336 = vrsqrt.f32 %v572_v33  ;;  %v621_v51 = vmul.f32 %v3847_v8, %v601_v40 }
 0x189   : > { %v3327_v46 = vpop.eup %3326  ;;  %v573_v47 = vadd.f32 1e-05, %v557_v41  ;;  %v648_v50 = vpack.c.bf16 %v640_v43, %v639_v39  ;;  %v612_v56 = vmul.f32 %v3847_v8, %v592_v37 }
 0x18a   : > { %v564_v48 = vadd.f32 1e-05, %v548_v42  ;;  %v3329_v53 = vpop.eup %3328  ;;  %v524_v54 = vpop.xlane.xlu0 %523  ;;  %v593_v57 = vmul.f32 %v3327_v46, %v3792_v59  ;;  %v641_v59 = vadd.f32 %v3851_v23, %v621_v51 }
 0x18b   : > { %v542_v55 = vpop.xlane.xlu1 %541  ;;  %3338 = vrsqrt.f32 %v573_v47  ;;  %v549_v58 = vmul.f32 0.0078125, %v524_v54  ;;  %696 = vmatprep.subr.bf16.mxu0 %v648_v50  ;;  %v602_v44 = vmul.f32 %v3329_v53, %v3786_v52  ;;  %v632_v63 = vadd.f32 %v3851_v23, %v612_v56 }
 0x18c   : > { %v558_v61 = vmul.f32 0.0078125, %v542_v55  ;;  %3340 = vrsqrt.f32 %v564_v48  ;;  %v613_v10 = vmul.f32 %v3847_v8, %v593_v57  ;;  %v3229_v57 = vld [vmem:[%s3681_s17 + $0x8] sm:$0xff]  }
 0x18d   : > { %v3331_v0 = vpop.eup %3330  ;;  %v565_v1 = vadd.f32 1e-05, %v549_v58  ;;  %v622_v5 = vmul.f32 %v3847_v8, %v602_v44  ;;  %v647_v9 = vpack.c.bf16 %v632_v63, %v631_v62 }
 0x18e   : > { %v574_v2 = vadd.f32 1e-05, %v558_v61  ;;  %v3333_v6 = vpop.eup %3332  ;;  %v603_v13 = vmul.f32 %v3331_v0, %v3800_v3  ;;  %v633_v36 = vadd.f32 %v3851_v23, %v613_v10 }
 0x18f   : > { %v526_v7 = vpop.xlane.xlu1 %525  ;;  %3342 = vrsqrt.f32 %v565_v1  ;;  %v642_v14 = vadd.f32 %v3851_v23, %v622_v5  ;;  %v594_v15 = vmul.f32 %v3333_v6, %v3794_v60  ;;  %697 = vmatpush1.bf16.msra.mxu0 %v647_v9 }
 0x190   : > { %v550_v52 = vmul.f32 0.0078125, %v526_v7  ;;  %3344 = vrsqrt.f32 %v574_v2  ;;  %v623_v24 = vmul.f32 %v3847_v8, %v603_v13 }
 0x191   : > { %v3335_v16 = vpop.eup %3334  ;;  %v650_v18 = vpack.c.bf16 %v642_v14, %v641_v59  ;;  %v614_v21 = vmul.f32 %v3847_v8, %v594_v15 }
 0x192   : > { %v566_v17 = vadd.f32 1e-05, %v550_v52  ;;  %v3337_v22 = vpop.eup %3336  ;;  %v595_v60 = vmul.f32 %v3335_v16, %v3809_v11  ;;  %v643_v30 = vadd.f32 %v3851_v23, %v623_v24 }
 0x193   : > { %698 = vmatprep.subr.bf16.mxu0 %v650_v18  ;;  %v634_v3 = vadd.f32 %v3851_v23, %v614_v21  ;;  %v604_v25 = vmul.f32 %v3337_v22, %v3802_v4 }
 0x194   : > { %3346 = vrsqrt.f32 %v566_v17  ;;  %v615_v38 = vmul.f32 %v3847_v8, %v595_v60 }
 0x195   : > { %v3339_v26 = vpop.eup %3338  ;;  %v649_v29 = vpack.c.bf16 %v634_v3, %v633_v36  ;;  %v624_v32 = vmul.f32 %v3847_v8, %v604_v25 }
 0x196   : > { %v3341_v33 = vpop.eup %3340  ;;  %v605_v39 = vmul.f32 %v3339_v26, %v3819_v19  ;;  %v635_v43 = vadd.f32 %v3851_v23, %v615_v38 }
 0x197   : > { %699 = vmatpush1.bf16.msra.mxu0 %v649_v29  ;;  %v644_v31 = vadd.f32 %v3851_v23, %v624_v32  ;;  %v596_v35 = vmul.f32 %v3341_v33, %v3812_v12 }
 0x198   : > { %v625_v12 = vmul.f32 %v3847_v8, %v605_v39 }
 0x199   : > { %v3343_v40 = vpop.eup %3342  ;;  %v652_v4 = vpack.c.bf16 %v644_v31, %v643_v30  ;;  %v616_v11 = vmul.f32 %v3847_v8, %v596_v35 }
 0x19a   : > { %v3345_v41 = vpop.eup %3344  ;;  %v597_v42 = vmul.f32 %v3343_v40, %v3829_v27  ;;  %v645_v27 = vadd.f32 %v3851_v23, %v625_v12 }
 0x19b   : > { %700 = vmatprep.subr.bf16.mxu0 %v652_v4  ;;  %v636_v37 = vadd.f32 %v3851_v23, %v616_v11  ;;  %v606_v45 = vmul.f32 %v3345_v41, %v3822_v20 }
 0x19c   : > { %v617_v50 = vmul.f32 %v3847_v8, %v597_v42 }
 0x19d   : > { %v651_v47 = vpack.c.bf16 %v636_v37, %v635_v43  ;;  %v626_v19 = vmul.f32 %v3847_v8, %v606_v45 }
 0x19e   : > { %v3347_v46 = vpop.eup %3346  ;;  %v637_v55 = vadd.f32 %v3851_v23, %v617_v50 }
 0x19f   : > { %v598_v48 = vmul.f32 %v3347_v46, %v3832_v28  ;;  %701 = vmatpush1.bf16.msra.mxu0 %v651_v47  ;;  %v646_v53 = vadd.f32 %v3851_v23, %v626_v19  ;;  %v3228_v28 = vld [vmem:[%s3681_s17] sm:$0xff]  }
 0x1a1   : > { %v618_v20 = vmul.f32 %v3847_v8, %v598_v48  ;;  %v654_v54 = vpack.c.bf16 %v646_v53, %v645_v27  ;;  %v3230_v8 = vld [vmem:[%s3681_s17 + $0x10] sm:$0xff]  }
 0x1a3   : > { %v638_v56 = vadd.f32 %v3851_v23, %v618_v20  ;;  %702 = vmatprep.subr.bf16.mxu0 %v654_v54  ;;  %v3231_v23 = vld [vmem:[%s3681_s17 + $0x18] sm:$0xff]  }
 0x1a5   : > { %v653_v51 = vpack.c.bf16 %v638_v56, %v637_v55 }
 0x1a7   : > { %703 = vmatpush1.bf16.msra.mxu0 %v653_v51 }
 0x1aa   : > { %2966 = vmatmul.mubr.msk.bf16.vlgmr.msra.gmra.mrb[0].mxu0 %vm683_vm0, %v3228_v28 }
 0x1ab   : > { %738 = vmatprep.mubr.bf16.mxu0 %v3598_v34 }
 0x1b2   : > { %2967 = vmatmul.mubr.msk.bf16.gmra.mrb[4].mxu0 %vm683_vm0, %v3229_v57 }
 0x1b3   : > { %748 = vmatprep.mubr.bf16.mxu0 %v3598_v34 }
 0x1ba   : > { %2968 = vmatmul.mubr.msk.bf16.gmra.mrb[8].mxu0 %vm683_vm0, %v3230_v8 }
 0x1bb   : > { %758 = vmatprep.mubr.bf16.mxu0 %v3598_v34 }
 0x1c2   : > { %2969 = vmatmul.mubr.msk.bf16.gmra.mrb[12].mxu0 %vm683_vm0, %v3231_v23 }
 0x1c3   : > { %1514 = vmatprep.mubr.bf16.mxu0 %v3598_v34 }
 0x27d   : > { %v3911_v58 = vpop.f32.mrb[0].mxu0 }
 0x27e   : > { %v769_v61 = vmul.f32 %v3911_v58, %v3911_v58  ;;  %v3915_v44 = vpop.f32.mrb[1].mxu0  ;;  %v801_v8 = vmul.f32 0.5, %v3911_v58 }
 0x27f   : > { %v770_v62 = vmul.f32 %v3915_v44, %v3915_v44  ;;  %v3919_v63 = vpop.f32.mrb[2].mxu0 }
 0x280   : > { %v785_v0 = vmul.f32 %v769_v61, %v3911_v58  ;;  %v771_v1 = vmul.f32 %v3919_v63, %v3919_v63  ;;  %v3924_v2 = vpop.f32.mrb[3].mxu0  ;;  %v802_v61 = vmul.f32 0.5, %v3915_v44 }
 0x281   : > { %v786_v5 = vmul.f32 %v770_v62, %v3915_v44  ;;  %v772_v6 = vmul.f32 %v3924_v2, %v3924_v2  ;;  %v803_v62 = vmul.f32 0.5, %v3919_v63 }
 0x282   : > { %v817_v7 = vmul.f32 0.044715, %v785_v0  ;;  %v787_v9 = vmul.f32 %v771_v1, %v3919_v63 }
 0x283   : > { %v818_v59 = vmul.f32 0.044715, %v786_v5  ;;  %v788_v10 = vmul.f32 %v772_v6, %v3924_v2 }
 0x284   : > { %v833_v13 = vadd.f32 %v817_v7, %v3911_v58  ;;  %v819_v52 = vmul.f32 0.044715, %v787_v9  ;;  %v804_v58 = vmul.f32 0.5, %v3924_v2 }
 0x285   : > { %v820_v14 = vmul.f32 0.044715, %v788_v10  ;;  %v3932_v15 = vpop.f32.mrb[4].mxu0  ;;  %v834_v17 = vadd.f32 %v818_v59, %v3915_v44 }
 0x286   : > { %v849_v16 = vmul.f32 0.7978846, %v833_v13  ;;  %v835_v18 = vadd.f32 %v819_v52, %v3919_v63  ;;  %v773_v21 = vmul.f32 %v3932_v15, %v3932_v15  ;;  %v742_v22 = vpop.f32.mrb[5].mxu0 }
 0x287   : > { %v836_v36 = vadd.f32 %v820_v14, %v3924_v2  ;;  %v774_v24 = vmul.f32 %v742_v22, %v742_v22  ;;  %v3939_v3 = vpop.f32.mrb[6].mxu0  ;;  %v850_v30 = vmul.f32 0.7978846, %v834_v17  ;;  %v806_v7 = vmul.f32 0.5, %v742_v22 }
 0x288   : > { %v851_v25 = vmul.f32 0.7978846, %v835_v18  ;;  %v789_v60 = vmul.f32 %v773_v21, %v3932_v15  ;;  %v775_v26 = vmul.f32 %v3939_v3, %v3939_v3  ;;  %v746_v29 = vpop.f32.mrb[7].mxu0  ;;  %3348 = vtanh.f32 %v849_v16 }
 0x289   : > { %v790_v32 = vmul.f32 %v774_v24, %v742_v22  ;;  %v776_v33 = vmul.f32 %v746_v29, %v746_v29  ;;  %v852_v38 = vmul.f32 0.7978846, %v836_v36  ;;  %v808_v16 = vmul.f32 0.5, %v746_v29 }
 0x28a   : > { %v821_v31 = vmul.f32 0.044715, %v789_v60  ;;  %v791_v35 = vmul.f32 %v775_v26, %v3939_v3  ;;  %3350 = vtanh.f32 %v851_v25 }
 0x28b   : > { %v822_v39 = vmul.f32 0.044715, %v790_v32  ;;  %v792_v40 = vmul.f32 %v776_v33, %v746_v29  ;;  %3352 = vtanh.f32 %v850_v30 }
 0x28c   : > { %v837_v4 = vadd.f32 %v821_v31, %v3932_v15  ;;  %v823_v11 = vmul.f32 0.044715, %v791_v35  ;;  %3354 = vtanh.f32 %v852_v38 }
 0x28d   : > { %v838_v41 = vadd.f32 %v822_v39, %v742_v22  ;;  %v824_v42 = vmul.f32 0.044715, %v792_v40  ;;  %v3946_v43 = vpop.f32.mrb[8].mxu0 }
 0x28e   : > { %v839_v37 = vadd.f32 %v823_v11, %v3939_v3  ;;  %v777_v45 = vmul.f32 %v3946_v43, %v3946_v43  ;;  %v3951_v12 = vpop.f32.mrb[9].mxu0  ;;  %v853_v50 = vmul.f32 0.7978846, %v837_v4 }
 0x28f   : > { %v854_v46 = vmul.f32 0.7978846, %v838_v41  ;;  %v840_v47 = vadd.f32 %v824_v42, %v746_v29  ;;  %v778_v19 = vmul.f32 %v3951_v12, %v3951_v12  ;;  %v3955_v48 = vpop.f32.mrb[10].mxu0 }
 0x290   : > { %v793_v27 = vmul.f32 %v777_v45, %v3946_v43  ;;  %v779_v53 = vmul.f32 %v3955_v48, %v3955_v48  ;;  %v3960_v20 = vpop.f32.mrb[11].mxu0  ;;  %v855_v54 = vmul.f32 0.7978846, %v839_v37 }
 0x291   : > { %3356 = vtanh.f32 %v854_v46  ;;  %v856_v55 = vmul.f32 0.7978846, %v840_v47  ;;  %v794_v56 = vmul.f32 %v778_v19, %v3951_v12  ;;  %v780_v57 = vmul.f32 %v3960_v20, %v3960_v20 }
 0x292   : > { %v825_v51 = vmul.f32 0.044715, %v793_v27  ;;  %v795_v28 = vmul.f32 %v779_v53, %v3955_v48  ;;  %v3349_v0 = vpop.eup %3348 }
 0x293   : > { %3358 = vtanh.f32 %v856_v55  ;;  %v826_v23 = vmul.f32 0.044715, %v794_v56  ;;  %v796_v6 = vmul.f32 %v780_v57, %v3960_v20  ;;  %v881_v22 = vadd.f32 1.0, %v3349_v0 }
 0x294   : > { %3360 = vtanh.f32 %v853_v50  ;;  %v841_v1 = vadd.f32 %v825_v51, %v3946_v43  ;;  %v827_v5 = vmul.f32 0.044715, %v795_v28  ;;  %v3351_v10 = vpop.eup %3350 }
 0x295   : > { %3362 = vtanh.f32 %v855_v54  ;;  %v842_v9 = vadd.f32 %v826_v23, %v3951_v12  ;;  %v3972_v59 = vpop.f32.mrb[12].mxu0  ;;  %v828_v63 = vmul.f32 0.044715, %v796_v6  ;;  %v3353_v36 = vpop.eup %3352  ;;  %v883_v33 = vadd.f32 1.0, %v3351_v10 }
 0x296   : > { %v857_v13 = vmul.f32 0.7978846, %v841_v1  ;;  %v843_v44 = vadd.f32 %v827_v5, %v3955_v48  ;;  %v781_v52 = vmul.f32 %v3972_v59, %v3972_v59  ;;  %v3978_v14 = vpop.f32.mrb[13].mxu0  ;;  %v3355_v26 = vpop.eup %3354  ;;  %v882_v4 = vadd.f32 1.0, %v3353_v36 }
 0x297   : > { %v858_v17 = vmul.f32 0.7978846, %v842_v9  ;;  %v782_v18 = vmul.f32 %v3978_v14, %v3978_v14  ;;  %v3982_v21 = vpop.f32.mrb[14].mxu0  ;;  %v844_v24 = vadd.f32 %v828_v63, %v3960_v20  ;;  %v897_v11 = vmul.f32 %v881_v22, %v801_v8 }
 0x298   : > { %3364 = vtanh.f32 %v857_v13  ;;  %v859_v2 = vmul.f32 0.7978846, %v843_v44  ;;  %v797_v25 = vmul.f32 %v781_v52, %v3972_v59  ;;  %v3986_v60 = vpop.f32.mrb[15].mxu0  ;;  %v783_v32 = vmul.f32 %v3982_v21, %v3982_v21 }
 0x299   : > { %3366 = vtanh.f32 %v858_v17  ;;  %v798_v29 = vmul.f32 %v782_v18, %v3978_v14  ;;  %v860_v30 = vmul.f32 0.7978846, %v844_v24  ;;  %v784_v35 = vmul.f32 %v3986_v60, %v3986_v60 }
 0x29a   : > { %3368 = vtanh.f32 %v859_v2  ;;  %v829_v31 = vmul.f32 0.044715, %v797_v25  ;;  %v799_v40 = vmul.f32 %v783_v32, %v3982_v21  ;;  %v884_v37 = vadd.f32 1.0, %v3355_v26 }
 0x29b   : > { %v3357_v38 = vpop.eup %3356  ;;  %v830_v39 = vmul.f32 0.044715, %v798_v29  ;;  %3370 = vtanh.f32 %v860_v30  ;;  %v800_v42 = vmul.f32 %v784_v35, %v3986_v60  ;;  %v898_v19 = vmul.f32 %v882_v4, %v802_v61 }
 0x29c   : > { %v845_v41 = vadd.f32 %v829_v31, %v3972_v59  ;;  %v831_v47 = vmul.f32 0.044715, %v799_v40  ;;  %v899_v50 = vmul.f32 %v883_v33, %v803_v62  ;;  %v900_v55 = vmul.f32 %v884_v37, %v804_v58 }
 0x29d   : > { %v3359_v45 = vpop.eup %3358  ;;  %v846_v46 = vadd.f32 %v830_v39, %v3978_v14  ;;  %v832_v54 = vmul.f32 0.044715, %v800_v42  ;;  %v886_v56 = vadd.f32 1.0, %v3357_v38  ;;  %v805_v10 = vmul.f32 0.5, %v3932_v15 }
 0x29e   : > { %v3361_v27 = vpop.eup %3360  ;;  %v861_v53 = vmul.f32 0.7978846, %v845_v41  ;;  %v847_v57 = vadd.f32 %v831_v47, %v3982_v21  ;;  %v921_v8 = vpack.c.bf16 %v899_v50, %v897_v11  ;;  %v888_v23 = vadd.f32 1.0, %v3359_v45 }
 0x29f   : > { %v3363_v51 = vpop.eup %3362  ;;  %v862_v28 = vmul.f32 0.7978846, %v846_v46  ;;  %v848_v0 = vadd.f32 %v832_v54, %v3986_v60  ;;  %v922_v1 = vpack.c.bf16 %v900_v55, %v898_v19  ;;  %v902_v5 = vmul.f32 %v886_v56, %v806_v7  ;;  %v3540_v55 = vld [vmem:[%s3701_s15] sm:$0xff] }
 0x2a0   : > { %3372 = vtanh.f32 %v861_v53  ;;  %v863_v6 = vmul.f32 0.7978846, %v847_v57  ;;  %v904_v61 = vmul.f32 %v888_v23, %v808_v16  ;;  %v885_v62 = vadd.f32 1.0, %v3361_v27  ;;  %v3541_v57 = vld [vmem:[%s3701_s15 + $0x8] sm:$0xff] }
 0x2a1   : > { %3374 = vtanh.f32 %v862_v28  ;;  %v807_v58 = vmul.f32 0.5, %v3939_v3  ;;  %v864_v13 = vmul.f32 0.7978846, %v848_v0  ;;  %961 = vmatprep.subr.bf16.mxu1 %v922_v1  ;;  %v887_v44 = vadd.f32 1.0, %v3363_v51  ;;  %v3542_v1 = vld [vmem:[%s3701_s15 + $0x10] sm:$0xff] }
 0x2a2   : > { %v3365_v9 = vpop.eup %3364  ;;  %3376 = vtanh.f32 %v863_v6  ;;  %962 = vmatpush1.bf16.msra.mxu1 %v921_v8  ;;  %v924_v52 = vpack.c.bf16 %v904_v61, %v902_v5  ;;  %v901_v7 = vmul.f32 %v885_v62, %v805_v10  ;;  %v809_v16 = vmul.f32 0.5, %v3946_v43  ;;  %v3543_v62 = vld [vmem:[%s3701_s15 + $0x18] sm:$0xff] }
 0x2a3   : > { %v3367_v63 = vpop.eup %3366  ;;  %v889_v17 = vadd.f32 1.0, %v3365_v9  ;;  %3378 = vtanh.f32 %v864_v13  ;;  %v903_v22 = vmul.f32 %v887_v44, %v807_v58  ;;  %v811_v36 = vmul.f32 0.5, %v3955_v48  ;;  %v3544_v13 = vld [vmem:[%s3701_s15 + $0x20] sm:$0xff] }
 0x2a4   : > { %v3369_v18 = vpop.eup %3368  ;;  %963 = vmatprep.subr.bf16.mxu1 %v924_v52  ;;  %v890_v15 = vadd.f32 1.0, %v3367_v63  ;;  %v810_v24 = vmul.f32 0.5, %v3951_v12  ;;  %v812_v26 = vmul.f32 0.5, %v3960_v20  ;;  %v813_v12 = vmul.f32 0.5, %v3972_v59  ;;  %v3232_v59 = vld [vmem:[%s3686_s20] sm:$0xff]  }
 0x2a5   : > { %v891_v2 = vadd.f32 1.0, %v3369_v18  ;;  %v3371_v3 = vpop.eup %3370  ;;  %v923_v25 = vpack.c.bf16 %v903_v22, %v901_v7  ;;  %v905_v32 = vmul.f32 %v889_v17, %v809_v16  ;;  %v815_v20 = vmul.f32 0.5, %v3982_v21  ;;  %v3234_v21 = vld [vmem:[%s3686_s20 + $0x10] sm:$0xff]   ;;  %v3545_v17 = vld [vmem:[%s3701_s15 + $0x28] sm:$0xff] }
 0x2a6   : > { %v892_v29 = vadd.f32 1.0, %v3371_v3  ;;  %v906_v30 = vmul.f32 %v890_v15, %v810_v24  ;;  %v814_v42 = vmul.f32 0.5, %v3978_v14  ;;  %v816_v37 = vmul.f32 0.5, %v3986_v60  ;;  %v3233_v14 = vld [vmem:[%s3686_s20 + $0x8] sm:$0xff]   ;;  %v3235_v60 = vld [vmem:[%s3686_s20 + $0x18] sm:$0xff]   ;;  %v3546_v16 = vld [vmem:[%s3701_s15 + $0x30] sm:$0xff] }
 0x2a7   : > { %v907_v33 = vmul.f32 %v891_v2, %v811_v36  ;;  %964 = vmatpush1.bf16.msra.mxu1 %v923_v25  ;;  %v3547_v3 = vld [vmem:[%s3701_s15 + $0x38] sm:$0xff] }
 0x2a8   : > { %v908_v31 = vmul.f32 %v892_v29, %v812_v26  ;;  %v3548_v26 = vld [vmem:[%s3701_s15 + $0x40] sm:$0xff] }
 0x2a9   : > { %v925_v35 = vpack.c.bf16 %v907_v33, %v905_v32  ;;  %v3549_v32 = vld [vmem:[%s3701_s15 + $0x48] sm:$0xff] }
 0x2aa   : > { %v3373_v38 = vpop.eup %3372  ;;  %v926_v39 = vpack.c.bf16 %v908_v31, %v906_v30  ;;  %v3550_v30 = vld [vmem:[%s3701_s15 + $0x50] sm:$0xff] }
 0x2ab   : > { %v3375_v43 = vpop.eup %3374  ;;  %v893_v48 = vadd.f32 1.0, %v3373_v38 }
 0x2ac   : > { %v3377_v40 = vpop.eup %3376  ;;  %965 = vmatprep.subr.bf16.mxu1 %v926_v39  ;;  %v894_v4 = vadd.f32 1.0, %v3375_v43  ;;  %v3552_v43 = vld [vmem:[%s3701_s15 + $0x60] sm:$0xff] }
 0x2ad   : > { %v3379_v11 = vpop.eup %3378  ;;  %966 = vmatpush1.bf16.msra.mxu1 %v925_v35  ;;  %v895_v41 = vadd.f32 1.0, %v3377_v40  ;;  %v909_v46 = vmul.f32 %v893_v48, %v813_v12  ;;  %v3551_v35 = vld [vmem:[%s3701_s15 + $0x58] sm:$0xff]  ;;  %v3553_v48 = vld [vmem:[%s3701_s15 + $0x68] sm:$0xff] }
 0x2ae   : > { %v896_v45 = vadd.f32 1.0, %v3379_v11  ;;  %v910_v19 = vmul.f32 %v894_v4, %v814_v42  ;;  %v3554_v4 = vld [vmem:[%s3701_s15 + $0x70] sm:$0xff]  ;;  %v3555_v12 = vld [vmem:[%s3701_s15 + $0x78] sm:$0xff] }
 0x2af   : > { %v911_v47 = vmul.f32 %v895_v41, %v815_v20  ;;  %v3236_v41 = vld [vmem:[%s3691_s29] ss:$16 sps:$4 sm:$0xff]   ;;  %v3238_v42 = vld [vmem:[%s3691_s29 + $0x4] ss:$16 sps:$4 sm:$0xff]  }
 0x2b0   : > { %v912_v50 = vmul.f32 %v896_v45, %v816_v37  ;;  %v3239_v37 = vld [vmem:[%s3691_s29 + $0x8] ss:$16 sps:$4 sm:$0xff]   ;;  %v3241_v45 = vld [vmem:[%s3691_s29 + $0xc] ss:$16 sps:$4 sm:$0xff]   ;;  %1482 = vmatprep.subr.bf16.mxu0 %v3238_v42 }
 0x2b1   : > { %v927_v27 = vpack.c.bf16 %v911_v47, %v909_v46  ;;  %v3244_v46 = vld [vmem:[%s3691_s29 + $0x24] ss:$16 sps:$4 sm:$0xff]   ;;  %v3247_v47 = vld [vmem:[%s3691_s29 + $0x2c] ss:$16 sps:$4 sm:$0xff]   ;;  %1483 = vmatpush1.bf16.msra.mxu0 %v3236_v41 }
 0x2b2   : > { %v928_v53 = vpack.c.bf16 %v912_v50, %v910_v19  ;;  %v3242_v19 = vld [vmem:[%s3691_s29 + $0x20] ss:$16 sps:$4 sm:$0xff]   ;;  %1484 = vmatprep.subr.bf16.mxu0 %v3244_v46  ;;  %v3245_v50 = vld [vmem:[%s3691_s29 + $0x28] ss:$16 sps:$4 sm:$0xff]   ;;  %v3256_v41 = vld [vmem:[%s3691_s29 + $0x64] ss:$16 sps:$4 sm:$0xff]  }
 0x2b3   : > { %v3259_v42 = vld [vmem:[%s3691_s29 + $0x6c] ss:$16 sps:$4 sm:$0xff]  }
 0x2b4   : > { %967 = vmatprep.subr.bf16.mxu1 %v928_v53 }
 0x2b5   : > { %968 = vmatpush1.bf16.msra.mxu1 %v927_v27  ;;  %1485 = vmatpush1.bf16.msra.mxu0 %v3242_v19  ;;  %v3257_v19 = vld [vmem:[%s3691_s29 + $0x68] ss:$16 sps:$4 sm:$0xff]  }
 0x2b6   : > { %1595 = vmatprep.subr.bf16.mxu1 %v3241_v45 }
 0x2b8   : > { %2974 = vmatmul.mubr.msk.bf16.vlgmr.msra.gmra.mrb[0].mxu1 %vm683_vm0, %v3232_v59 }
 0x2b9   : > { %1003 = vmatprep.mubr.bf16.mxu1 %v3598_v34  ;;  %1596 = vmatpush1.bf16.msra.mxu1 %v3239_v37 }
 0x2ba   : > { %1597 = vmatprep.subr.bf16.mxu1 %v3247_v47  ;;  %v3254_v47 = vld [vmem:[%s3691_s29 + $0x60] ss:$16 sps:$4 sm:$0xff]  }
 0x2bd   : > { %1598 = vmatpush1.bf16.msra.mxu1 %v3245_v50 }
 0x2c0   : > { %2975 = vmatmul.mubr.msk.bf16.gmra.mrb[4].mxu1 %vm683_vm0, %v3233_v14 }
 0x2c1   : > { %1013 = vmatprep.mubr.bf16.mxu1 %v3598_v34 }
 0x2c8   : > { %2976 = vmatmul.mubr.msk.bf16.gmra.mrb[8].mxu1 %vm683_vm0, %v3234_v21 }
 0x2c9   : > { %1023 = vmatprep.mubr.bf16.mxu1 %v3598_v34 }
 0x2d0   : > { %2977 = vmatmul.mubr.msk.bf16.gmra.mrb[12].mxu1 %vm683_vm0, %v3235_v60 }
 0x2d1   : > { %1627 = vmatprep.mubr.bf16.mxu1 %v3598_v34 }
 0x38b   : > { %v995_v54 = vpop.f32.mrb[0].mxu1 }
 0x38c   : > { %v4022_v56 = vadd.f32 %v3540_v55, %v995_v54  ;;  %v997_v51 = vpop.f32.mrb[1].mxu1 }
 0x38d   : > { %v999_v28 = vpop.f32.mrb[2].mxu1  ;;  %v4053_v29 = vadd.f32 %v3548_v26, %v997_v51 }
 0x38e   : > { %5266 = vst [vmem:[#allocation3_spill] sm:$0xff] %v4022_v56  ;;  %v4025_v8 = vadd.f32 %v3541_v57, %v999_v28  ;;  %1050 = vadd.xlane.f32.xlu0 %v4022_v56  ;;  %v1001_v23 = vpop.f32.mrb[3].mxu1 }
 0x38f   : > { %5274 = vst [vmem:[#allocation11_spill] sm:$0xff] %v4053_v29  ;;  %v4057_v33 = vadd.f32 %v3549_v32, %v1001_v23  ;;  %v3248_v32 = vld [vmem:[%s3691_s29 + $0x40] ss:$16 sps:$4 sm:$0xff]  }
 0x390   : > { %5267 = vst [vmem:[#allocation4_spill] sm:$0xff] %v4025_v8  ;;  %1052 = vadd.xlane.f32.xlu1 %v4025_v8 }
 0x391   : > { %5275 = vst [vmem:[#allocation12_spill] sm:$0xff] %v4057_v33 }
 0x393   : > { %v1005_v0 = vpop.f32.mrb[4].mxu1 }
 0x394   : > { %v4030_v5 = vadd.f32 %v3542_v1, %v1005_v0  ;;  %v1007_v6 = vpop.f32.mrb[5].mxu1 }
 0x395   : > { %v1009_v61 = vpop.f32.mrb[6].mxu1  ;;  %v4061_v31 = vadd.f32 %v3550_v30, %v1007_v6  ;;  %v3251_v30 = vld [vmem:[%s3691_s29 + $0x48] ss:$16 sps:$4 sm:$0xff]  }
 0x396   : > { %5268 = vst [vmem:[#allocation5_spill] sm:$0xff] %v4030_v5  ;;  %v4033_v9 = vadd.f32 %v3543_v62, %v1009_v61  ;;  %1054 = vadd.xlane.f32.xlu0 %v4030_v5  ;;  %v1011_v10 = vpop.f32.mrb[7].mxu1 }
 0x397   : > { %5276 = vst [vmem:[#allocation13_spill] sm:$0xff] %v4061_v31  ;;  %v4065_v38 = vadd.f32 %v3551_v35, %v1011_v10 }
 0x398   : > { %5269 = vst [vmem:[#allocation6_spill] sm:$0xff] %v4033_v9  ;;  %1056 = vadd.xlane.f32.xlu1 %v4033_v9 }
 0x399   : > { %5277 = vst [vmem:[#allocation14_spill] sm:$0xff] %v4065_v38 }
 0x39b   : > { %v1015_v58 = vpop.f32.mrb[8].mxu1 }
 0x39c   : > { %v4038_v44 = vadd.f32 %v3544_v13, %v1015_v58  ;;  %v1017_v63 = vpop.f32.mrb[9].mxu1 }
 0x39d   : > { %v1019_v52 = vpop.f32.mrb[10].mxu1  ;;  %v4069_v39 = vadd.f32 %v3552_v43, %v1017_v63 }
 0x39e   : > { %5270 = vst [vmem:[#allocation7_spill] sm:$0xff] %v4038_v44  ;;  %v4041_v18 = vadd.f32 %v3545_v17, %v1019_v52  ;;  %1058 = vadd.xlane.f32.xlu0 %v4038_v44  ;;  %v1021_v7 = vpop.f32.mrb[11].mxu1 }
 0x39f   : > { %5278 = vst [vmem:[#allocation15_spill] sm:$0xff] %v4069_v39  ;;  %v4073_v40 = vadd.f32 %v3553_v48, %v1021_v7 }
 0x3a0   : > { %5271 = vst [vmem:[#allocation8_spill] sm:$0xff] %v4041_v18  ;;  %1060 = vadd.xlane.f32.xlu1 %v4041_v18 }
 0x3a1   : > { %5279 = vst [vmem:[#allocation16_spill] sm:$0xff] %v4073_v40 }
 0x3a3   : > { %v1025_v22 = vpop.f32.mrb[12].mxu1 }
 0x3a4   : > { %v4046_v36 = vadd.f32 %v3546_v16, %v1025_v22  ;;  %v1027_v15 = vpop.f32.mrb[13].mxu1 }
 0x3a5   : > { %v1029_v2 = vpop.f32.mrb[14].mxu1  ;;  %v4077_v11 = vadd.f32 %v3554_v4, %v1027_v15 }
 0x3a6   : > { %5272 = vst [vmem:[#allocation9_spill] sm:$0xff] %v4046_v36  ;;  %v4049_v24 = vadd.f32 %v3547_v3, %v1029_v2  ;;  %1062 = vadd.xlane.f32.xlu0 %v4046_v36  ;;  %v1031_v25 = vpop.f32.mrb[15].mxu1  ;;  %v3250_v2 = vld [vmem:[%s3691_s29 + $0x44] ss:$16 sps:$4 sm:$0xff]   ;;  %v3253_v3 = vld [vmem:[%s3691_s29 + $0x4c] ss:$16 sps:$4 sm:$0xff]  }
 0x3a7   : > { %5280 = vst [vmem:[#allocation17_spill] sm:$0xff] %v4077_v11  ;;  %v4081_v20 = vadd.f32 %v3555_v12, %v1031_v25  ;;  %1486 = vmatprep.subr.bf16.mxu0 %v3250_v2  ;;  %1599 = vmatprep.subr.bf16.mxu1 %v3253_v3  ;;  %v3266_v2 = vld [vmem:[%s3691_s29 + $0xa0] ss:$16 sps:$4 sm:$0xff]   ;;  %v3269_v3 = vld [vmem:[%s3691_s29 + $0xa8] ss:$16 sps:$4 sm:$0xff]  }
 0x3a8   : > { %5273 = vst [vmem:[#allocation10_spill] sm:$0xff] %v4049_v24  ;;  %1064 = vadd.xlane.f32.xlu1 %v4049_v24  ;;  %1487 = vmatpush1.bf16.msra.mxu0 %v3248_v32 }
 0x3a9   : > { %5281 = vst [vmem:[#allocation18_spill] sm:$0xff] %v4081_v20  ;;  %1600 = vmatpush1.bf16.msra.mxu1 %v3251_v30  ;;  %1488 = vmatprep.subr.bf16.mxu0 %v3256_v41  ;;  %v3275_v41 = vld [vmem:[%s3691_s29 + $0xc8] ss:$16 sps:$4 sm:$0xff]  }
 0x3aa   : > { %1066 = vadd.xlane.f32.xlu0 %v4053_v29  ;;  %1601 = vmatprep.subr.bf16.mxu1 %v3259_v42  ;;  %v3277_v42 = vld [vmem:[%s3691_s29 + $0xcc] ss:$16 sps:$4 sm:$0xff]  }
 0x3ac   : > { %1068 = vadd.xlane.f32.xlu1 %v4057_v33  ;;  %1489 = vmatpush1.bf16.msra.mxu0 %v3254_v47 }
 0x3ad   : > { %1602 = vmatpush1.bf16.msra.mxu1 %v3257_v19  ;;  %v3280_v19 = vld [vmem:[%s3691_s29 + $0xe4] ss:$16 sps:$4 sm:$0xff]  }
 0x3ae   : > { %1070 = vadd.xlane.f32.xlu0 %v4061_v31 }
 0x3b0   : > { %1072 = vadd.xlane.f32.xlu1 %v4065_v38 }
 0x3b2   : > { %1074 = vadd.xlane.f32.xlu0 %v4069_v39 }
 0x3b4   : > { %1076 = vadd.xlane.f32.xlu1 %v4073_v40 }
 0x3b6   : > { %1078 = vadd.xlane.f32.xlu0 %v4077_v11 }
 0x3b8   : > { %1080 = vadd.xlane.f32.xlu1 %v4081_v20 }
 0x41b   : > { %v1051_v27 = vpop.xlane.xlu0 %1050 }
 0x41c   : > { %v1082_v53 = vmul.f32 0.0078125, %v1051_v27 }
 0x41d   : > { %v1053_v59 = vpop.xlane.xlu1 %1052 }
 0x41e   : > { %v4094_v14 = vsub.f32 %v4022_v56, %v1082_v53  ;;  %v1083_v21 = vmul.f32 0.0078125, %v1053_v59 }
 0x420   : > { %v4097_v60 = vsub.f32 %v4025_v8, %v1083_v21  ;;  %v1114_v54 = vmul.f32 %v4094_v14, %v4094_v14 }
 0x422   : > { %1130 = vadd.xlane.f32.xlu0 %v1114_v54  ;;  %v1115_v55 = vmul.f32 %v4097_v60, %v4097_v60  ;;  %v3262_v54 = vld [vmem:[%s3691_s29 + $0x84] ss:$16 sps:$4 sm:$0xff]  }
 0x423   : > { %v1055_v51 = vpop.xlane.xlu0 %1054  ;;  %1490 = vmatprep.subr.bf16.mxu0 %v3262_v54  ;;  %v3281_v54 = vld [vmem:[%s3691_s29 + $0xe8] ss:$16 sps:$4 sm:$0xff]  }
 0x424   : > { %v1084_v28 = vmul.f32 0.0078125, %v1055_v51  ;;  %1132 = vadd.xlane.f32.xlu1 %v1115_v55  ;;  %v3265_v55 = vld [vmem:[%s3691_s29 + $0x8c] ss:$16 sps:$4 sm:$0xff]  }
 0x425   : > { %v1057_v57 = vpop.xlane.xlu1 %1056  ;;  %1603 = vmatprep.subr.bf16.mxu1 %v3265_v55 }
 0x426   : > { %v4104_v23 = vsub.f32 %v4030_v5, %v1084_v28  ;;  %v1085_v0 = vmul.f32 0.0078125, %v1057_v57 }
 0x428   : > { %v4107_v1 = vsub.f32 %v4033_v9, %v1085_v0  ;;  %v1116_v6 = vmul.f32 %v4104_v23, %v4104_v23  ;;  %v3260_v0 = vld [vmem:[%s3691_s29 + $0x80] ss:$16 sps:$4 sm:$0xff]  }
 0x429   : > { %1491 = vmatpush1.bf16.msra.mxu0 %v3260_v0 }
 0x42a   : > { %1134 = vadd.xlane.f32.xlu0 %v1116_v6  ;;  %v1117_v61 = vmul.f32 %v4107_v1, %v4107_v1  ;;  %v3263_v6 = vld [vmem:[%s3691_s29 + $0x88] ss:$16 sps:$4 sm:$0xff]  }
 0x42b   : > { %v1059_v62 = vpop.xlane.xlu0 %1058  ;;  %1604 = vmatpush1.bf16.msra.mxu1 %v3263_v6 }
 0x42c   : > { %v1086_v10 = vmul.f32 0.0078125, %v1059_v62  ;;  %1136 = vadd.xlane.f32.xlu1 %v1117_v61 }
 0x42d   : > { %v1061_v58 = vpop.xlane.xlu1 %1060 }
 0x42e   : > { %v4114_v13 = vsub.f32 %v4038_v44, %v1086_v10  ;;  %v1087_v63 = vmul.f32 0.0078125, %v1061_v58 }
 0x430   : > { %v4117_v52 = vsub.f32 %v4041_v18, %v1087_v63  ;;  %v1118_v17 = vmul.f32 %v4114_v13, %v4114_v13 }
 0x432   : > { %1138 = vadd.xlane.f32.xlu0 %v1118_v17  ;;  %v1119_v7 = vmul.f32 %v4117_v52, %v4117_v52  ;;  %v3268_v17 = vld [vmem:[%s3691_s29 + $0xa4] ss:$16 sps:$4 sm:$0xff]  }
 0x433   : > { %v1063_v22 = vpop.xlane.xlu0 %1062  ;;  %1492 = vmatprep.subr.bf16.mxu0 %v3268_v17 }
 0x434   : > { %v1088_v16 = vmul.f32 0.0078125, %v1063_v22  ;;  %1140 = vadd.xlane.f32.xlu1 %v1119_v7  ;;  %v3271_v7 = vld [vmem:[%s3691_s29 + $0xac] ss:$16 sps:$4 sm:$0xff]   ;;  %1493 = vmatpush1.bf16.msra.mxu0 %v3266_v2 }
 0x435   : > { %v1065_v15 = vpop.xlane.xlu1 %1064  ;;  %1605 = vmatprep.subr.bf16.mxu1 %v3271_v7 }
 0x436   : > { %v4126_v25 = vsub.f32 %v4046_v36, %v1088_v16  ;;  %v1089_v26 = vmul.f32 0.0078125, %v1065_v15  ;;  %1606 = vmatpush1.bf16.msra.mxu1 %v3269_v3 }
 0x437   : > { %v1067_v35 = vpop.xlane.xlu0 %1066  ;;  %1607 = vmatprep.subr.bf16.mxu1 %v3277_v42 }
 0x438   : > { %v4131_v43 = vsub.f32 %v4049_v24, %v1089_v26  ;;  %v1090_v48 = vmul.f32 0.0078125, %v1067_v35  ;;  %v1120_v4 = vmul.f32 %v4126_v25, %v4126_v25 }
 0x439   : > { %v1069_v12 = vpop.xlane.xlu1 %1068 }
 0x43a   : > { %v4138_v37 = vsub.f32 %v4053_v29, %v1090_v48  ;;  %v1091_v45 = vmul.f32 0.0078125, %v1069_v12  ;;  %1142 = vadd.xlane.f32.xlu0 %v1120_v4  ;;  %v1121_v46 = vmul.f32 %v4131_v43, %v4131_v43  ;;  %v3272_v48 = vld [vmem:[%s3691_s29 + $0xc0] ss:$16 sps:$4 sm:$0xff]   ;;  %v3274_v4 = vld [vmem:[%s3691_s29 + $0xc4] ss:$16 sps:$4 sm:$0xff]   ;;  %1608 = vmatpush1.bf16.msra.mxu1 %v3275_v41 }
 0x43b   : > { %v1071_v50 = vpop.xlane.xlu0 %1070  ;;  %1494 = vmatprep.subr.bf16.mxu0 %v3274_v4 }
 0x43c   : > { %v4145_v27 = vsub.f32 %v4057_v33, %v1091_v45  ;;  %v1092_v53 = vmul.f32 0.0078125, %v1071_v50  ;;  %1144 = vadd.xlane.f32.xlu1 %v1121_v46  ;;  %v1122_v59 = vmul.f32 %v4138_v37, %v4138_v37  ;;  %v3283_v50 = vld [vmem:[%s3691_s29 + $0xec] ss:$16 sps:$4 sm:$0xff]   ;;  %1495 = vmatpush1.bf16.msra.mxu0 %v3272_v48  ;;  %v1248_v48 = vsub.s32 3, %v3842_v49 }
 0x43d   : > { %v1073_v21 = vpop.xlane.xlu1 %1072  ;;  %1496 = vmatprep.subr.bf16.mxu0 %v3280_v19  ;;  %1609 = vmatprep.subr.bf16.mxu1 %v3283_v50 }
 0x43e   : > { %v4152_v51 = vsub.f32 %v4061_v31, %v1092_v53  ;;  %v1093_v28 = vmul.f32 0.0078125, %v1073_v21  ;;  %1146 = vadd.xlane.f32.xlu0 %v1122_v59  ;;  %v1123_v57 = vmul.f32 %v4145_v27, %v4145_v27  ;;  %v3278_v21 = vld [vmem:[%s3691_s29 + $0xe0] ss:$16 sps:$4 sm:$0xff]   ;;  %1610 = vmatpush1.bf16.msra.mxu1 %v3281_v54 }
 0x43f   : > { %v1075_v61 = vpop.xlane.xlu0 %1074 }
 0x440   : > { %v4159_v62 = vsub.f32 %v4065_v38, %v1093_v28  ;;  %v1094_v10 = vmul.f32 0.0078125, %v1075_v61  ;;  %1148 = vadd.xlane.f32.xlu1 %v1123_v57  ;;  %v1124_v58 = vmul.f32 %v4152_v51, %v4152_v51  ;;  %1497 = vmatpush1.bf16.msra.mxu0 %v3278_v21  ;;  %v3284_v28 = vld [vmem:[%s3696_s12 + $0x40] sm:$0xff]  }
 0x441   : > { %v1077_v63 = vpop.xlane.xlu1 %1076  ;;  %v3286_v57 = vld [vmem:[%s3696_s12 + $0xc0] sm:$0xff]   ;;  %3059 = vmatprep.subr.bf16.mxu0 %v3284_v28 }
 0x442   : > { %v4166_v22 = vsub.f32 %v4069_v39, %v1094_v10  ;;  %v1095_v16 = vmul.f32 0.0078125, %v1077_v63  ;;  %1150 = vadd.xlane.f32.xlu0 %v1124_v58  ;;  %v1125_v15 = vmul.f32 %v4159_v62, %v4159_v62  ;;  %3123 = vmatprep.subr.bf16.mxu1 %v3286_v57 }
 0x443   : > { %v1079_v26 = vpop.xlane.xlu0 %1078 }
 0x444   : > { %v4173_v32 = vsub.f32 %v4073_v40, %v1095_v16  ;;  %v1096_v30 = vmul.f32 0.0078125, %v1079_v26  ;;  %1152 = vadd.xlane.f32.xlu1 %v1125_v15  ;;  %v1126_v35 = vmul.f32 %v4166_v22, %v4166_v22  ;;  %v1228_v16 = vsub.s32 2, %v3842_v49 }
 0x445   : > { %v1081_v12 = vpop.xlane.xlu1 %1080 }
 0x446   : > { %v4182_v45 = vsub.f32 %v4077_v11, %v1096_v30  ;;  %v1097_v46 = vmul.f32 0.0078125, %v1081_v12  ;;  %1154 = vadd.xlane.f32.xlu0 %v1126_v35  ;;  %v1127_v47 = vmul.f32 %v4173_v32, %v4173_v32  ;;  %v4201_v30 = vld [vmem:[%s3671_s11] sm:$0xff] }
 0x447   : > { %v4204_v35 = vrot.slane %v4201_v30, %v1228_v16  ;;  %v3290_v16 = vld [vmem:[%s3696_s12 + $0xc8] sm:$0xff]  }
 0x448   : > { %v4189_v53 = vsub.f32 %v4081_v20, %v1097_v46  ;;  %1156 = vadd.xlane.f32.xlu1 %v1127_v47  ;;  %v1128_v59 = vmul.f32 %v4182_v45, %v4182_v45 }
 0x44a   : > { %1158 = vadd.xlane.f32.xlu0 %v1128_v59  ;;  %v1129_v55 = vmul.f32 %v4189_v53, %v4189_v53  ;;  %v4211_v59 = vrot.slane %v4201_v30, %v1248_v48 }
 0x44c   : > { %1160 = vadd.xlane.f32.xlu1 %v1129_v55 }
 0x4af   : > { %v1131_v0 = vpop.xlane.xlu0 %1130 }
 0x4b0   : > { %v1162_v6 = vmul.f32 0.0078125, %v1131_v0 }
 0x4b1   : > { %v1133_v61 = vpop.xlane.xlu1 %1132 }
 0x4b2   : > { %v1178_v10 = vadd.f32 1e-05, %v1162_v6  ;;  %v1163_v58 = vmul.f32 0.0078125, %v1133_v61 }
 0x4b4   : > { %3380 = vrsqrt.f32 %v1178_v10  ;;  %v1179_v63 = vadd.f32 1e-05, %v1163_v58  ;;  %v3285_v10 = vld [vmem:[%s3696_s12] sm:$0xff]  }
 0x4b5   : > { %v3287_v58 = vld [vmem:[%s3696_s12 + $0x80] sm:$0xff]  }
 0x4b6   : > { %3382 = vrsqrt.f32 %v1179_v63 }
 0x4b7   : > { %v1135_v17 = vpop.xlane.xlu0 %1134 }
 0x4b8   : > { %v1164_v7 = vmul.f32 0.0078125, %v1135_v17 }
 0x4b9   : > { %v1137_v15 = vpop.xlane.xlu1 %1136 }
 0x4ba   : > { %v1180_v2 = vadd.f32 1e-05, %v1164_v7  ;;  %v1165_v3 = vmul.f32 0.0078125, %v1137_v15  ;;  %v3288_v7 = vld [vmem:[%s3696_s12 + $0x48] sm:$0xff]  }
 0x4bc   : > { %3384 = vrsqrt.f32 %v1180_v2  ;;  %v1181_v26 = vadd.f32 1e-05, %v1165_v3 }
 0x4be   : > { %v3381_v4 = vpop.eup %3380  ;;  %3386 = vrsqrt.f32 %v1181_v26 }
 0x4bf   : > { %v1210_v12 = vmul.f32 %v3381_v4, %v4094_v14  ;;  %v1139_v41 = vpop.xlane.xlu0 %1138 }
 0x4c0   : > { %v3383_v42 = vpop.eup %3382  ;;  %v1166_v46 = vmul.f32 0.0078125, %v1139_v41  ;;  %v3291_v41 = vld [vmem:[%s3696_s12 + $0x88] sm:$0xff]  }
 0x4c1   : > { %v1230_v47 = vmul.f32 %v4204_v35, %v1210_v12  ;;  %v1211_v19 = vmul.f32 %v3383_v42, %v4097_v60  ;;  %v1141_v50 = vpop.xlane.xlu1 %1140  ;;  %v3289_v12 = vld [vmem:[%s3696_s12 + $0x8] sm:$0xff]  }
 0x4c2   : > { %v1182_v21 = vadd.f32 1e-05, %v1166_v46  ;;  %v1167_v54 = vmul.f32 0.0078125, %v1141_v50  ;;  %v3292_v46 = vld [vmem:[%s3696_s12 + $0x50] sm:$0xff]  }
 0x4c3   : > { %v1231_v55 = vmul.f32 %v4204_v35, %v1211_v19  ;;  %v1250_v28 = vadd.f32 %v4211_v59, %v1230_v47  ;;  %v3294_v47 = vld [vmem:[%s3696_s12 + $0xd0] sm:$0xff]  }
 0x4c4   : > { %3388 = vrsqrt.f32 %v1182_v21  ;;  %v1183_v14 = vadd.f32 1e-05, %v1167_v54 }
 0x4c5   : > { %v1251_v57 = vadd.f32 %v4211_v59, %v1231_v55 }
 0x4c6   : > { %v3385_v0 = vpop.eup %3384  ;;  %3390 = vrsqrt.f32 %v1183_v14 }
 0x4c7   : > { %v1143_v60 = vpop.xlane.xlu0 %1142  ;;  %v1266_v6 = vpack.c.bf16 %v1251_v57, %v1250_v28  ;;  %v1212_v61 = vmul.f32 %v3385_v0, %v4104_v23 }
 0x4c8   : > { %v3387_v63 = vpop.eup %3386  ;;  %v1168_v17 = vmul.f32 0.0078125, %v1143_v60  ;;  %v3293_v60 = vld [vmem:[%s3696_s12 + $0x10] sm:$0xff]  }
 0x4c9   : > { %1515 = vmatmul.mubr.bf16.vlgmr.msra.gmra.mrb[16].mxu0 %v1266_v6  ;;  %1628 = vmatmul.mubr.bf16.vlgmr.msra.gmra.mrb[16].mxu1 %v1266_v6  ;;  %v1145_v15 = vpop.xlane.xlu1 %1144  ;;  %v1213_v2 = vmul.f32 %v3387_v63, %v4107_v1  ;;  %v1232_v3 = vmul.f32 %v4204_v35, %v1212_v61  ;;  %v3295_v6 = vld [vmem:[%s3696_s12 + $0x90] sm:$0xff]   ;;  %v3296_v63 = vld [vmem:[%s3696_s12 + $0x58] sm:$0xff]  }
 0x4ca   : > { %v1184_v26 = vadd.f32 1e-05, %v1168_v17  ;;  %v1169_v48 = vmul.f32 0.0078125, %v1145_v15  ;;  %1524 = vmatprep.mubr.bf16.mxu0 %v3598_v34  ;;  %1637 = vmatprep.mubr.bf16.mxu1 %v3598_v34  ;;  %v3298_v17 = vld [vmem:[%s3696_s12 + $0xd8] sm:$0xff]  }
 0x4cb   : > { %v1147_v23 = vpop.xlane.xlu0 %1146  ;;  %v1233_v4 = vmul.f32 %v4204_v35, %v1213_v2  ;;  %3060 = vmatpush3.bf16.msra.mxu0 %v3285_v10  ;;  %3124 = vmatpush3.bf16.msra.mxu1 %v3287_v58  ;;  %v1252_v50 = vadd.f32 %v4211_v59, %v1232_v3  ;;  %v3297_v3 = vld [vmem:[%s3696_s12 + $0x18] sm:$0xff]  }
 0x4cc   : > { %3392 = vrsqrt.f32 %v1184_v26  ;;  %v1185_v42 = vadd.f32 1e-05, %v1169_v48  ;;  %v1170_v1 = vmul.f32 0.0078125, %v1147_v23  ;;  %3061 = vmatprep.subr.bf16.mxu0 %v3288_v7  ;;  %3125 = vmatprep.subr.bf16.mxu1 %v3290_v16  ;;  %v3299_v26 = vld [vmem:[%s3696_s12 + $0x98] sm:$0xff]  }
 0x4cd   : > { %v1149_v19 = vpop.xlane.xlu1 %1148  ;;  %v1253_v21 = vadd.f32 %v4211_v59, %v1233_v4 }
 0x4ce   : > { %v3389_v54 = vpop.eup %3388  ;;  %3394 = vrsqrt.f32 %v1185_v42  ;;  %v1186_v55 = vadd.f32 1e-05, %v1170_v1  ;;  %v1171_v14 = vmul.f32 0.0078125, %v1149_v19 }
 0x4cf   : > { %v1151_v28 = vpop.xlane.xlu0 %1150  ;;  %v1267_v57 = vpack.c.bf16 %v1253_v21, %v1252_v50  ;;  %v1214_v0 = vmul.f32 %v3389_v54, %v4114_v13  ;;  %3062 = vmatpush3.bf16.msra.mxu0 %v3289_v12  ;;  %3126 = vmatpush3.bf16.msra.mxu1 %v3291_v41 }
 0x4d0   : > { %v3391_v61 = vpop.eup %3390  ;;  %3396 = vrsqrt.f32 %v1186_v55  ;;  %v1187_v10 = vadd.f32 1e-05, %v1171_v14  ;;  %v1172_v58 = vmul.f32 0.0078125, %v1151_v28  ;;  %3063 = vmatprep.subr.bf16.mxu0 %v3292_v46  ;;  %3127 = vmatprep.subr.bf16.mxu1 %v3294_v47 }
 0x4d1   : > { %1525 = vmatmul.mubr.bf16.gmra.mrb[20].mxu0 %v1267_v57  ;;  %1638 = vmatmul.mubr.bf16.gmra.mrb[20].mxu1 %v1267_v57  ;;  %v1153_v7 = vpop.xlane.xlu1 %1152  ;;  %v1215_v16 = vmul.f32 %v3391_v61, %v4117_v52  ;;  %v1234_v13 = vmul.f32 %v4204_v35, %v1214_v0 }
 0x4d2   : > { %3398 = vrsqrt.f32 %v1187_v10  ;;  %v1173_v15 = vmul.f32 0.0078125, %v1153_v7  ;;  %1534 = vmatprep.mubr.bf16.mxu0 %v3598_v34  ;;  %1647 = vmatprep.mubr.bf16.mxu1 %v3598_v34  ;;  %v1188_v48 = vadd.f32 1e-05, %v1172_v58 }
 0x4d3   : > { %v1235_v2 = vmul.f32 %v4204_v35, %v1215_v16  ;;  %3064 = vmatpush3.bf16.msra.mxu0 %v3293_v60  ;;  %3128 = vmatpush3.bf16.msra.mxu1 %v3295_v6  ;;  %v1155_v4 = vpop.xlane.xlu0 %1154  ;;  %v1254_v12 = vadd.f32 %v4211_v59, %v1234_v13 }
 0x4d4   : > { %v1189_v23 = vadd.f32 1e-05, %v1173_v15  ;;  %3065 = vmatprep.subr.bf16.mxu0 %v3296_v63  ;;  %3129 = vmatprep.subr.bf16.mxu1 %v3298_v17  ;;  %v1174_v50 = vmul.f32 0.0078125, %v1155_v4 }
 0x4d5   : > { %v1157_v52 = vpop.xlane.xlu1 %1156  ;;  %v1255_v41 = vadd.f32 %v4211_v59, %v1235_v2 }
 0x4d6   : > { %v3393_v42 = vpop.eup %3392  ;;  %3400 = vrsqrt.f32 %v1189_v23  ;;  %v1175_v1 = vmul.f32 0.0078125, %v1157_v52  ;;  %v1190_v0 = vadd.f32 1e-05, %v1174_v50 }
 0x4d7   : > { %v1268_v46 = vpack.c.bf16 %v1255_v41, %v1254_v12  ;;  %v1216_v47 = vmul.f32 %v3393_v42, %v4126_v25  ;;  %3066 = vmatpush3.bf16.msra.mxu0 %v3297_v3  ;;  %3130 = vmatpush3.bf16.msra.mxu1 %v3299_v26  ;;  %3402 = vrsqrt.f32 %v1188_v48  ;;  %v1159_v60 = vpop.xlane.xlu0 %1158 }
 0x4d8   : > { %v3395_v19 = vpop.eup %3394  ;;  %v1191_v14 = vadd.f32 1e-05, %v1175_v1  ;;  %v1176_v16 = vmul.f32 0.0078125, %v1159_v60  ;;  %v3302_v60 = vld [vmem:[%s3696_s12 + $0xe0] sm:$0xff]  }
 0x4d9   : > { %1535 = vmatmul.mubr.bf16.gmra.mrb[24].mxu0 %v1268_v46  ;;  %1648 = vmatmul.mubr.bf16.gmra.mrb[24].mxu1 %v1268_v46  ;;  %v1217_v21 = vmul.f32 %v3395_v19, %v4131_v43  ;;  %v1236_v54 = vmul.f32 %v4204_v35, %v1216_v47  ;;  %v1161_v28 = vpop.xlane.xlu1 %1160 }
 0x4da   : > { %v3397_v55 = vpop.eup %3396  ;;  %1544 = vmatprep.mubr.bf16.mxu0 %v3598_v34  ;;  %1657 = vmatprep.mubr.bf16.mxu1 %v3598_v34  ;;  %3404 = vrsqrt.f32 %v1191_v14  ;;  %v1177_v58 = vmul.f32 0.0078125, %v1161_v28  ;;  %v1192_v3 = vadd.f32 1e-05, %v1176_v16  ;;  %v3313_v16 = vld [vmem:[%s3696_s12 + $0x38] sm:$0xff]  }
 0x4db   : > { %v1237_v25 = vmul.f32 %v4204_v35, %v1217_v21  ;;  %v1256_v6 = vadd.f32 %v4211_v59, %v1236_v54  ;;  %v1218_v43 = vmul.f32 %v3397_v55, %v4138_v37  ;;  %3406 = vrsqrt.f32 %v1190_v0  ;;  %v3300_v0 = vld [vmem:[%s3696_s12 + $0x60] sm:$0xff]   ;;  %3131 = vmatprep.subr.bf16.mxu1 %v3302_v60 }
 0x4dc   : > { %v3399_v57 = vpop.eup %3398  ;;  %v1193_v2 = vadd.f32 1e-05, %v1177_v58  ;;  %3067 = vmatprep.subr.bf16.mxu0 %v3300_v0  ;;  %v3309_v58 = vld [vmem:[%s3696_s12 + $0x30] sm:$0xff]  }
 0x4dd   : > { %v1257_v61 = vadd.f32 %v4211_v59, %v1237_v25  ;;  %v1219_v10 = vmul.f32 %v3399_v57, %v4145_v27  ;;  %v1238_v13 = vmul.f32 %v4204_v35, %v1218_v43  ;;  %v3307_v43 = vld [vmem:[%s3696_s12 + $0xa8] sm:$0xff]  }
 0x4de   : > { %3408 = vrsqrt.f32 %v1193_v2  ;;  %v1308_v2 = vsub.s32 4, %v3842_v49 }
 0x4df   : > { %v1269_v63 = vpack.c.bf16 %v1257_v61, %v1256_v6  ;;  %v1239_v17 = vmul.f32 %v4204_v35, %v1219_v10  ;;  %v1258_v26 = vadd.f32 %v4211_v59, %v1238_v13  ;;  %3410 = vrsqrt.f32 %v1192_v3  ;;  %v3301_v6 = vld [vmem:[%s3696_s12 + $0x20] sm:$0xff]   ;;  %v3306_v61 = vld [vmem:[%s3696_s12 + $0xe8] sm:$0xff]   ;;  %v3308_v10 = vld [vmem:[%s3696_s12 + $0x70] sm:$0xff]  }
 0x4e0   : > { %v3401_v7 = vpop.eup %3400  ;;  %3068 = vmatpush3.bf16.msra.mxu0 %v3301_v6  ;;  %v3314_v13 = vld [vmem:[%s3696_s12 + $0xf8] sm:$0xff]  }
 0x4e1   : > { %1545 = vmatmul.mubr.bf16.gmra.mrb[28].mxu0 %v1269_v63  ;;  %1658 = vmatmul.mubr.bf16.gmra.mrb[28].mxu1 %v1269_v63  ;;  %v3403_v15 = vpop.eup %3402  ;;  %v1259_v37 = vadd.f32 %v4211_v59, %v1239_v17  ;;  %v1221_v27 = vmul.f32 %v3401_v7, %v4159_v62  ;;  %v3310_v63 = vld [vmem:[%s3696_s12 + $0xf0] sm:$0xff]   ;;  %v3312_v7 = vld [vmem:[%s3696_s12 + $0x78] sm:$0xff]  }
 0x4e2   : > { %1554 = vmatprep.mubr.bf16.mxu0 %v3598_v34  ;;  %1667 = vmatprep.mubr.bf16.mxu1 %v3598_v34  ;;  %v1220_v48 = vmul.f32 %v3403_v15, %v4152_v51  ;;  %v3311_v17 = vld [vmem:[%s3696_s12 + $0xb0] sm:$0xff]   ;;  %v3315_v15 = vld [vmem:[%s3696_s12 + $0xb8] sm:$0xff]  }
 0x4e3   : > { %v1270_v23 = vpack.c.bf16 %v1259_v37, %v1258_v26  ;;  %v1241_v4 = vmul.f32 %v4204_v35, %v1221_v27  ;;  %v411_v37 = vld [vmem:[%s3671_s11 + $0x10] sm:$0xff]  ;;  %v410_v27 = vld [vmem:[%s3671_s11 + $0x8] sm:$0xff]  ;;  %v412_v3 = vld [vmem:[%s3671_s11 + $0x18] sm:$0xff]  ;;  %v4307_v26 = vrot.slane %v4201_v30, %v1308_v2 }
 0x4e4   : > { %v3405_v52 = vpop.eup %3404  ;;  %v1240_v12 = vmul.f32 %v4204_v35, %v1220_v48  ;;  %v4309_v48 = vrot.slane %v411_v37, %v1308_v2 }
 0x4e5   : > { %v3407_v41 = vpop.eup %3406  ;;  %v1261_v62 = vadd.f32 %v4211_v59, %v1241_v4  ;;  %v1223_v42 = vmul.f32 %v3405_v52, %v4173_v32  ;;  %v4313_v4 = vrot.slane %v412_v3, %v1308_v2 }
 0x4e6   : > { %v1260_v51 = vadd.f32 %v4211_v59, %v1240_v12  ;;  %v1222_v1 = vmul.f32 %v3407_v41, %v4166_v22 }
 0x4e7   : > { %v1243_v47 = vmul.f32 %v4204_v35, %v1223_v42 }
 0x4e8   : > { %v1271_v46 = vpack.c.bf16 %v1261_v62, %v1260_v51  ;;  %v3409_v19 = vpop.eup %3408  ;;  %v1242_v50 = vmul.f32 %v4204_v35, %v1222_v1 }
 0x4e9   : > { %1555 = vmatmul.mubr.bf16.gmra.mrb[32].mxu0 %v1270_v23  ;;  %1668 = vmatmul.mubr.bf16.gmra.mrb[32].mxu1 %v1270_v23  ;;  %v3411_v21 = vpop.eup %3410  ;;  %v1263_v54 = vadd.f32 %v4211_v59, %v1243_v47  ;;  %v1225_v32 = vmul.f32 %v3409_v19, %v4189_v53  ;;  %v4311_v23 = vrot.slane %v410_v27, %v1308_v2 }
 0x4ea   : > { %1564 = vmatprep.mubr.bf16.mxu0 %v3598_v34  ;;  %1677 = vmatprep.mubr.bf16.mxu1 %v3598_v34  ;;  %v1262_v22 = vadd.f32 %v4211_v59, %v1242_v50  ;;  %v1224_v55 = vmul.f32 %v3411_v21, %v4182_v45 }
 0x4eb   : > { %v1245_v28 = vmul.f32 %v4204_v35, %v1225_v32 }
 0x4ec   : > { %v1272_v14 = vpack.c.bf16 %v1263_v54, %v1262_v22  ;;  %v1244_v25 = vmul.f32 %v4204_v35, %v1224_v55  ;;  %v3303_v35 = vld [vmem:[%s3696_s12 + $0xa0] sm:$0xff]  }
 0x4ed   : > { %v1265_v53 = vadd.f32 %v4211_v59, %v1245_v28  ;;  %3132 = vmatpush3.bf16.msra.mxu1 %v3303_v35 }
 0x4ee   : > { %v1264_v57 = vadd.f32 %v4211_v59, %v1244_v25  ;;  %v3305_v59 = vld [vmem:[%s3696_s12 + $0x28] sm:$0xff]   ;;  %3133 = vmatprep.subr.bf16.mxu1 %v3306_v61 }
 0x4f0   : > { %v1273_v45 = vpack.c.bf16 %v1265_v53, %v1264_v57 }
 0x4f1   : > { %1565 = vmatmul.mubr.bf16.gmra.mrb[36].mxu0 %v1271_v46  ;;  %1678 = vmatmul.mubr.bf16.gmra.mrb[36].mxu1 %v1271_v46 }
 0x4f2   : > { %1574 = vmatprep.mubr.bf16.mxu0 %v3598_v34  ;;  %1687 = vmatprep.mubr.bf16.mxu1 %v3598_v34 }
 0x4f3   : > { %3134 = vmatpush3.bf16.msra.mxu1 %v3307_v43 }
 0x4f4   : > { %3135 = vmatprep.subr.bf16.mxu1 %v3310_v63 }
 0x4f7   : > { %3136 = vmatpush3.bf16.msra.mxu1 %v3311_v17 }
 0x4f8   : > { %3137 = vmatprep.subr.bf16.mxu1 %v3314_v13 }
 0x4f9   : > { %1575 = vmatmul.mubr.bf16.gmra.mrb[40].mxu0 %v1272_v14  ;;  %1688 = vmatmul.mubr.bf16.gmra.mrb[40].mxu1 %v1272_v14 }
 0x4fa   : > { %1584 = vmatprep.mubr.bf16.mxu0 %v3598_v34  ;;  %1697 = vmatprep.mubr.bf16.mxu1 %v3598_v34  ;;  %v3304_v34 = vld [vmem:[%s3696_s12 + $0x68] sm:$0xff]  }
 0x4fb   : > { %3069 = vmatprep.subr.bf16.mxu0 %v3304_v34  ;;  %3138 = vmatpush3.bf16.msra.mxu1 %v3315_v15 }
 0x4fc   : > { %3070 = vmatpush3.bf16.msra.mxu0 %v3305_v59 }
 0x4fd   : > { %3071 = vmatprep.subr.bf16.mxu0 %v3308_v10 }
 0x500   : > { %3072 = vmatpush3.bf16.msra.mxu0 %v3309_v58 }
 0x501   : > { %1585 = vmatmul.mubr.bf16.gmra.mrb[44].mxu0 %v1273_v45  ;;  %1698 = vmatmul.mubr.bf16.gmra.mrb[44].mxu1 %v1273_v45 }
 0x502   : > { %3073 = vmatprep.subr.bf16.mxu0 %v3312_v7 }
 0x504   : > { %3074 = vmatpush3.bf16.msra.mxu0 %v3313_v16 }
 0x59c   : > { %v1516_v52 = vpop.f32.mrb[16].mxu0  ;;  %v1629_v12 = vpop.f32.mrb[16].mxu1 }
 0x59d   : > { %v1517_v41 = vadd.f32 %v1516_v52, %v4307_v26  ;;  %v1630_v62 = vadd.f32 %v1629_v12, %v4309_v48  ;;  %v1518_v42 = vpop.f32.mrb[17].mxu0  ;;  %v1631_v51 = vpop.f32.mrb[17].mxu1 }
 0x59e   : > { %v4318_v1 = vadd.f32 %v1518_v42, %v4311_v23  ;;  %v4321_v30 = vadd.f32 %v1631_v51, %v4313_v4  ;;  %v1520_v46 = vpop.f32.mrb[18].mxu0  ;;  %v1633_v47 = vpop.f32.mrb[18].mxu1 }
 0x59f   : > { %v1708_v19 = vmul.f32 %v1517_v41, %v1517_v41  ;;  %v4323_v50 = vmul.f32 0.5, %v1517_v41  ;;  %v1710_v21 = vmul.f32 %v1630_v62, %v1630_v62  ;;  %v4325_v54 = vmul.f32 0.5, %v1630_v62  ;;  %v1522_v32 = vpop.f32.mrb[19].mxu0  ;;  %v1635_v22 = vpop.f32.mrb[19].mxu1 }
 0x5a0   : > { %v1709_v55 = vmul.f32 %v4318_v1, %v4318_v1  ;;  %v1711_v14 = vmul.f32 %v4321_v30, %v4321_v30  ;;  %v1521_v28 = vadd.f32 %v1520_v46, %v4307_v26  ;;  %v1634_v25 = vadd.f32 %v1633_v47, %v4309_v48 }
 0x5a1   : > { %v1772_v53 = vmul.f32 %v1708_v19, %v1517_v41  ;;  %v1774_v57 = vmul.f32 %v1710_v21, %v1630_v62  ;;  %v4334_v45 = vadd.f32 %v1522_v32, %v4311_v23  ;;  %v4337_v0 = vadd.f32 %v1635_v22, %v4313_v4 }
 0x5a2   : > { %v1773_v60 = vmul.f32 %v1709_v55, %v4318_v1  ;;  %v1775_v6 = vmul.f32 %v1711_v14, %v4321_v30  ;;  %v1712_v35 = vmul.f32 %v1521_v28, %v1521_v28  ;;  %v4341_v34 = vmul.f32 0.5, %v1521_v28 }
 0x5a3   : > { %v1900_v59 = vmul.f32 0.044715, %v1772_v53  ;;  %v1902_v61 = vmul.f32 0.044715, %v1774_v57  ;;  %v1714_v43 = vmul.f32 %v1634_v25, %v1634_v25  ;;  %v4343_v10 = vmul.f32 0.5, %v1634_v25 }
 0x5a4   : > { %v1901_v58 = vmul.f32 0.044715, %v1773_v60  ;;  %v1903_v63 = vmul.f32 0.044715, %v1775_v6  ;;  %v1776_v17 = vmul.f32 %v1712_v35, %v1521_v28  ;;  %v1713_v7 = vmul.f32 %v4334_v45, %v4334_v45  ;;  %v1526_v16 = vpop.f32.mrb[20].mxu0  ;;  %v1639_v13 = vpop.f32.mrb[20].mxu1 }
 0x5a5   : > { %v1964_v15 = vadd.f32 %v1900_v59, %v1517_v41  ;;  %v1966_v2 = vadd.f32 %v1902_v61, %v1630_v62  ;;  %v1778_v37 = vmul.f32 %v1714_v43, %v1634_v25  ;;  %v1715_v27 = vmul.f32 %v4337_v0, %v4337_v0  ;;  %v1528_v3 = vpop.f32.mrb[21].mxu0  ;;  %v1641_v52 = vpop.f32.mrb[21].mxu1 }
 0x5a6   : > { %v1965_v12 = vadd.f32 %v1901_v58, %v4318_v1  ;;  %v1967_v42 = vadd.f32 %v1903_v63, %v4321_v30  ;;  %v1904_v51 = vmul.f32 0.044715, %v1776_v17  ;;  %v1777_v46 = vmul.f32 %v1713_v7, %v4334_v45  ;;  %v1530_v47 = vpop.f32.mrb[22].mxu0  ;;  %v1643_v19 = vpop.f32.mrb[22].mxu1 }
 0x5a7   : > { %v2028_v21 = vmul.f32 0.7978846, %v1964_v15  ;;  %v2030_v32 = vmul.f32 0.7978846, %v1966_v2  ;;  %v1906_v22 = vmul.f32 0.044715, %v1778_v37  ;;  %v1779_v41 = vmul.f32 %v1715_v27, %v4337_v0 }
 0x5a8   : > { %v2029_v62 = vmul.f32 0.7978846, %v1965_v12  ;;  %v2031_v55 = vmul.f32 0.7978846, %v1967_v42  ;;  %v1968_v14 = vadd.f32 %v1904_v51, %v1521_v28  ;;  %v1905_v53 = vmul.f32 0.044715, %v1777_v46 }
 0x5a9   : > { %3412 = vtanh.f32 %v2028_v21  ;;  %v1970_v57 = vadd.f32 %v1906_v22, %v1634_v25  ;;  %v1907_v60 = vmul.f32 0.044715, %v1779_v41  ;;  %v4354_v6 = vadd.f32 %v1526_v16, %v4307_v26  ;;  %v1532_v35 = vpop.f32.mrb[23].mxu0  ;;  %v1645_v59 = vpop.f32.mrb[23].mxu1 }
 0x5aa   : > { %3414 = vtanh.f32 %v2030_v32  ;;  %v2032_v61 = vmul.f32 0.7978846, %v1968_v14  ;;  %v1969_v43 = vadd.f32 %v1905_v53, %v4334_v45  ;;  %v4358_v58 = vadd.f32 %v1639_v13, %v4309_v48 }
 0x5ab   : > { %3416 = vtanh.f32 %v2029_v62  ;;  %v2034_v63 = vmul.f32 0.7978846, %v1970_v57  ;;  %v1971_v28 = vadd.f32 %v1907_v60, %v4337_v0  ;;  %v1716_v25 = vmul.f32 %v4354_v6, %v4354_v6 }
 0x5ac   : > { %5282 = vst [vmem:[#allocation19_spill] sm:$0xff] %v4358_v58  ;;  %3418 = vtanh.f32 %v2031_v55  ;;  %v2033_v17 = vmul.f32 0.7978846, %v1969_v43  ;;  %v1718_v7 = vmul.f32 %v4358_v58, %v4358_v58  ;;  %v4366_v16 = vadd.f32 %v1528_v3, %v4311_v23  ;;  %v4368_v15 = vpop.f32.mrb[24].mxu0  ;;  %v4370_v2 = vpop.f32.mrb[24].mxu1 }
 0x5ad   : > { %3420 = vtanh.f32 %v2032_v61  ;;  %v2035_v13 = vmul.f32 0.7978846, %v1971_v28  ;;  %v1780_v37 = vmul.f32 %v1716_v25, %v4354_v6  ;;  %v4374_v27 = vadd.f32 %v1641_v52, %v4313_v4  ;;  %v4376_v12 = vpop.f32.mrb[25].mxu0  ;;  %v4378_v42 = vpop.f32.mrb[25].mxu1 }
 0x5ae   : > { %3422 = vtanh.f32 %v2034_v63  ;;  %v1782_v51 = vmul.f32 %v1718_v7, %v4358_v58  ;;  %v1717_v3 = vmul.f32 %v4366_v16, %v4366_v16  ;;  %v4384_v46 = vadd.f32 %v1530_v47, %v4307_v26  ;;  %v4386_v21 = vpop.f32.mrb[26].mxu0  ;;  %v4388_v32 = vpop.f32.mrb[26].mxu1 }
 0x5af   : > { %3424 = vtanh.f32 %v2033_v17  ;;  %v1908_v52 = vmul.f32 0.044715, %v1780_v37  ;;  %v1719_v22 = vmul.f32 %v4374_v27, %v4374_v27  ;;  %v4393_v41 = vadd.f32 %v1643_v19, %v4309_v48  ;;  %v4395_v62 = vpop.f32.mrb[27].mxu0  ;;  %v4397_v55 = vpop.f32.mrb[27].mxu1 }
 0x5b0   : > { %5283 = vst [vmem:[#allocation20_spill] sm:$0xff] %v4384_v46  ;;  %3426 = vtanh.f32 %v2035_v13  ;;  %v1910_v14 = vmul.f32 0.044715, %v1782_v51  ;;  %v1781_v47 = vmul.f32 %v1717_v3, %v4366_v16  ;;  %v1720_v53 = vmul.f32 %v4384_v46, %v4384_v46 }
 0x5b1   : > { %5284 = vst [vmem:[#allocation21_spill] sm:$0xff] %v4393_v41  ;;  %v1972_v57 = vadd.f32 %v1908_v52, %v4354_v6  ;;  %v1783_v60 = vmul.f32 %v1719_v22, %v4374_v27  ;;  %v1722_v61 = vmul.f32 %v4393_v41, %v4393_v41  ;;  %v4407_v19 = vadd.f32 %v1532_v35, %v4311_v23 }
 0x5b2   : > { %v1974_v43 = vadd.f32 %v1910_v14, %v4358_v58  ;;  %v1909_v63 = vmul.f32 0.044715, %v1781_v47  ;;  %v1784_v28 = vmul.f32 %v1720_v53, %v4384_v46  ;;  %v4412_v25 = vadd.f32 %v1645_v59, %v4313_v4 }
 0x5b3   : > { %v3413_v17 = vpop.eup %3412  ;;  %v2036_v7 = vmul.f32 0.7978846, %v1972_v57  ;;  %v1911_v13 = vmul.f32 0.044715, %v1783_v60  ;;  %v1786_v37 = vmul.f32 %v1722_v61, %v4393_v41  ;;  %v1721_v51 = vmul.f32 %v4407_v19, %v4407_v19 }
 0x5b4   : > { %v3415_v3 = vpop.eup %3414  ;;  %v2156_v52 = vadd.f32 1.0, %v3413_v17  ;;  %v2038_v35 = vmul.f32 0.7978846, %v1974_v43  ;;  %v1973_v22 = vadd.f32 %v1909_v63, %v4366_v16  ;;  %v1912_v14 = vmul.f32 0.044715, %v1784_v28  ;;  %v4418_v47 = vpop.f32.mrb[28].mxu0 }
 0x5b5   : > { %v4420_v53 = vpop.eup %3416  ;;  %v2158_v59 = vadd.f32 1.0, %v3415_v3  ;;  %3428 = vtanh.f32 %v2036_v7  ;;  %v1975_v57 = vadd.f32 %v1911_v13, %v4374_v27  ;;  %v1914_v60 = vmul.f32 0.044715, %v1786_v37  ;;  %v4423_v20 = vpop.f32.mrb[28].mxu1 }
 0x5b6   : > { %v4425_v61 = vpop.f32.mrb[29].mxu0  ;;  %v4427_v11 = vpop.eup %3418  ;;  %v4430_v43 = vmul.f32 %v2156_v52, %v4323_v50  ;;  %3430 = vtanh.f32 %v2038_v35  ;;  %v2037_v63 = vmul.f32 0.7978846, %v1973_v22  ;;  %v1976_v28 = vadd.f32 %v1912_v14, %v4384_v46 }
 0x5b7   : > { %v4433_v17 = vpop.f32.mrb[29].mxu1  ;;  %v4435_v3 = vpop.f32.mrb[30].mxu0  ;;  %v4438_v13 = vmul.f32 %v2158_v59, %v4325_v54  ;;  %v2039_v37 = vmul.f32 0.7978846, %v1975_v57  ;;  %v1978_v40 = vadd.f32 %v1914_v60, %v4393_v41  ;;  %v1785_v39 = vmul.f32 %v1721_v51, %v4407_v19 }
 0x5b8   : > { %v3421_v7 = vpop.eup %3420  ;;  %v4442_v38 = vpop.f32.mrb[30].mxu1  ;;  %3432 = vtanh.f32 %v2037_v63  ;;  %v2040_v22 = vmul.f32 0.7978846, %v1976_v28  ;;  %v1723_v14 = vmul.f32 %v4412_v25, %v4412_v25  ;;  %v4460_v28 = vadd.f32 %v4368_v15, %v4307_v26 }
 0x5b9   : > { %v4444_v50 = vpop.f32.mrb[31].mxu0  ;;  %v3423_v52 = vpop.eup %3422  ;;  %v2160_v35 = vadd.f32 1.0, %v3421_v7  ;;  %3434 = vtanh.f32 %v2039_v37  ;;  %v2042_v57 = vmul.f32 0.7978846, %v1978_v40  ;;  %v1913_v60 = vmul.f32 0.044715, %v1785_v39 }
 0x5ba   : > { %v4448_v31 = vpop.f32.mrb[31].mxu1  ;;  %v4450_v54 = vpop.eup %3424  ;;  %v2162_v59 = vadd.f32 1.0, %v3423_v52  ;;  %3436 = vtanh.f32 %v2040_v22  ;;  %v1787_v63 = vmul.f32 %v1723_v14, %v4412_v25  ;;  %5285 = vst [vmem:[#allocation22_spill] sm:$0xff] %v4460_v28  ;;  %v4468_v39 = vadd.f32 %v4370_v2, %v4309_v48 }
 0x5bb   : > { %v4452_v51 = vpop.eup %3426  ;;  %v4455_v33 = vmul.f32 %v2160_v35, %v4341_v34  ;;  %3438 = vtanh.f32 %v2042_v57  ;;  %v1977_v37 = vadd.f32 %v1913_v60, %v4407_v19  ;;  %v1724_v34 = vmul.f32 %v4460_v28, %v4460_v28 }
 0x5bc   : > { %v4463_v7 = vmul.f32 %v2162_v59, %v4343_v10  ;;  %5286 = vst [vmem:[#allocation23_spill] sm:$0xff] %v4468_v39  ;;  %v1915_v40 = vmul.f32 0.044715, %v1787_v63  ;;  %v4474_v52 = vadd.f32 %v4376_v12, %v4311_v23  ;;  %v4478_v15 = vadd.f32 %v4378_v42, %v4313_v4  ;;  %v4480_v10 = vpop.f32.mrb[32].mxu0  ;;  %v4482_v35 = vpop.f32.mrb[32].mxu1 }
 0x5bd   : > { %v2041_v22 = vmul.f32 0.7978846, %v1977_v37  ;;  %v1726_v2 = vmul.f32 %v4468_v39, %v4468_v39  ;;  %v4488_v14 = vadd.f32 %v4386_v21, %v4307_v26  ;;  %v4492_v12 = vadd.f32 %v4388_v32, %v4309_v48  ;;  %v4494_v59 = vpop.f32.mrb[33].mxu0  ;;  %v4496_v42 = vpop.f32.mrb[33].mxu1 }
 0x5be   : > { %5287 = vst [vmem:[#allocation24_spill] sm:$0xff] %v4474_v52  ;;  %5288 = vst [vmem:[#allocation25_spill] sm:$0xff] %v4478_v15  ;;  %v1979_v57 = vadd.f32 %v1915_v40, %v4412_v25  ;;  %v1788_v60 = vmul.f32 %v1724_v34, %v4460_v28  ;;  %v1725_v63 = vmul.f32 %v4474_v52, %v4474_v52  ;;  %v4504_v21 = vpop.f32.mrb[34].mxu0  ;;  %v4506_v29 = vpop.f32.mrb[34].mxu1 }
 0x5bf   : > { %5289 = vst [vmem:[#allocation26_spill] sm:$0xff] %v4488_v14  ;;  %5290 = vst [vmem:[#allocation27_spill] sm:$0xff] %v4492_v12  ;;  %v1727_v37 = vmul.f32 %v4478_v15, %v4478_v15  ;;  %v4508_v32 = vpop.eup %3428  ;;  %3440 = vtanh.f32 %v2041_v22  ;;  %v1790_v24 = vmul.f32 %v1726_v2, %v4468_v39  ;;  %v1728_v40 = vmul.f32 %v4488_v14, %v4488_v14  ;;  %v4515_v36 = vpop.f32.mrb[35].mxu0 }
 0x5c0   : > { %5291 = vst [vmem:[#allocation28_spill] sm:$0xff] %v4508_v32  ;;  %v1730_v34 = vmul.f32 %v4492_v12, %v4492_v12  ;;  %v4517_v18 = vpop.f32.mrb[35].mxu1  ;;  %v4519_v44 = vpop.eup %3430  ;;  %v2043_v9 = vmul.f32 0.7978846, %v1979_v57  ;;  %v1916_v5 = vmul.f32 0.044715, %v1788_v60  ;;  %v1789_v8 = vmul.f32 %v1725_v63, %v4474_v52 }
 0x5c1   : > { %5292 = vst [vmem:[#allocation29_spill] sm:$0xff] %v4519_v44  ;;  %v1791_v22 = vmul.f32 %v1727_v37, %v4478_v15  ;;  %v1918_v56 = vmul.f32 0.044715, %v1790_v24  ;;  %v1792_v2 = vmul.f32 %v1728_v40, %v4488_v14  ;;  %v4527_v41 = vadd.f32 %v4395_v62, %v4311_v23 }
 0x5c2   : > { %v1794_v49 = vmul.f32 %v1730_v34, %v4492_v12  ;;  %v4529_v58 = vpop.eup %3432  ;;  %3442 = vtanh.f32 %v2043_v9  ;;  %v1980_v44 = vadd.f32 %v1916_v5, %v4460_v28  ;;  %v1917_v57 = vmul.f32 0.044715, %v1789_v8 }
 0x5c3   : > { %5293 = vst [vmem:[#allocation30_spill] sm:$0xff] %v4527_v41  ;;  %v1919_v60 = vmul.f32 0.044715, %v1791_v22  ;;  %v4532_v32 = vpop.eup %3434  ;;  %v1982_v63 = vadd.f32 %v1918_v56, %v4468_v39  ;;  %v1920_v24 = vmul.f32 0.044715, %v1792_v2  ;;  %v1729_v40 = vmul.f32 %v4527_v41, %v4527_v41 }
 0x5c4   : > { %v1922_v37 = vmul.f32 0.044715, %v1794_v49  ;;  %v4537_v34 = vpop.eup %3436  ;;  %v2044_v62 = vmul.f32 0.7978846, %v1980_v44  ;;  %v1981_v46 = vadd.f32 %v1917_v57, %v4474_v52  ;;  %v4543_v8 = vadd.f32 %v4397_v55, %v4313_v4  ;;  %v4545_v5 = vpop.f32.mrb[36].mxu0 }
 0x5c5   : > { %5294 = vst [vmem:[#allocation31_spill] sm:$0xff] %v4537_v34  ;;  %v1983_v9 = vadd.f32 %v1919_v60, %v4478_v15  ;;  %v4547_v22 = vpop.f32.mrb[36].mxu1  ;;  %v4549_v56 = vpop.eup %3438  ;;  %v2046_v49 = vmul.f32 0.7978846, %v1982_v63  ;;  %v1984_v2 = vadd.f32 %v1920_v24, %v4488_v14  ;;  %v1793_v44 = vmul.f32 %v1729_v40, %v4527_v41 }
 0x5c6   : > { %5295 = vst [vmem:[#allocation32_spill] sm:$0xff] %v4543_v8  ;;  %5296 = vst [vmem:[#allocation33_spill] sm:$0xff] %v4549_v56  ;;  %v1986_v39 = vadd.f32 %v1922_v37, %v4492_v12  ;;  %v4554_v57 = vpop.f32.mrb[37].mxu0  ;;  %v4556_v60 = vpop.f32.mrb[37].mxu1  ;;  %3444 = vtanh.f32 %v2044_v62  ;;  %v2045_v55 = vmul.f32 0.7978846, %v1981_v46  ;;  %v1731_v15 = vmul.f32 %v4543_v8, %v4543_v8 }
 0x5c7   : > { %v2047_v28 = vmul.f32 0.7978846, %v1983_v9  ;;  %v4560_v52 = vpop.f32.mrb[38].mxu0  ;;  %v4562_v56 = vpop.f32.mrb[38].mxu1  ;;  %3446 = vtanh.f32 %v2046_v49  ;;  %v2048_v63 = vmul.f32 0.7978846, %v1984_v2  ;;  %v4567_v12 = vadd.f32 %v4418_v47, %v4307_v26 }
 0x5c8   : > { %v2050_v24 = vmul.f32 0.7978846, %v1986_v39  ;;  %v1921_v37 = vmul.f32 0.044715, %v1793_v44  ;;  %3448 = vtanh.f32 %v2045_v55  ;;  %v1795_v40 = vmul.f32 %v1731_v15, %v4543_v8  ;;  %v4573_v62 = vpop.f32.mrb[39].mxu0  ;;  %v4575_v9 = vpop.f32.mrb[39].mxu1 }
 0x5c9   : > { %5297 = vst [vmem:[#allocation34_spill] sm:$0xff] %v4567_v12  ;;  %v4571_v46 = vadd.f32 %v4423_v20, %v4309_v48  ;;  %5299 = vst [vmem:[#allocation36_spill] sm:$0xff] %v4573_v62  ;;  %v4577_v14 = vpop.eup %3440  ;;  %3450 = vtanh.f32 %v2047_v28  ;;  %v4582_v15 = vadd.f32 %v4425_v61, %v4311_v23  ;;  %v4586_v47 = vadd.f32 %v4433_v17, %v4313_v4 }
 0x5ca   : > { %5300 = vst [vmem:[#allocation37_spill] sm:$0xff] %v4575_v9  ;;  %v1985_v39 = vadd.f32 %v1921_v37, %v4527_v41  ;;  %3452 = vtanh.f32 %v2048_v63  ;;  %v1923_v20 = vmul.f32 0.044715, %v1795_v40  ;;  %v1732_v49 = vmul.f32 %v4567_v12, %v4567_v12 }
 0x5cb   : > { %5298 = vst [vmem:[#allocation35_spill] sm:$0xff] %v4571_v46  ;;  %5301 = vst [vmem:[#allocation38_spill] sm:$0xff] %v4582_v15  ;;  %v1734_v2 = vmul.f32 %v4571_v46, %v4571_v46  ;;  %3454 = vtanh.f32 %v2050_v24  ;;  %v1733_v44 = vmul.f32 %v4582_v15, %v4582_v15  ;;  %v1735_v61 = vmul.f32 %v4586_v47, %v4586_v47 }
 0x5cc   : > { %5302 = vst [vmem:[#allocation39_spill] sm:$0xff] %v4586_v47  ;;  %v2049_v28 = vmul.f32 0.7978846, %v1985_v39  ;;  %v4596_v55 = vpop.eup %3442  ;;  %v1987_v17 = vadd.f32 %v1923_v20, %v4543_v8  ;;  %v1796_v63 = vmul.f32 %v1732_v49, %v4567_v12  ;;  %v4603_v40 = vadd.f32 %v4435_v3, %v4307_v26  ;;  %v4605_v24 = vpop.f32.mrb[40].mxu0 }
 0x5cd   : > { %v1798_v37 = vmul.f32 %v1734_v2, %v4571_v46  ;;  %5304 = vst [vmem:[#allocation41_spill] sm:$0xff] %v4605_v24  ;;  %v4607_v39 = vpop.f32.mrb[40].mxu1  ;;  %v1797_v41 = vmul.f32 %v1733_v44, %v4582_v15  ;;  %v1799_v9 = vmul.f32 %v1735_v61, %v4586_v47  ;;  %v4613_v20 = vadd.f32 %v4442_v38, %v4309_v48  ;;  %v4615_v49 = vpop.f32.mrb[41].mxu0 }
 0x5ce   : > { %5303 = vst [vmem:[#allocation40_spill] sm:$0xff] %v4603_v40  ;;  %5305 = vst [vmem:[#allocation42_spill] sm:$0xff] %v4607_v39  ;;  %3456 = vtanh.f32 %v2049_v28  ;;  %v4617_v2 = vpop.f32.mrb[41].mxu1  ;;  %v2051_v8 = vmul.f32 0.7978846, %v1987_v17  ;;  %v1736_v24 = vmul.f32 %v4603_v40, %v4603_v40  ;;  %v4625_v61 = vadd.f32 %v4444_v50, %v4311_v23  ;;  %v4627_v38 = vpop.f32.mrb[42].mxu0 }
 0x5cf   : > { %5306 = vst [vmem:[#allocation43_spill] sm:$0xff] %v4613_v20  ;;  %5307 = vst [vmem:[#allocation44_spill] sm:$0xff] %v4615_v49  ;;  %v1924_v3 = vmul.f32 0.044715, %v1796_v63  ;;  %v1926_v62 = vmul.f32 0.044715, %v1798_v37  ;;  %v1738_v44 = vmul.f32 %v4613_v20, %v4613_v20 }
 0x5d0   : > { %5308 = vst [vmem:[#allocation45_spill] sm:$0xff] %v4617_v2  ;;  %v1925_v39 = vmul.f32 0.044715, %v1797_v41  ;;  %v1927_v28 = vmul.f32 0.044715, %v1799_v9  ;;  %5309 = vst [vmem:[#allocation46_spill] sm:$0xff] %v4625_v61  ;;  %v4631_v2 = vpop.eup %3444  ;;  %3458 = vtanh.f32 %v2051_v8  ;;  %v1800_v41 = vmul.f32 %v1736_v24, %v4603_v40 }
 0x5d1   : > { %5310 = vst [vmem:[#allocation47_spill] sm:$0xff] %v4627_v38  ;;  %v4629_v49 = vpop.f32.mrb[42].mxu1  ;;  %v1988_v17 = vadd.f32 %v1924_v3, %v4567_v12  ;;  %v1990_v63 = vadd.f32 %v1926_v62, %v4571_v46  ;;  %v4636_v9 = vpop.f32.mrb[43].mxu0  ;;  %v1737_v8 = vmul.f32 %v4625_v61, %v4625_v61  ;;  %v4651_v12 = vadd.f32 %v4448_v31, %v4313_v4 }
 0x5d2   : > { %5311 = vst [vmem:[#allocation48_spill] sm:$0xff] %v4629_v49  ;;  %5312 = vst [vmem:[#allocation49_spill] sm:$0xff] %v4636_v9  ;;  %v4638_v37 = vpop.f32.mrb[43].mxu1  ;;  %v4640_v34 = vpop.eup %3446  ;;  %v1989_v50 = vadd.f32 %v1925_v39, %v4582_v15  ;;  %v1991_v38 = vadd.f32 %v1927_v28, %v4586_v47  ;;  %v1802_v49 = vmul.f32 %v1738_v44, %v4613_v20  ;;  %v1928_v24 = vmul.f32 0.044715, %v1800_v41 }
 0x5d3   : > { %5313 = vst [vmem:[#allocation50_spill] sm:$0xff] %v4638_v37  ;;  %v4647_v3 = vpop.eup %3448  ;;  %v2052_v62 = vmul.f32 0.7978846, %v1988_v17  ;;  %v2054_v46 = vmul.f32 0.7978846, %v1990_v63  ;;  %5314 = vst [vmem:[#allocation51_spill] sm:$0xff] %v4651_v12  ;;  %v1801_v28 = vmul.f32 %v1737_v8, %v4625_v61  ;;  %v1739_v17 = vmul.f32 %v4651_v12, %v4651_v12 }
 0x5d4   : > { %v4653_v37 = vpop.eup %3450  ;;  %v2053_v9 = vmul.f32 0.7978846, %v1989_v50  ;;  %v2055_v39 = vmul.f32 0.7978846, %v1991_v38  ;;  %v1930_v15 = vmul.f32 0.044715, %v1802_v49  ;;  %v1992_v47 = vadd.f32 %v1928_v24, %v4603_v40 }
 0x5d5   : > { %v4656_v44 = vpop.eup %3452  ;;  %3460 = vtanh.f32 %v2052_v62  ;;  %v4663_v63 = vadd.f32 %v4480_v10, %v4307_v26  ;;  %v4665_v31 = vpop.f32.mrb[44].mxu0  ;;  %v1929_v50 = vmul.f32 0.044715, %v1801_v28  ;;  %v4674_v8 = vadd.f32 %v4482_v35, %v4309_v48 }
 0x5d6   : > { %5316 = vst [vmem:[#allocation53_spill] sm:$0xff] %v4665_v31  ;;  %v4667_v41 = vpop.f32.mrb[44].mxu1  ;;  %v4669_v38 = vpop.eup %3454  ;;  %3462 = vtanh.f32 %v2054_v46  ;;  %v1994_v49 = vadd.f32 %v1930_v15, %v4613_v20  ;;  %v2056_v10 = vmul.f32 0.7978846, %v1992_v47  ;;  %v1803_v40 = vmul.f32 %v1739_v17, %v4651_v12 }
 0x5d7   : > { %5315 = vst [vmem:[#allocation52_spill] sm:$0xff] %v4663_v63  ;;  %5317 = vst [vmem:[#allocation54_spill] sm:$0xff] %v4667_v41  ;;  %v4676_v62 = vpop.f32.mrb[45].mxu0  ;;  %v4678_v24 = vpop.f32.mrb[45].mxu1  ;;  %3464 = vtanh.f32 %v2053_v9  ;;  %v1740_v41 = vmul.f32 %v4663_v63, %v4663_v63  ;;  %v1993_v28 = vadd.f32 %v1929_v50, %v4625_v61  ;;  %v1742_v20 = vmul.f32 %v4674_v8, %v4674_v8 }
 0x5d8   : > { %5318 = vst [vmem:[#allocation55_spill] sm:$0xff] %v4676_v62  ;;  %5319 = vst [vmem:[#allocation56_spill] sm:$0xff] %v4678_v24  ;;  %v4683_v31 = vpop.f32.mrb[46].mxu0  ;;  %v4685_v46 = vpop.f32.mrb[46].mxu1  ;;  %3466 = vtanh.f32 %v2055_v39  ;;  %v2058_v35 = vmul.f32 0.7978846, %v1994_v49  ;;  %v4704_v50 = vadd.f32 %v4496_v42, %v4313_v4 }
 0x5d9   : > { %5320 = vst [vmem:[#allocation57_spill] sm:$0xff] %v4683_v31  ;;  %5321 = vst [vmem:[#allocation58_spill] sm:$0xff] %v4685_v46  ;;  %v4687_v15 = vpop.eup %3456  ;;  %v4692_v9 = vpop.f32.mrb[47].mxu0  ;;  %3468 = vtanh.f32 %v2056_v10  ;;  %v1931_v17 = vmul.f32 0.044715, %v1803_v40  ;;  %v1804_v24 = vmul.f32 %v1740_v41, %v4663_v63  ;;  %v4699_v46 = vadd.f32 %v4494_v59, %v4311_v23 }
 0x5da   : > { %5322 = vst [vmem:[#allocation59_spill] sm:$0xff] %v4692_v9  ;;  %v4694_v47 = vpop.f32.mrb[47].mxu1  ;;  %3470 = vtanh.f32 %v2058_v35  ;;  %v2057_v39 = vmul.f32 0.7978846, %v1993_v28  ;;  %v1806_v49 = vmul.f32 %v1742_v20, %v4674_v8  ;;  %v4706_v31 = vpop.eup %3458  ;;  %v1837_v41 = vmul.f32 0.5, %v4318_v1 }
 0x5db   : > { %5323 = vst [vmem:[#allocation60_spill] sm:$0xff] %v4694_v47  ;;  %v1995_v47 = vadd.f32 %v1931_v17, %v4651_v12  ;;  %v1932_v10 = vmul.f32 0.044715, %v1804_v24  ;;  %v1741_v40 = vmul.f32 %v4699_v46, %v4699_v46  ;;  %v1743_v35 = vmul.f32 %v4704_v50, %v4704_v50 }
 0x5dc   : > { %3472 = vtanh.f32 %v2057_v39  ;;  %v1934_v59 = vmul.f32 0.044715, %v1806_v49  ;;  %v1841_v20 = vmul.f32 0.5, %v4334_v45  ;;  %v2157_v17 = vadd.f32 1.0, %v4420_v53 }
 0x5dd   : > { %v2059_v28 = vmul.f32 0.7978846, %v1995_v47  ;;  %v1996_v42 = vadd.f32 %v1932_v10, %v4663_v63  ;;  %v1805_v9 = vmul.f32 %v1741_v40, %v4699_v46  ;;  %v1807_v12 = vmul.f32 %v1743_v35, %v4704_v50 }
 0x5de   : > { %v1998_v24 = vadd.f32 %v1934_v59, %v4674_v8  ;;  %v2161_v1 = vadd.f32 1.0, %v4450_v54  ;;  %v1839_v39 = vmul.f32 0.5, %v4321_v30  ;;  %v2221_v47 = vmul.f32 %v2157_v17, %v1837_v41 }
 0x5df   : > { %v4722_v49 = vpop.eup %3460  ;;  %3474 = vtanh.f32 %v2059_v28  ;;  %v2060_v61 = vmul.f32 0.7978846, %v1996_v42  ;;  %v1933_v45 = vmul.f32 0.044715, %v1805_v9  ;;  %v1935_v40 = vmul.f32 0.044715, %v1807_v12 }
 0x5e0   : > { %v4724_v62 = vpop.eup %3462  ;;  %v2062_v10 = vmul.f32 0.7978846, %v1998_v24  ;;  %v2225_v63 = vmul.f32 %v2161_v1, %v1841_v20  ;;  %v1843_v53 = vmul.f32 0.5, %v4337_v0  ;;  %v2159_v30 = vadd.f32 1.0, %v4427_v11 }
 0x5e1   : > { %v4727_v59 = vpop.eup %3464  ;;  %3476 = vtanh.f32 %v2060_v61  ;;  %v1997_v54 = vadd.f32 %v1933_v45, %v4699_v46  ;;  %v2163_v35 = vadd.f32 1.0, %v4452_v51  ;;  %v1999_v9 = vadd.f32 %v1935_v40, %v4704_v50 }
 0x5e2   : > { %v4732_v28 = vpop.eup %3466  ;;  %3478 = vtanh.f32 %v2062_v10  ;;  %v2285_v41 = vpack.c.bf16 %v2225_v63, %v2221_v47  ;;  %v4737_v12 = vadd.f32 %v4504_v21, %v4307_v26  ;;  %v2223_v61 = vmul.f32 %v2159_v30, %v1839_v39 }
 0x5e3   : > { %v4739_v0 = vpop.eup %3468  ;;  %v2061_v20 = vmul.f32 0.7978846, %v1997_v54  ;;  %v2227_v42 = vmul.f32 %v2163_v35, %v1843_v53  ;;  %v4743_v11 = vadd.f32 %v4506_v29, %v4309_v48  ;;  %v2063_v17 = vmul.f32 0.7978846, %v1999_v9 }
 0x5e4   : > { %v4745_v51 = vpop.eup %3470  ;;  %2608 = vmatprep.mubr.bf16.mxu0 %v2285_v41  ;;  %v1744_v63 = vmul.f32 %v4737_v12, %v4737_v12  ;;  %v2284_v21 = vpack.c.bf16 %v4455_v33, %v4430_v43  ;;  %v2286_v24 = vpack.c.bf16 %v4463_v7, %v4438_v13  ;;  %v4757_v29 = vadd.f32 %v4515_v36, %v4311_v23 }
 0x5e5   : > { %5324 = vst [vmem:[#allocation61_spill] sm:$0xff] %v4743_v11  ;;  %3480 = vtanh.f32 %v2061_v20  ;;  %v2287_v1 = vpack.c.bf16 %v2227_v42, %v2223_v61  ;;  %v1746_v39 = vmul.f32 %v4743_v11, %v4743_v11  ;;  %v4764_v33 = vadd.f32 %v4517_v18, %v4313_v4 }
 0x5e6   : > { %v4759_v45 = vpop.eup %3472  ;;  %3482 = vtanh.f32 %v2063_v17  ;;  %v1808_v47 = vmul.f32 %v1744_v63, %v4737_v12  ;;  %2609 = vmatmul.mubr.bf16.vlgmr.msra.gmra.mrb[48].mxu0 %v2284_v21  ;;  %v4768_v43 = vadd.f32 %v4545_v5, %v4307_v26  ;;  %v1745_v36 = vmul.f32 %v4757_v29, %v4757_v29 }
 0x5e7   : > { %2705 = vmatprep.mubr.bf16.mxu1 %v2287_v1  ;;  %v1810_v13 = vmul.f32 %v1746_v39, %v4743_v11  ;;  %v4775_v7 = vadd.f32 %v4547_v22, %v4309_v48  ;;  %v4779_v10 = vadd.f32 %v4554_v57, %v4311_v23  ;;  %v1747_v5 = vmul.f32 %v4764_v33, %v4764_v33 }
 0x5e8   : > { %5325 = vst [vmem:[#allocation62_spill] sm:$0xff] %v4768_v43  ;;  %v1936_v18 = vmul.f32 0.044715, %v1808_v47  ;;  %2706 = vmatmul.mubr.bf16.vlgmr.msra.gmra.mrb[48].mxu1 %v2286_v24  ;;  %v1748_v40 = vmul.f32 %v4768_v43, %v4768_v43  ;;  %v4787_v53 = vadd.f32 %v4556_v60, %v4313_v4  ;;  %v1809_v30 = vmul.f32 %v1745_v36, %v4757_v29 }
 0x5e9   : > { %5326 = vst [vmem:[#allocation63_spill] sm:$0xff] %v4775_v7  ;;  %v4789_v54 = vpop.eup %3474  ;;  %v1938_v22 = vmul.f32 0.044715, %v1810_v13  ;;  %v1750_v57 = vmul.f32 %v4775_v7, %v4775_v7  ;;  %v1749_v35 = vmul.f32 %v4779_v10, %v4779_v10  ;;  %v1811_v41 = vmul.f32 %v1747_v5, %v4764_v33 }
 0x5ea   : > { %v2000_v9 = vadd.f32 %v1936_v18, %v4737_v12  ;;  %v1812_v20 = vmul.f32 %v1748_v40, %v4768_v43  ;;  %v1751_v60 = vmul.f32 %v4787_v53, %v4787_v53  ;;  %v1937_v17 = vmul.f32 0.044715, %v1809_v30 }
 0x5eb   : > { %v4801_v61 = vpop.eup %3476  ;;  %v2002_v42 = vadd.f32 %v1938_v22, %v4743_v11  ;;  %v1814_v63 = vmul.f32 %v1750_v57, %v4775_v7  ;;  %v1813_v21 = vmul.f32 %v1749_v35, %v4779_v10  ;;  %v1939_v39 = vmul.f32 0.044715, %v1811_v41 }
 0x5ec   : > { %v4806_v24 = vpop.eup %3478  ;;  %v2064_v1 = vmul.f32 0.7978846, %v2000_v9  ;;  %v1940_v47 = vmul.f32 0.044715, %v1812_v20  ;;  %v1815_v13 = vmul.f32 %v1751_v60, %v4787_v53  ;;  %v2001_v18 = vadd.f32 %v1937_v17, %v4757_v29 }
 0x5ed   : > { %v2066_v36 = vmul.f32 0.7978846, %v2002_v42  ;;  %v1942_v5 = vmul.f32 0.044715, %v1814_v63  ;;  %v1941_v40 = vmul.f32 0.044715, %v1813_v21  ;;  %v2003_v22 = vadd.f32 %v1939_v39, %v4764_v33 }
 0x5ee   : > { %3484 = vtanh.f32 %v2064_v1  ;;  %v2004_v30 = vadd.f32 %v1940_v47, %v4768_v43  ;;  %v1943_v57 = vmul.f32 0.044715, %v1815_v13  ;;  %v2065_v35 = vmul.f32 0.7978846, %v2001_v18 }
 0x5ef   : > { %v4812_v11 = vpop.eup %3480  ;;  %3486 = vtanh.f32 %v2066_v36  ;;  %v2006_v9 = vadd.f32 %v1942_v5, %v4775_v7  ;;  %v2005_v41 = vadd.f32 %v1941_v40, %v4779_v10  ;;  %v2067_v60 = vmul.f32 0.7978846, %v2003_v22 }
 0x5f0   : > { %v4816_v20 = vpop.eup %3482  ;;  %v2068_v42 = vmul.f32 0.7978846, %v2004_v30  ;;  %v2007_v17 = vadd.f32 %v1943_v57, %v4787_v53  ;;  %v1845_v63 = vmul.f32 0.5, %v4366_v16  ;;  %3488 = vtanh.f32 %v2065_v35  ;;  %v5329_v35 = vld [vmem:[#allocation20_spill] sm:$0xff] }
 0x5f1   : > { %v2070_v21 = vmul.f32 0.7978846, %v2006_v9  ;;  %v2069_v1 = vmul.f32 0.7978846, %v2005_v41  ;;  %v1849_v39 = vmul.f32 0.5, %v4407_v19  ;;  %3490 = vtanh.f32 %v2067_v60  ;;  %v5330_v41 = vld [vmem:[#allocation28_spill] sm:$0xff] }
 0x5f2   : > { %v2071_v47 = vmul.f32 0.7978846, %v2007_v17  ;;  %v2165_v13 = vadd.f32 1.0, %v4529_v58  ;;  %v2169_v36 = vadd.f32 1.0, %v4577_v14  ;;  %3492 = vtanh.f32 %v2068_v42  ;;  %v5331_v42 = vld [vmem:[#allocation31_spill] sm:$0xff] }
 0x5f3   : > { %v1847_v18 = vmul.f32 0.5, %v4374_v27  ;;  %v1851_v5 = vmul.f32 0.5, %v4412_v25  ;;  %v2167_v40 = vadd.f32 1.0, %v4532_v32  ;;  %3494 = vtanh.f32 %v2070_v21 }
 0x5f4   : > { %v2229_v16 = vmul.f32 %v2165_v13, %v1845_v63  ;;  %v2233_v22 = vmul.f32 %v2169_v36, %v1849_v39  ;;  %v2171_v30 = vadd.f32 1.0, %v4596_v55  ;;  %3496 = vtanh.f32 %v2069_v1  ;;  %v5332_v63 = vld [vmem:[#allocation19_spill] sm:$0xff]  ;;  %v5333_v1 = vld [vmem:[#allocation21_spill] sm:$0xff] }
 0x5f5   : > { %v2231_v19 = vmul.f32 %v2167_v40, %v1847_v18  ;;  %v4829_v57 = vadd.f32 %v4560_v52, %v4307_v26  ;;  %v4833_v58 = vadd.f32 %v4562_v56, %v4309_v48  ;;  %3498 = vtanh.f32 %v2071_v47  ;;  %v5334_v18 = vld [vmem:[#allocation29_spill] sm:$0xff] }
 0x5f6   : > { %v2289_v27 = vpack.c.bf16 %v2233_v22, %v2229_v16  ;;  %v2235_v25 = vmul.f32 %v2171_v30, %v1851_v5  ;;  %v1844_v14 = vmul.f32 0.5, %v4354_v6  ;;  %v1848_v9 = vmul.f32 0.5, %v5329_v35  ;;  %v5335_v16 = vld [vmem:[#allocation33_spill] sm:$0xff]  ;;  %v5336_v30 = vld [vmem:[#allocation36_spill] sm:$0xff] }
 0x5f7   : > { %5327 = vst [vmem:[#allocation64_spill] sm:$0xff] %v4829_v57  ;;  %5328 = vst [vmem:[#allocation65_spill] sm:$0xff] %v4833_v58  ;;  %v1752_v32 = vmul.f32 %v4829_v57, %v4829_v57  ;;  %v1754_v55 = vmul.f32 %v4833_v58, %v4833_v58  ;;  %v2164_v52 = vadd.f32 1.0, %v5330_v41  ;;  %v2168_v17 = vadd.f32 1.0, %v5331_v42 }
 0x5f8   : > { %v4842_v60 = vpop.eup %3484  ;;  %2616 = vmatprep.mubr.bf16.mxu0 %v2289_v27  ;;  %v2291_v56 = vpack.c.bf16 %v2235_v25, %v2231_v19  ;;  %v1846_v21 = vmul.f32 0.5, %v5332_v63  ;;  %v1850_v6 = vmul.f32 0.5, %v5333_v1  ;;  %v2166_v5 = vadd.f32 1.0, %v5334_v18  ;;  %v5337_v27 = vld [vmem:[#allocation37_spill] sm:$0xff]  ;;  %v5341_v18 = vld [vmem:[#allocation42_spill] sm:$0xff] }
 0x5f9   : > { %v4847_v39 = vpop.eup %3486  ;;  %v1816_v47 = vmul.f32 %v1752_v32, %v4829_v57  ;;  %v1818_v13 = vmul.f32 %v1754_v55, %v4833_v58  ;;  %v2228_v36 = vmul.f32 %v2164_v52, %v1844_v14  ;;  %v2232_v40 = vmul.f32 %v2168_v17, %v1848_v9  ;;  %v5338_v14 = vld [vmem:[#allocation41_spill] sm:$0xff] }
 0x5fa   : > { %2713 = vmatprep.mubr.bf16.mxu1 %v2291_v56  ;;  %v2170_v22 = vadd.f32 1.0, %v5335_v16  ;;  %v4855_v19 = vadd.f32 %v5336_v30, %v4311_v23  ;;  %v4859_v25 = vadd.f32 %v5337_v27, %v4313_v4  ;;  %v4861_v35 = vpop.eup %3488  ;;  %v2230_v55 = vmul.f32 %v2166_v5, %v1846_v21 }
 0x5fb   : > { %v1944_v32 = vmul.f32 0.044715, %v1816_v47  ;;  %v1946_v41 = vmul.f32 0.044715, %v1818_v13  ;;  %v4865_v52 = vadd.f32 %v5338_v14, %v4307_v26  ;;  %v4867_v9 = vpop.eup %3490  ;;  %v2288_v56 = vpack.c.bf16 %v2232_v40, %v2228_v36 }
 0x5fc   : > { %v2234_v42 = vmul.f32 %v2170_v22, %v1850_v6  ;;  %v1753_v17 = vmul.f32 %v4855_v19, %v4855_v19  ;;  %v1755_v63 = vmul.f32 %v4859_v25, %v4859_v25  ;;  %v4873_v1 = vpop.eup %3492  ;;  %v4881_v5 = vadd.f32 %v5341_v18, %v4309_v48  ;;  %v5344_v22 = vld [vmem:[#allocation44_spill] sm:$0xff] }
 0x5fd   : > { %5339 = vst [vmem:[#allocation20_spill] sm:$0xff] %v4865_v52  ;;  %5340 = vst [vmem:[#allocation28_spill] sm:$0xff] %v4873_v1  ;;  %v2008_v47 = vadd.f32 %v1944_v32, %v4829_v57  ;;  %v2010_v21 = vadd.f32 %v1946_v41, %v4833_v58  ;;  %v1756_v13 = vmul.f32 %v4865_v52, %v4865_v52  ;;  %v4883_v6 = vpop.eup %3494  ;;  %2617 = vmatmul.mubr.bf16.gmra.mrb[52].mxu0 %v2288_v56  ;;  %v5349_v1 = vld [vmem:[#allocation30_spill] sm:$0xff] }
 0x5fe   : > { %5342 = vst [vmem:[#allocation31_spill] sm:$0xff] %v4881_v5  ;;  %5343 = vst [vmem:[#allocation19_spill] sm:$0xff] %v4883_v6  ;;  %v2290_v36 = vpack.c.bf16 %v2234_v42, %v2230_v55  ;;  %v1817_v40 = vmul.f32 %v1753_v17, %v4855_v19  ;;  %v1819_v16 = vmul.f32 %v1755_v63, %v4859_v25  ;;  %v4891_v27 = vpop.eup %3496  ;;  %v5346_v17 = vld [vmem:[#allocation45_spill] sm:$0xff] }
 0x5ff   : > { %v4889_v30 = vadd.f32 %v5344_v22, %v4311_v23  ;;  %v2072_v32 = vmul.f32 0.7978846, %v2008_v47  ;;  %v2074_v41 = vmul.f32 0.7978846, %v2010_v21  ;;  %v1820_v14 = vmul.f32 %v1756_v13, %v4865_v52  ;;  %v4896_v6 = vpop.eup %3498  ;;  %v5348_v13 = vld [vmem:[#allocation24_spill] sm:$0xff] }
 0x600   : > { %v1758_v18 = vmul.f32 %v4881_v5, %v4881_v5  ;;  %5345 = vst [vmem:[#allocation21_spill] sm:$0xff] %v4896_v6  ;;  %2714 = vmatmul.mubr.bf16.gmra.mrb[52].mxu1 %v2290_v36  ;;  %v1945_v55 = vmul.f32 0.044715, %v1817_v40  ;;  %v1947_v56 = vmul.f32 0.044715, %v1819_v16  ;;  %v4902_v63 = vadd.f32 %v5346_v17, %v4313_v4  ;;  %v5353_v6 = vld [vmem:[#allocation32_spill] sm:$0xff] }
 0x601   : > { %v1757_v42 = vmul.f32 %v4889_v30, %v4889_v30  ;;  %3500 = vtanh.f32 %v2072_v32  ;;  %v1948_v47 = vmul.f32 0.044715, %v1820_v14  ;;  %v1853_v22 = vmul.f32 0.5, %v5348_v13  ;;  %v5350_v13 = vld [vmem:[#allocation47_spill] sm:$0xff] }
 0x602   : > { %5347 = vst [vmem:[#allocation29_spill] sm:$0xff] %v4902_v63  ;;  %v1822_v21 = vmul.f32 %v1758_v18, %v4881_v5  ;;  %3502 = vtanh.f32 %v2074_v41  ;;  %v2009_v58 = vadd.f32 %v1945_v55, %v4855_v19  ;;  %v2011_v36 = vadd.f32 %v1947_v56, %v4859_v25 }
 0x603   : > { %v1821_v40 = vmul.f32 %v1757_v42, %v4889_v30  ;;  %v2012_v16 = vadd.f32 %v1948_v47, %v4865_v52  ;;  %v1759_v17 = vmul.f32 %v4902_v63, %v4902_v63  ;;  %v1857_v32 = vmul.f32 0.5, %v5349_v1  ;;  %v5352_v1 = vld [vmem:[#allocation25_spill] sm:$0xff] }
 0x604   : > { %v1950_v7 = vmul.f32 0.044715, %v1822_v21  ;;  %v2073_v14 = vmul.f32 0.7978846, %v2009_v58  ;;  %v2075_v57 = vmul.f32 0.7978846, %v2011_v36  ;;  %v4915_v41 = vadd.f32 %v5350_v13, %v4307_v26 }
 0x605   : > { %v1949_v18 = vmul.f32 0.044715, %v1821_v40  ;;  %v2076_v55 = vmul.f32 0.7978846, %v2012_v16  ;;  %v1823_v42 = vmul.f32 %v1759_v17, %v4902_v63  ;;  %v2173_v47 = vadd.f32 1.0, %v4647_v3 }
 0x606   : > { %5351 = vst [vmem:[#allocation33_spill] sm:$0xff] %v4915_v41  ;;  %v2014_v56 = vadd.f32 %v1950_v7, %v4881_v5  ;;  %3504 = vtanh.f32 %v2073_v14  ;;  %v2177_v52 = vadd.f32 1.0, %v4687_v15  ;;  %v1855_v58 = vmul.f32 0.5, %v5352_v1 }
 0x607   : > { %v2013_v21 = vadd.f32 %v1949_v18, %v4889_v30  ;;  %3506 = vtanh.f32 %v2075_v57  ;;  %v1951_v40 = vmul.f32 0.044715, %v1823_v42  ;;  %v2237_v43 = vmul.f32 %v2173_v47, %v1853_v22  ;;  %v5354_v18 = vld [vmem:[#allocation48_spill] sm:$0xff] }
 0x608   : > { %v2078_v36 = vmul.f32 0.7978846, %v2014_v56  ;;  %3508 = vtanh.f32 %v2076_v55  ;;  %v2241_v16 = vmul.f32 %v2177_v52, %v1857_v32  ;;  %v1859_v7 = vmul.f32 0.5, %v5353_v6  ;;  %v5356_v56 = vld [vmem:[#allocation22_spill] sm:$0xff] }
 0x609   : > { %v2077_v13 = vmul.f32 0.7978846, %v2013_v21  ;;  %v2015_v17 = vadd.f32 %v1951_v40, %v4902_v63  ;;  %v2175_v3 = vadd.f32 1.0, %v4653_v37  ;;  %v2179_v14 = vadd.f32 1.0, %v4706_v31 }
 0x60a   : > { %3510 = vtanh.f32 %v2078_v36  ;;  %v2293_v15 = vpack.c.bf16 %v2241_v16, %v2237_v43  ;;  %v1760_v57 = vmul.f32 %v4915_v41, %v4915_v41  ;;  %v4931_v22 = vadd.f32 %v5354_v18, %v4309_v48  ;;  %v5357_v43 = vld [vmem:[#allocation26_spill] sm:$0xff] }
 0x60b   : > { %3512 = vtanh.f32 %v2077_v13  ;;  %v4933_v55 = vpop.eup %3500  ;;  %v2079_v52 = vmul.f32 0.7978846, %v2015_v17  ;;  %v2239_v6 = vmul.f32 %v2175_v3, %v1855_v58  ;;  %v2243_v32 = vmul.f32 %v2179_v14, %v1859_v7  ;;  %v5358_v58 = vld [vmem:[#allocation23_spill] sm:$0xff] }
 0x60c   : > { %5355 = vst [vmem:[#allocation36_spill] sm:$0xff] %v4931_v22  ;;  %v1852_v42 = vmul.f32 0.5, %v5356_v56  ;;  %v4936_v47 = vpop.eup %3502  ;;  %2624 = vmatprep.mubr.bf16.mxu0 %v2293_v15  ;;  %v1824_v37 = vmul.f32 %v1760_v57, %v4915_v41  ;;  %v1762_v31 = vmul.f32 %v4931_v22, %v4931_v22  ;;  %v1856_v21 = vmul.f32 0.5, %v5357_v43  ;;  %v5359_v3 = vld [vmem:[#allocation27_spill] sm:$0xff]  ;;  %v5361_v56 = vld [vmem:[#allocation50_spill] sm:$0xff] }
 0x60d   : > { %v2172_v1 = vadd.f32 1.0, %v4631_v2  ;;  %3514 = vtanh.f32 %v2079_v52  ;;  %v2295_v36 = vpack.c.bf16 %v2243_v32, %v2239_v6  ;;  %v2176_v40 = vadd.f32 1.0, %v4656_v44  ;;  %v5360_v2 = vld [vmem:[#allocation49_spill] sm:$0xff] }
 0x60e   : > { %v1854_v13 = vmul.f32 0.5, %v5358_v58  ;;  %v1952_v16 = vmul.f32 0.044715, %v1824_v37  ;;  %v1826_v7 = vmul.f32 %v1762_v31, %v4931_v22  ;;  %v1858_v14 = vmul.f32 0.5, %v5359_v3  ;;  %v5362_v37 = vld [vmem:[#allocation53_spill] sm:$0xff] }
 0x60f   : > { %v2236_v17 = vmul.f32 %v2172_v1, %v1852_v42  ;;  %2721 = vmatprep.mubr.bf16.mxu1 %v2295_v36  ;;  %v2240_v15 = vmul.f32 %v2176_v40, %v1856_v21  ;;  %v2174_v57 = vadd.f32 1.0, %v4640_v34  ;;  %v2178_v18 = vadd.f32 1.0, %v4669_v38 }
 0x610   : > { %v4951_v52 = vadd.f32 %v5360_v2, %v4311_v23  ;;  %v4953_v6 = vpop.eup %3504  ;;  %v2016_v44 = vadd.f32 %v1952_v16, %v4915_v41  ;;  %v1954_v32 = vmul.f32 0.044715, %v1826_v7  ;;  %v4958_v42 = vadd.f32 %v5361_v56, %v4313_v4 }
 0x611   : > { %v4962_v31 = vadd.f32 %v5362_v37, %v4307_v26  ;;  %v4964_v34 = vpop.eup %3506  ;;  %v2292_v38 = vpack.c.bf16 %v2240_v15, %v2236_v17  ;;  %v2238_v43 = vmul.f32 %v2174_v57, %v1854_v13  ;;  %v2242_v21 = vmul.f32 %v2178_v18, %v1858_v14  ;;  %v5366_v14 = vld [vmem:[#allocation54_spill] sm:$0xff]  ;;  %v5367_v57 = vld [vmem:[#allocation55_spill] sm:$0xff] }
 0x612   : > { %v1761_v1 = vmul.f32 %v4951_v52, %v4951_v52  ;;  %v4968_v36 = vpop.eup %3508  ;;  %v2080_v40 = vmul.f32 0.7978846, %v2016_v44  ;;  %v2018_v58 = vadd.f32 %v1954_v32, %v4931_v22  ;;  %v1763_v16 = vmul.f32 %v4958_v42, %v4958_v42 }
 0x613   : > { %5363 = vst [vmem:[#allocation37_spill] sm:$0xff] %v4962_v31  ;;  %5364 = vst [vmem:[#allocation41_spill] sm:$0xff] %v4968_v36  ;;  %v1764_v7 = vmul.f32 %v4962_v31, %v4962_v31  ;;  %2625 = vmatmul.mubr.bf16.gmra.mrb[56].mxu0 %v2292_v38  ;;  %v2294_v17 = vpack.c.bf16 %v2242_v21, %v2238_v43  ;;  %v4980_v15 = vadd.f32 %v5366_v14, %v4309_v48  ;;  %v5368_v21 = vld [vmem:[#allocation56_spill] sm:$0xff] }
 0x614   : > { %v4975_v3 = vpop.eup %3510  ;;  %v1825_v13 = vmul.f32 %v1761_v1, %v4951_v52  ;;  %v4984_v18 = vadd.f32 %v5367_v57, %v4311_v23  ;;  %3516 = vtanh.f32 %v2080_v40  ;;  %v2082_v44 = vmul.f32 0.7978846, %v2018_v58  ;;  %v5369_v58 = vld [vmem:[#allocation38_spill] sm:$0xff] }
 0x615   : > { %5365 = vst [vmem:[#allocation42_spill] sm:$0xff] %v4975_v3  ;;  %v4986_v2 = vpop.eup %3512  ;;  %v1827_v32 = vmul.f32 %v1763_v16, %v4958_v42  ;;  %v1828_v56 = vmul.f32 %v1764_v7, %v4962_v31  ;;  %2722 = vmatmul.mubr.bf16.gmra.mrb[56].mxu1 %v2294_v17  ;;  %v1766_v38 = vmul.f32 %v4980_v15, %v4980_v15  ;;  %v1861_v57 = vmul.f32 0.5, %v5369_v58 }
 0x616   : > { %v1953_v37 = vmul.f32 0.044715, %v1825_v13  ;;  %v1765_v43 = vmul.f32 %v4984_v18, %v4984_v18  ;;  %v4996_v1 = vadd.f32 %v5368_v21, %v4313_v4  ;;  %3518 = vtanh.f32 %v2082_v44  ;;  %v5371_v44 = vld [vmem:[#allocation46_spill] sm:$0xff] }
 0x617   : > { %v1955_v14 = vmul.f32 0.044715, %v1827_v32  ;;  %v1956_v40 = vmul.f32 0.044715, %v1828_v56  ;;  %v4999_v16 = vpop.eup %3514  ;;  %v1830_v17 = vmul.f32 %v1766_v38, %v4980_v15  ;;  %v1865_v32 = vmul.f32 0.5, %v5371_v44 }
 0x618   : > { %5370 = vst [vmem:[#allocation44_spill] sm:$0xff] %v4999_v16  ;;  %v2017_v7 = vadd.f32 %v1953_v37, %v4951_v52  ;;  %v1829_v13 = vmul.f32 %v1765_v43, %v4984_v18  ;;  %v1767_v3 = vmul.f32 %v4996_v1, %v4996_v1  ;;  %v2181_v56 = vadd.f32 1.0, %v4727_v59 }
 0x619   : > { %v2019_v22 = vadd.f32 %v1955_v14, %v4958_v42  ;;  %v2020_v21 = vadd.f32 %v1956_v40, %v4962_v31  ;;  %v1958_v5 = vmul.f32 0.044715, %v1830_v17  ;;  %v2185_v43 = vadd.f32 1.0, %v4759_v45  ;;  %v5372_v31 = vld [vmem:[#allocation39_spill] sm:$0xff] }
 0x61a   : > { %v2081_v58 = vmul.f32 0.7978846, %v2017_v7  ;;  %v1957_v36 = vmul.f32 0.044715, %v1829_v13  ;;  %v1831_v37 = vmul.f32 %v1767_v3, %v4996_v1  ;;  %v2245_v16 = vmul.f32 %v2181_v56, %v1861_v57  ;;  %v5373_v7 = vld [vmem:[#allocation51_spill] sm:$0xff] }
 0x61b   : > { %v2083_v41 = vmul.f32 0.7978846, %v2019_v22  ;;  %v2084_v38 = vmul.f32 0.7978846, %v2020_v21  ;;  %v2022_v63 = vadd.f32 %v1958_v5, %v4980_v15  ;;  %v2249_v44 = vmul.f32 %v2185_v43, %v1865_v32  ;;  %v5375_v32 = vld [vmem:[#allocation58_spill] sm:$0xff] }
 0x61c   : > { %3520 = vtanh.f32 %v2081_v58  ;;  %v2021_v14 = vadd.f32 %v1957_v36, %v4984_v18  ;;  %v1959_v40 = vmul.f32 0.044715, %v1831_v37  ;;  %v1863_v59 = vmul.f32 0.5, %v5372_v31  ;;  %v5374_v36 = vld [vmem:[#allocation57_spill] sm:$0xff] }
 0x61d   : > { %3522 = vtanh.f32 %v2083_v41  ;;  %v1867_v17 = vmul.f32 0.5, %v5373_v7  ;;  %v2086_v13 = vmul.f32 0.7978846, %v2022_v63  ;;  %v2297_v45 = vpack.c.bf16 %v2249_v44, %v2245_v16  ;;  %v5376_v63 = vld [vmem:[#allocation34_spill] sm:$0xff]  ;;  %v5378_v7 = vld [vmem:[#allocation35_spill] sm:$0xff] }
 0x61e   : > { %3524 = vtanh.f32 %v2084_v38  ;;  %v2085_v3 = vmul.f32 0.7978846, %v2021_v14  ;;  %v2023_v22 = vadd.f32 %v1959_v40, %v4996_v1  ;;  %v5017_v21 = vpop.eup %3516  ;;  %v2183_v57 = vadd.f32 1.0, %v4732_v28  ;;  %v5377_v38 = vld [vmem:[#allocation40_spill] sm:$0xff] }
 0x61f   : > { %v2187_v5 = vadd.f32 1.0, %v4789_v54  ;;  %v5023_v41 = vadd.f32 %v5374_v36, %v4307_v26  ;;  %3526 = vtanh.f32 %v2086_v13  ;;  %v5027_v56 = vadd.f32 %v5375_v32, %v4309_v48  ;;  %2632 = vmatprep.mubr.bf16.mxu0 %v2297_v45 }
 0x620   : > { %v2087_v31 = vmul.f32 0.7978846, %v2023_v22  ;;  %v1860_v58 = vmul.f32 0.5, %v5376_v63  ;;  %v5030_v37 = vpop.eup %3518  ;;  %3528 = vtanh.f32 %v2085_v3  ;;  %v2247_v16 = vmul.f32 %v2183_v57, %v1863_v59  ;;  %v5379_v3 = vld [vmem:[#allocation43_spill] sm:$0xff] }
 0x621   : > { %v2251_v28 = vmul.f32 %v2187_v5, %v1867_v17  ;;  %v1768_v54 = vmul.f32 %v5023_v41, %v5023_v41  ;;  %v1770_v26 = vmul.f32 %v5027_v56, %v5027_v56  ;;  %v1864_v43 = vmul.f32 0.5, %v5377_v38 }
 0x622   : > { %3530 = vtanh.f32 %v2087_v31  ;;  %v2180_v48 = vadd.f32 1.0, %v4722_v49  ;;  %v2184_v44 = vadd.f32 1.0, %v4739_v0  ;;  %v1862_v13 = vmul.f32 0.5, %v5378_v7  ;;  %v5380_v49 = vld [vmem:[#allocation59_spill] sm:$0xff] }
 0x623   : > { %v2299_v14 = vpack.c.bf16 %v2251_v28, %v2247_v16  ;;  %v1832_v40 = vmul.f32 %v1768_v54, %v5023_v41  ;;  %v1834_v59 = vmul.f32 %v1770_v26, %v5027_v56  ;;  %v1866_v22 = vmul.f32 0.5, %v5379_v3  ;;  %v5381_v16 = vld [vmem:[#allocation60_spill] sm:$0xff] }
 0x624   : > { %v2244_v17 = vmul.f32 %v2180_v48, %v1860_v58  ;;  %v2182_v45 = vadd.f32 1.0, %v4724_v62  ;;  %v2248_v5 = vmul.f32 %v2184_v44, %v1864_v43  ;;  %v2186_v36 = vadd.f32 1.0, %v4745_v51 }
 0x625   : > { %2729 = vmatprep.mubr.bf16.mxu1 %v2299_v14  ;;  %v1960_v57 = vmul.f32 0.044715, %v1832_v40  ;;  %v5047_v31 = vadd.f32 %v5380_v49, %v4311_v23  ;;  %v1962_v0 = vmul.f32 0.044715, %v1834_v59  ;;  %v5053_v58 = vadd.f32 %v5381_v16, %v4313_v4 }
 0x626   : > { %v5049_v32 = vpop.eup %3520  ;;  %v2246_v63 = vmul.f32 %v2182_v45, %v1862_v13  ;;  %v1869_v28 = vmul.f32 0.5, %v4699_v46  ;;  %v2296_v26 = vpack.c.bf16 %v2248_v5, %v2244_v17  ;;  %v2250_v51 = vmul.f32 %v2186_v36, %v1866_v22 }
 0x627   : > { %v5056_v62 = vpop.eup %3522  ;;  %v2024_v54 = vadd.f32 %v1960_v57, %v5023_v41  ;;  %v1769_v23 = vmul.f32 %v5047_v31, %v5047_v31  ;;  %v2026_v43 = vadd.f32 %v1962_v0, %v5027_v56  ;;  %v1771_v48 = vmul.f32 %v5053_v58, %v5053_v58 }
 0x628   : > { %v5061_v38 = vpop.eup %3524  ;;  %v1873_v4 = vmul.f32 0.5, %v4757_v29  ;;  %v2189_v46 = vadd.f32 1.0, %v4812_v11  ;;  %2633 = vmatmul.mubr.bf16.gmra.mrb[60].mxu0 %v2296_v26  ;;  %v2298_v40 = vpack.c.bf16 %v2250_v51, %v2246_v63  ;;  %v2193_v7 = vadd.f32 1.0, %v4861_v35 }
 0x629   : > { %v2088_v14 = vmul.f32 0.7978846, %v2024_v54  ;;  %v1833_v44 = vmul.f32 %v1769_v23, %v5047_v31  ;;  %v5070_v13 = vpop.eup %3526  ;;  %v2090_v59 = vmul.f32 0.7978846, %v2026_v43  ;;  %v1835_v17 = vmul.f32 %v1771_v48, %v5053_v58 }
 0x62a   : > { %v2253_v3 = vmul.f32 %v2189_v46, %v1869_v28  ;;  %v1871_v22 = vmul.f32 0.5, %v4704_v50  ;;  %v5074_v45 = vpop.eup %3528  ;;  %2730 = vmatmul.mubr.bf16.gmra.mrb[60].mxu1 %v2298_v40  ;;  %v2257_v29 = vmul.f32 %v2193_v7, %v1873_v4  ;;  %v1875_v57 = vmul.f32 0.5, %v4764_v33  ;;  %v5382_v50 = vld [vmem:[#allocation52_spill] sm:$0xff] }
 0x62b   : > { %3532 = vtanh.f32 %v2088_v14  ;;  %v1961_v11 = vmul.f32 0.044715, %v1833_v44  ;;  %v1963_v35 = vmul.f32 0.044715, %v1835_v17  ;;  %v2191_v36 = vadd.f32 1.0, %v4816_v20 }
 0x62c   : > { %v5077_v5 = vpop.eup %3530  ;;  %3534 = vtanh.f32 %v2090_v59  ;;  %v2195_v49 = vadd.f32 1.0, %v4867_v9  ;;  %v2301_v63 = vpack.c.bf16 %v2257_v29, %v2253_v3  ;;  %v1868_v16 = vmul.f32 0.5, %v5382_v50  ;;  %v5383_v9 = vld [vmem:[#allocation61_spill] sm:$0xff]  ;;  %v5387_v50 = vld [vmem:[#allocation28_spill] sm:$0xff] }
 0x62d   : > { %v2025_v0 = vadd.f32 %v1961_v11, %v5047_v31  ;;  %v1872_v28 = vmul.f32 0.5, %v4737_v12  ;;  %v2027_v54 = vadd.f32 %v1963_v35, %v5053_v58  ;;  %v2255_v26 = vmul.f32 %v2191_v36, %v1871_v22  ;;  %v5384_v29 = vld [vmem:[#allocation21_spill] sm:$0xff]  ;;  %v5385_v36 = vld [vmem:[#allocation62_spill] sm:$0xff] }
 0x62e   : > { %v2259_v51 = vmul.f32 %v2195_v49, %v1875_v57  ;;  %v2188_v33 = vadd.f32 1.0, %v4801_v61  ;;  %2640 = vmatprep.mubr.bf16.mxu0 %v2301_v63  ;;  %v2192_v43 = vadd.f32 1.0, %v4842_v60  ;;  %v1870_v20 = vmul.f32 0.5, %v4674_v8  ;;  %v5386_v49 = vld [vmem:[#allocation64_spill] sm:$0xff] }
 0x62f   : > { %v2089_v23 = vmul.f32 0.7978846, %v2025_v0  ;;  %v1874_v48 = vmul.f32 0.5, %v5383_v9  ;;  %v2091_v4 = vmul.f32 0.7978846, %v2027_v54  ;;  %v2190_v40 = vadd.f32 1.0, %v4806_v24 }
 0x630   : > { %v2303_v46 = vpack.c.bf16 %v2259_v51, %v2255_v26  ;;  %v2252_v14 = vmul.f32 %v2188_v33, %v1868_v16  ;;  %v2256_v12 = vmul.f32 %v2192_v43, %v1872_v28  ;;  %v2194_v44 = vadd.f32 1.0, %v4847_v39  ;;  %v5389_v26 = vld [vmem:[#allocation65_spill] sm:$0xff]  ;;  %v5390_v33 = vld [vmem:[#allocation19_spill] sm:$0xff] }
 0x631   : > { %3536 = vtanh.f32 %v2089_v23  ;;  %v1877_v7 = vmul.f32 0.5, %v4779_v10  ;;  %v2254_v61 = vmul.f32 %v2190_v40, %v1870_v20  ;;  %v1881_v60 = vmul.f32 0.5, %v4855_v19 }
 0x632   : > { %3538 = vtanh.f32 %v2091_v4  ;;  %2737 = vmatprep.mubr.bf16.mxu1 %v2303_v46  ;;  %v2197_v8 = vadd.f32 1.0, %v4891_v27  ;;  %v2300_v59 = vpack.c.bf16 %v2256_v12, %v2252_v14  ;;  %v2258_v17 = vmul.f32 %v2194_v44, %v1874_v48 }
 0x633   : > { %v2201_v3 = vadd.f32 1.0, %v4953_v6  ;;  %v1879_v22 = vmul.f32 0.5, %v4787_v53  ;;  %v1883_v11 = vmul.f32 0.5, %v4859_v25  ;;  %v2199_v39 = vadd.f32 1.0, %v5384_v29 }
 0x634   : > { %v2261_v24 = vmul.f32 %v2197_v8, %v1877_v7  ;;  %v2203_v10 = vadd.f32 1.0, %v4964_v34  ;;  %2641 = vmatmul.mubr.bf16.gmra.mrb[64].mxu0 %v2300_v59  ;;  %v2302_v35 = vpack.c.bf16 %v2258_v17, %v2254_v61  ;;  %v1876_v27 = vmul.f32 0.5, %v5385_v36  ;;  %v5388_v34 = vld [vmem:[#allocation63_spill] sm:$0xff]  ;;  %v5391_v7 = vld [vmem:[#allocation29_spill] sm:$0xff] }
 0x635   : > { %v5099_v57 = vpop.eup %3532  ;;  %v2265_v19 = vmul.f32 %v2201_v3, %v1881_v60  ;;  %v1880_v0 = vmul.f32 0.5, %v5386_v49  ;;  %v2263_v6 = vmul.f32 %v2199_v39, %v1879_v22  ;;  %v2196_v16 = vadd.f32 1.0, %v5387_v50  ;;  %v5397_v49 = vld [vmem:[#allocation36_spill] sm:$0xff] }
 0x636   : > { %v5103_v63 = vpop.eup %3534  ;;  %v2267_v53 = vmul.f32 %v2203_v10, %v1883_v11  ;;  %v2200_v25 = vadd.f32 1.0, %v4933_v55  ;;  %2738 = vmatmul.mubr.bf16.gmra.mrb[64].mxu1 %v2302_v35  ;;  %v1878_v54 = vmul.f32 0.5, %v5388_v34  ;;  %v1882_v51 = vmul.f32 0.5, %v5389_v26  ;;  %v5394_v11 = vld [vmem:[#allocation33_spill] sm:$0xff] }
 0x637   : > { %v2305_v28 = vpack.c.bf16 %v2265_v19, %v2261_v24  ;;  %v2198_v23 = vadd.f32 1.0, %v5390_v33  ;;  %v2260_v20 = vmul.f32 %v2196_v16, %v1876_v27  ;;  %v2202_v48 = vadd.f32 1.0, %v4936_v47  ;;  %v5392_v47 = vld [vmem:[#allocation44_spill] sm:$0xff]  ;;  %v5395_v10 = vld [vmem:[#allocation41_spill] sm:$0xff] }
 0x638   : > { %v2307_v43 = vpack.c.bf16 %v2267_v53, %v2263_v6  ;;  %v2264_v9 = vmul.f32 %v2200_v25, %v1880_v0  ;;  %v1885_v46 = vmul.f32 0.5, %v4889_v30  ;;  %v1889_v14 = vmul.f32 0.5, %v4951_v52  ;;  %v5393_v24 = vld [vmem:[#allocation20_spill] sm:$0xff] }
 0x639   : > { %2648 = vmatprep.mubr.bf16.mxu0 %v2305_v28  ;;  %v2262_v4 = vmul.f32 %v2198_v23, %v1878_v54  ;;  %v2205_v55 = vadd.f32 1.0, %v4986_v2  ;;  %v2266_v12 = vmul.f32 %v2202_v48, %v1882_v51  ;;  %v2209_v44 = vadd.f32 1.0, %v5049_v32 }
 0x63a   : > { %2745 = vmatprep.mubr.bf16.mxu1 %v2307_v43  ;;  %v2304_v40 = vpack.c.bf16 %v2264_v9, %v2260_v20  ;;  %v1887_v61 = vmul.f32 0.5, %v5391_v7  ;;  %v1891_v59 = vmul.f32 0.5, %v4958_v42  ;;  %v2207_v17 = vadd.f32 1.0, %v5392_v47  ;;  %v5396_v42 = vld [vmem:[#allocation31_spill] sm:$0xff]  ;;  %v3557_v47 = vld [vmem:[%s3671_s11] sm:$0xff] }
 0x63b   : > { %v3537_v60 = vpop.eup %3536  ;;  %v2269_v8 = vmul.f32 %v2205_v55, %v1885_v46  ;;  %v2211_v3 = vadd.f32 1.0, %v5056_v62  ;;  %v2306_v22 = vpack.c.bf16 %v2266_v12, %v2262_v4  ;;  %v2273_v52 = vmul.f32 %v2209_v44, %v1889_v14  ;;  %v5398_v62 = vld [vmem:[#allocation42_spill] sm:$0xff]  ;;  %v5399_v46 = vld [vmem:[#allocation37_spill] sm:$0xff] }
 0x63c   : > { %v3539_v30 = vpop.eup %3538  ;;  %v1884_v2 = vmul.f32 0.5, %v5393_v24  ;;  %v1888_v29 = vmul.f32 0.5, %v5394_v11  ;;  %2649 = vmatmul.mubr.bf16.gmra.mrb[68].mxu0 %v2304_v40  ;;  %v2271_v39 = vmul.f32 %v2207_v17, %v1887_v61  ;;  %v2204_v35 = vadd.f32 1.0, %v5395_v10 }
 0x63d   : > { %v2275_v32 = vmul.f32 %v2211_v3, %v1891_v59  ;;  %v2208_v19 = vadd.f32 1.0, %v5017_v21  ;;  %v2309_v36 = vpack.c.bf16 %v2273_v52, %v2269_v8  ;;  %v1886_v27 = vmul.f32 0.5, %v5396_v42 }
 0x63e   : > { %v1890_v0 = vmul.f32 0.5, %v5397_v49  ;;  %v2206_v6 = vadd.f32 1.0, %v5398_v62  ;;  %2746 = vmatmul.mubr.bf16.gmra.mrb[68].mxu1 %v2306_v22  ;;  %v2268_v50 = vmul.f32 %v2204_v35, %v1884_v2  ;;  %v2210_v25 = vadd.f32 1.0, %v5030_v37 }
 0x63f   : > { %v2311_v53 = vpack.c.bf16 %v2275_v32, %v2271_v39  ;;  %v2272_v16 = vmul.f32 %v2208_v19, %v1888_v29  ;;  %2656 = vmatprep.mubr.bf16.mxu0 %v2309_v36  ;;  %v1893_v34 = vmul.f32 0.5, %v4984_v18  ;;  %v1897_v54 = vmul.f32 0.5, %v5047_v31  ;;  %v5401_v19 = vld [vmem:[#allocation3_spill] sm:$0xff] }
 0x640   : > { %v2270_v28 = vmul.f32 %v2206_v6, %v1886_v27  ;;  %v2213_v21 = vadd.f32 1.0, %v5074_v45  ;;  %v2274_v51 = vmul.f32 %v2210_v25, %v1890_v0  ;;  %v2217_v33 = vadd.f32 1.0, %v3537_v60  ;;  %v5402_v27 = vld [vmem:[#allocation4_spill] sm:$0xff] }
 0x641   : > { %2753 = vmatprep.mubr.bf16.mxu1 %v2311_v53  ;;  %v2308_v26 = vpack.c.bf16 %v2272_v16, %v2268_v50  ;;  %v1895_v23 = vmul.f32 0.5, %v4996_v1  ;;  %v1899_v20 = vmul.f32 0.5, %v5053_v58  ;;  %v2215_v9 = vadd.f32 1.0, %v5077_v5 }
 0x642   : > { %v2277_v43 = vmul.f32 %v2213_v21, %v1893_v34  ;;  %v2219_v37 = vadd.f32 1.0, %v3539_v30  ;;  %v2310_v48 = vpack.c.bf16 %v2274_v51, %v2270_v28  ;;  %v2281_v4 = vmul.f32 %v2217_v33, %v1897_v54 }
 0x643   : > { %v1892_v18 = vmul.f32 0.5, %v5399_v46  ;;  %v1896_v31 = vmul.f32 0.5, %v5023_v41  ;;  %v2279_v14 = vmul.f32 %v2215_v9, %v1895_v23  ;;  %v2212_v55 = vadd.f32 1.0, %v5061_v38 }
 0x644   : > { %v2283_v45 = vmul.f32 %v2219_v37, %v1899_v20  ;;  %v2216_v40 = vadd.f32 1.0, %v5099_v57  ;;  %2657 = vmatmul.mubr.bf16.gmra.mrb[72].mxu0 %v2308_v26  ;;  %v2313_v1 = vpack.c.bf16 %v2281_v4, %v2277_v43  ;;  %v1894_v12 = vmul.f32 0.5, %v4980_v15  ;;  %v5400_v15 = vld [vmem:[#allocation2_spill] sm:$0xff]  ;;  %v5403_v43 = vld [vmem:[#allocation5_spill] sm:$0xff] }
 0x645   : > { %v1898_v58 = vmul.f32 0.5, %v5027_v56  ;;  %v2214_v5 = vadd.f32 1.0, %v5070_v13  ;;  %v2276_v7 = vmul.f32 %v2212_v55, %v1892_v18  ;;  %v2218_v41 = vadd.f32 1.0, %v5103_v63  ;;  %v5404_v37 = vld [vmem:[#allocation6_spill] sm:$0xff] }
 0x646   : > { %v2315_v44 = vpack.c.bf16 %v2283_v45, %v2279_v14  ;;  %v2280_v61 = vmul.f32 %v2216_v40, %v1896_v31  ;;  %2754 = vmatmul.mubr.bf16.gmra.mrb[72].mxu1 %v2310_v48  ;;  %2664 = vmatprep.mubr.bf16.mxu0 %v2313_v1  ;;  %v2382_v59 = vsub.s32 5, %v5400_v15 }
 0x647   : > { %v2278_v60 = vmul.f32 %v2214_v5, %v1894_v12  ;;  %v2282_v57 = vmul.f32 %v2218_v41, %v1898_v58  ;;  %v5405_v41 = vld [vmem:[#allocation7_spill] sm:$0xff] }
 0x648   : > { %2761 = vmatprep.mubr.bf16.mxu1 %v2315_v44  ;;  %v2312_v38 = vpack.c.bf16 %v2280_v61, %v2276_v7  ;;  %v5143_v13 = vrot.slane %v3557_v47, %v2382_v59 }
 0x649   : > { %v2314_v8 = vpack.c.bf16 %v2282_v57, %v2278_v60  ;;  %v5406_v57 = vld [vmem:[#allocation8_spill] sm:$0xff] }
 0x64c   : > { %2665 = vmatmul.mubr.bf16.gmra.mrb[76].mxu0 %v2312_v38 }
 0x64e   : > { %2762 = vmatmul.mubr.bf16.gmra.mrb[76].mxu1 %v2314_v8 }
 0x6b9   : > { %v3075_v56 = vpop.f32.mrb[48].mxu0 }
 0x6ba   : > { %v3076_v17 = vpop.f32.mrb[49].mxu0 }
 0x6bb   : > { %v3139_v3 = vpop.f32.mrb[48].mxu1  ;;  %v3077_v30 = vadd.f32 %v3076_v17, %v3075_v56  ;;  %v3078_v63 = vpop.f32.mrb[50].mxu0 }
 0x6bc   : > { %v3140_v22 = vpop.f32.mrb[49].mxu1  ;;  %v3079_v52 = vpop.f32.mrb[51].mxu0 }
 0x6bd   : > { %v2611_v24 = vadd.f32 %v3077_v30, %v5143_v13  ;;  %v3141_v2 = vadd.f32 %v3140_v22, %v3139_v3  ;;  %v3142_v11 = vpop.f32.mrb[50].mxu1  ;;  %v3080_v29 = vadd.f32 %v3079_v52, %v3078_v63 }
 0x6be   : > { %v3143_v39 = vpop.f32.mrb[51].mxu1 }
 0x6bf   : > { %v2708_v32 = vadd.f32 %v3141_v2, %v2611_v24  ;;  %v2614_v10 = vadd.f32 %v3080_v29, %v5143_v13  ;;  %v3144_v35 = vadd.f32 %v3143_v39, %v3142_v11 }
 0x6c1   : > { %v2770_v36 = vadd.f32 %v2708_v32, %v5401_v19  ;;  %v2711_v42 = vadd.f32 %v3144_v35, %v2614_v10  ;;  %v5407_v32 = vld [vmem:[#allocation9_spill] sm:$0xff]  ;;  %v5408_v19 = vld [vmem:[#allocation10_spill] sm:$0xff] }
 0x6c3   : > { %2786 = vst [vmem:[%s3701_s15] sm:$0xff] %v2770_v36  ;;  %v2771_v49 = vadd.f32 %v2711_v42, %v5402_v27 }
 0x6c5   : > { %2787 = vst [vmem:[%s3701_s15 + $0x8] sm:$0xff] %v2771_v49 }
 0x6d0   : > { %v3081_v0 = vpop.f32.mrb[52].mxu0 }
 0x6d1   : > { %v3082_v62 = vpop.f32.mrb[53].mxu0 }
 0x6d2   : > { %v3083_v53 = vadd.f32 %v3082_v62, %v3081_v0  ;;  %v3084_v50 = vpop.f32.mrb[54].mxu0 }
 0x6d3   : > { %v3145_v6 = vpop.f32.mrb[52].mxu1  ;;  %v3085_v25 = vpop.f32.mrb[55].mxu0 }
 0x6d4   : > { %v3146_v16 = vpop.f32.mrb[53].mxu1  ;;  %v2619_v28 = vadd.f32 %v3083_v53, %v5143_v13  ;;  %v3086_v21 = vadd.f32 %v3085_v25, %v3084_v50 }
 0x6d5   : > { %v3147_v34 = vadd.f32 %v3146_v16, %v3145_v6  ;;  %v3148_v54 = vpop.f32.mrb[54].mxu1 }
 0x6d6   : > { %v3149_v26 = vpop.f32.mrb[55].mxu1  ;;  %v2622_v33 = vadd.f32 %v3086_v21, %v5143_v13 }
 0x6d7   : > { %v2716_v51 = vadd.f32 %v3147_v34, %v2619_v28  ;;  %v3150_v23 = vadd.f32 %v3149_v26, %v3148_v54 }
 0x6d9   : > { %v2772_v20 = vadd.f32 %v2716_v51, %v5403_v43  ;;  %v2719_v9 = vadd.f32 %v3150_v23, %v2622_v33  ;;  %v5409_v51 = vld [vmem:[#allocation11_spill] sm:$0xff] }
 0x6db   : > { %2788 = vst [vmem:[%s3701_s15 + $0x10] sm:$0xff] %v2772_v20  ;;  %v2773_v48 = vadd.f32 %v2719_v9, %v5404_v37  ;;  %v5410_v9 = vld [vmem:[#allocation12_spill] sm:$0xff] }
 0x6dd   : > { %2789 = vst [vmem:[%s3701_s15 + $0x18] sm:$0xff] %v2773_v48 }
 0x6e6   : > { %v3087_v4 = vpop.f32.mrb[56].mxu0 }
 0x6e7   : > { %v3088_v46 = vpop.f32.mrb[57].mxu0 }
 0x6e8   : > { %v3151_v18 = vpop.f32.mrb[56].mxu1  ;;  %v3089_v31 = vadd.f32 %v3088_v46, %v3087_v4  ;;  %v3090_v14 = vpop.f32.mrb[58].mxu0 }
 0x6e9   : > { %v3152_v45 = vpop.f32.mrb[57].mxu1  ;;  %v3091_v55 = vpop.f32.mrb[59].mxu0 }
 0x6ea   : > { %v2627_v40 = vadd.f32 %v3089_v31, %v5143_v13  ;;  %v3153_v1 = vadd.f32 %v3152_v45, %v3151_v18  ;;  %v3154_v12 = vpop.f32.mrb[58].mxu1  ;;  %v3092_v58 = vadd.f32 %v3091_v55, %v3090_v14 }
 0x6eb   : > { %v3155_v5 = vpop.f32.mrb[59].mxu1 }
 0x6ec   : > { %v2724_v44 = vadd.f32 %v3153_v1, %v2627_v40  ;;  %v2630_v7 = vadd.f32 %v3092_v58, %v5143_v13  ;;  %v3156_v61 = vadd.f32 %v3155_v5, %v3154_v12 }
 0x6ee   : > { %v2774_v38 = vadd.f32 %v2724_v44, %v5405_v41  ;;  %v2727_v60 = vadd.f32 %v3156_v61, %v2630_v7  ;;  %v5411_v44 = vld [vmem:[#allocation13_spill] sm:$0xff] }
 0x6f0   : > { %2790 = vst [vmem:[%s3701_s15 + $0x20] sm:$0xff] %v2774_v38  ;;  %v2775_v8 = vadd.f32 %v2727_v60, %v5406_v57  ;;  %v5412_v60 = vld [vmem:[#allocation14_spill] sm:$0xff] }
 0x6f2   : > { %2791 = vst [vmem:[%s3701_s15 + $0x28] sm:$0xff] %v2775_v8 }
 0x6fb   : > { %v3093_v15 = vpop.f32.mrb[60].mxu0 }
 0x6fc   : > { %v3094_v59 = vpop.f32.mrb[61].mxu0 }
 0x6fd   : > { %v3157_v56 = vpop.f32.mrb[60].mxu1  ;;  %v3095_v47 = vadd.f32 %v3094_v59, %v3093_v15  ;;  %v3096_v17 = vpop.f32.mrb[62].mxu0 }
 0x6fe   : > { %v3158_v3 = vpop.f32.mrb[61].mxu1  ;;  %v3097_v30 = vpop.f32.mrb[63].mxu0 }
 0x6ff   : > { %v2635_v63 = vadd.f32 %v3095_v47, %v5143_v13  ;;  %v3159_v22 = vadd.f32 %v3158_v3, %v3157_v56  ;;  %v3160_v52 = vpop.f32.mrb[62].mxu1  ;;  %v3098_v24 = vadd.f32 %v3097_v30, %v3096_v17 }
 0x700   : > { %v3161_v2 = vpop.f32.mrb[63].mxu1 }
 0x701   : > { %v2732_v11 = vadd.f32 %v3159_v22, %v2635_v63  ;;  %v2638_v29 = vadd.f32 %v3098_v24, %v5143_v13  ;;  %v3162_v39 = vadd.f32 %v3161_v2, %v3160_v52 }
 0x703   : > { %v2776_v10 = vadd.f32 %v2732_v11, %v5407_v32  ;;  %v2735_v35 = vadd.f32 %v3162_v39, %v2638_v29  ;;  %v5413_v11 = vld [vmem:[#allocation15_spill] sm:$0xff] }
 0x705   : > { %2792 = vst [vmem:[%s3701_s15 + $0x30] sm:$0xff] %v2776_v10  ;;  %v2777_v36 = vadd.f32 %v2735_v35, %v5408_v19  ;;  %v5414_v35 = vld [vmem:[#allocation16_spill] sm:$0xff] }
 0x707   : > { %2793 = vst [vmem:[%s3701_s15 + $0x38] sm:$0xff] %v2777_v36  ;;  %v3099_v42 = vpop.f32.mrb[64].mxu0 }
 0x708   : > { %v3100_v27 = vpop.f32.mrb[65].mxu0 }
 0x709   : > { %v3163_v49 = vpop.f32.mrb[64].mxu1  ;;  %v3101_v0 = vadd.f32 %v3100_v27, %v3099_v42  ;;  %v3102_v62 = vpop.f32.mrb[66].mxu0 }
 0x70a   : > { %v3164_v6 = vpop.f32.mrb[65].mxu1  ;;  %v3103_v53 = vpop.f32.mrb[67].mxu0 }
 0x70b   : > { %v2643_v50 = vadd.f32 %v3101_v0, %v5143_v13  ;;  %v3165_v16 = vadd.f32 %v3164_v6, %v3163_v49  ;;  %v3166_v25 = vpop.f32.mrb[66].mxu1  ;;  %v3104_v28 = vadd.f32 %v3103_v53, %v3102_v62 }
 0x70c   : > { %v3167_v34 = vpop.f32.mrb[67].mxu1 }
 0x70d   : > { %v2740_v54 = vadd.f32 %v3165_v16, %v2643_v50  ;;  %v2646_v21 = vadd.f32 %v3104_v28, %v5143_v13  ;;  %v3168_v26 = vadd.f32 %v3167_v34, %v3166_v25 }
 0x70f   : > { %v2778_v33 = vadd.f32 %v2740_v54, %v5409_v51  ;;  %v2743_v23 = vadd.f32 %v3168_v26, %v2646_v21  ;;  %v3105_v43 = vpop.f32.mrb[68].mxu0  ;;  %v5415_v54 = vld [vmem:[#allocation17_spill] sm:$0xff]  ;;  %v5416_v51 = vld [vmem:[#allocation18_spill] sm:$0xff] }
 0x710   : > { %v3106_v20 = vpop.f32.mrb[69].mxu0 }
 0x711   : > { %3042 = vst [vmem:[%s3701_s15 + $0x40] sm:$0xff] %v2778_v33  ;;  %v2779_v37 = vadd.f32 %v2743_v23, %v5410_v9  ;;  %v3169_v48 = vpop.f32.mrb[68].mxu1  ;;  %v3107_v4 = vadd.f32 %v3106_v20, %v3105_v43  ;;  %v3108_v46 = vpop.f32.mrb[70].mxu0 }
 0x712   : > { %v3170_v18 = vpop.f32.mrb[69].mxu1  ;;  %v3109_v31 = vpop.f32.mrb[71].mxu0 }
 0x713   : > { %3043 = vst [vmem:[%s3701_s15 + $0x48] sm:$0xff] %v2779_v37  ;;  %v2651_v14 = vadd.f32 %v3107_v4, %v5143_v13  ;;  %v3171_v45 = vadd.f32 %v3170_v18, %v3169_v48  ;;  %v3172_v55 = vpop.f32.mrb[70].mxu1  ;;  %v3110_v40 = vadd.f32 %v3109_v31, %v3108_v46 }
 0x714   : > { %v3173_v1 = vpop.f32.mrb[71].mxu1 }
 0x715   : > { %v2748_v12 = vadd.f32 %v3171_v45, %v2651_v14  ;;  %v2654_v58 = vadd.f32 %v3110_v40, %v5143_v13  ;;  %v3174_v5 = vadd.f32 %v3173_v1, %v3172_v55 }
 0x717   : > { %v2780_v7 = vadd.f32 %v2748_v12, %v5411_v44  ;;  %v2751_v61 = vadd.f32 %v3174_v5, %v2654_v58  ;;  %v3111_v41 = vpop.f32.mrb[72].mxu0 }
 0x718   : > { %v3112_v38 = vpop.f32.mrb[73].mxu0 }
 0x719   : > { %3044 = vst [vmem:[%s3701_s15 + $0x50] sm:$0xff] %v2780_v7  ;;  %v2781_v57 = vadd.f32 %v2751_v61, %v5412_v60  ;;  %v3175_v8 = vpop.f32.mrb[72].mxu1  ;;  %v3113_v15 = vadd.f32 %v3112_v38, %v3111_v41  ;;  %v3114_v59 = vpop.f32.mrb[74].mxu0 }
 0x71a   : > { %v3176_v56 = vpop.f32.mrb[73].mxu1  ;;  %v3115_v47 = vpop.f32.mrb[75].mxu0 }
 0x71b   : > { %3045 = vst [vmem:[%s3701_s15 + $0x58] sm:$0xff] %v2781_v57  ;;  %v2659_v17 = vadd.f32 %v3113_v15, %v5143_v13  ;;  %v3177_v3 = vadd.f32 %v3176_v56, %v3175_v8  ;;  %v3178_v30 = vpop.f32.mrb[74].mxu1  ;;  %v3116_v63 = vadd.f32 %v3115_v47, %v3114_v59 }
 0x71c   : > { %v3179_v22 = vpop.f32.mrb[75].mxu1 }
 0x71d   : > { %v2756_v52 = vadd.f32 %v3177_v3, %v2659_v17  ;;  %v2662_v24 = vadd.f32 %v3116_v63, %v5143_v13  ;;  %v3180_v2 = vadd.f32 %v3179_v22, %v3178_v30 }
 0x71f   : > { %v2782_v29 = vadd.f32 %v2756_v52, %v5413_v11  ;;  %v2759_v39 = vadd.f32 %v3180_v2, %v2662_v24  ;;  %v3117_v32 = vpop.f32.mrb[76].mxu0 }
 0x720   : > { %v3118_v10 = vpop.f32.mrb[77].mxu0 }
 0x721   : > { %3046 = vst [vmem:[%s3701_s15 + $0x60] sm:$0xff] %v2782_v29  ;;  %v2783_v19 = vadd.f32 %v2759_v39, %v5414_v35  ;;  %v3181_v36 = vpop.f32.mrb[76].mxu1  ;;  %v3119_v42 = vadd.f32 %v3118_v10, %v3117_v32  ;;  %v3120_v27 = vpop.f32.mrb[78].mxu0 }
 0x722   : > { %v3182_v49 = vpop.f32.mrb[77].mxu1  ;;  %v3121_v0 = vpop.f32.mrb[79].mxu0 }
 0x723   : > { %3047 = vst [vmem:[%s3701_s15 + $0x68] sm:$0xff] %v2783_v19  ;;  %v2667_v62 = vadd.f32 %v3119_v42, %v5143_v13  ;;  %v3183_v6 = vadd.f32 %v3182_v49, %v3181_v36  ;;  %v3184_v53 = vpop.f32.mrb[78].mxu1  ;;  %v3122_v50 = vadd.f32 %v3121_v0, %v3120_v27 }
 0x724   : > { %v3185_v16 = vpop.f32.mrb[79].mxu1 }
 0x725   : > { %v2764_v25 = vadd.f32 %v3183_v6, %v2667_v62  ;;  %v2670_v28 = vadd.f32 %v3122_v50, %v5143_v13  ;;  %v3186_v34 = vadd.f32 %v3185_v16, %v3184_v53 }
 0x727   : > { %v2784_v21 = vadd.f32 %v2764_v25, %v5415_v54  ;;  %v2767_v26 = vadd.f32 %v3186_v34, %v2670_v28 }
 0x729   : > { %3048 = vst [vmem:[%s3701_s15 + $0x70] sm:$0xff] %v2784_v21  ;;  %v2785_v33 = vadd.f32 %v2767_v26, %v5416_v51 }
 0x72b   : > { %3049 = vst [vmem:[%s3701_s15 + $0x78] sm:$0xff] %v2785_v33 }
 0x72c PF: > { %s16_s25 = sadd.s32 1, %s3596_s25   ;;  %s5417_s21 = smov %s3588_s23 }
 0x72d   : > { %p13_p8 = scmp.ge.s32.totalorder %s16_s25, 6   ;;  %s5418_s22 = smov %s3592_s24 }
 0x72e   : > { %s5419_s23 = smov %s5422_s26  ;;  %s5420_s24 = smov %s5426_s27 }
 0x72f   :  { %15 = sbr.rel (!%p13_p8) target bundleno = 3 (0x3), region = 94 }

</bundles_post_ra>
